<compile_context>
chip_gen: v6e
topology: v6e:2x2x1
jax: 0.10.0
libtpu: 0.0.40
codegen_flags: <defaults>
</compile_context>

<pallas_src>
import jax
import jax.numpy as jnp
from jax.experimental import pallas as pl
from jax.experimental.pallas import tpu as pltpu

# ----------------------------- small "encoder_kwargs" config ----------------------------
IN_FEATURES = 32      # feature-extractor output dim fed to the encoder
EMBED_DIM   = 64
NUM_HEADS   = 4
HEAD_DIM    = EMBED_DIM // NUM_HEADS
FFN_DIM     = 128
NUM_LAYERS  = 2
CONV_KERNEL = 3       # odd -> no trailing-sample removal (num_remove == 0)
CONV_GROUPS = 4
CONV_PAD    = CONV_KERNEL // 2
LN_EPS      = 1e-5
MASK_VALUE  = -10000.0       # torchaudio Encoder._preprocess mask value
HEAD_MASK   = -1e9           # cross-head block mask for packed attention (exp -> 0)
MXU_DTYPE   = jnp.bfloat16   # matmul operand dtype (f32 accumulation everywhere)
LANES       = 128

# Order of weight arrays fed to the fused kernel (must match kernel signature).
WEIGHT_NAMES = (
    "fp_ln_g", "fp_ln_b", "fp_w", "fp_b",
    "conv_w", "conv_b",
    "qkv_w", "qkv_b", "o_w", "o_b",
    "ln1_g", "ln1_b", "ff1_w", "ff1_b", "ff2_w", "ff2_b",
    "ln2_g", "ln2_b",
    "final_ln_g", "final_ln_b",
)


# ------------------------------- in-kernel helpers ---------------------------------------
def _layernorm(x, g, b):
    """Centered-variance LayerNorm in f32 (avoids E[x^2]-E[x]^2 cancellation)."""
    mean = jnp.mean(x, axis=-1, keepdims=True)
    d = x - mean
    var = jnp.mean(d * d, axis=-1, keepdims=True)
    return d * jax.lax.rsqrt(var + LN_EPS) * g + b


def _mm(x, w):
    """bf16 MXU matmul with f32 accumulation (w is already MXU_DTYPE)."""
    return jnp.dot(x.astype(MXU_DTYPE), w, preferred_element_type=jnp.float32)


# --------------------------------- fused encoder kernel ----------------------------------
def _encoder_kernel(lens_ref, feats_ref,
                    fp_ln_g, fp_ln_b, fp_w, fp_b,
                    conv_w, conv_b,
                    qkv_w, qkv_b, o_w, o_b,
                    ln1_g, ln1_b, ff1_w, ff1_b, ff2_w, ff2_b,
                    ln2_g, ln2_b,
                    final_ln_g, final_ln_b,
                    head_mask_ref,
                    out_ref):
    b = pl.program_id(0)
    valid_len = lens_ref[b]                         # SMEM scalar (sequence length)
    T = feats_ref.shape[1]
    C = EMBED_DIM
    H = NUM_HEADS
    Dh = HEAD_DIM

    # Padding masks built once per grid step from the prefetched length scalar.
    row_idx = jax.lax.broadcasted_iota(jnp.int32, (T, 1), 0)
    valid_rows = row_idx < valid_len                                       # (T, 1) bool
    key_idx = jax.lax.broadcasted_iota(jnp.int32, (1, T), 1)
    key_bias = jnp.where(key_idx < valid_len, 0.0, MASK_VALUE).astype(jnp.float32)  # (1, T)
    # Packed key-pad bias (heads tiled along the packed key axis) + block-diag head mask
    # (head mask is a hoisted constant built in the wrapper, not rebuilt per step).
    attn_mask = head_mask_ref[...] + jnp.concatenate([key_bias] * H, axis=1)  # (H*T, H*T)

    # ---------------- FeatureProjection: LayerNorm -> Linear ----------------
    f = feats_ref[0].astype(jnp.float32)                                    # (T, F)
    f = _layernorm(f, fp_ln_g[...], fp_ln_b[...])
    x = _mm(f, fp_w[...]) + fp_b[...]                                       # (T, C) f32

    # zero padded frames (torchaudio Encoder._preprocess: x[mask] = 0)
    x = jnp.where(valid_rows, x, 0.0)

    # ---------------- convolutional positional embedding --------------------
    # Grouped Conv1d (dense block-diagonal weight, flattened to (K*C, C) at init).
    # The K shifted copies are built with pltpu.roll (XLU) + a (T,1) halo row-mask,
    # lane-concatenated and contracted in a single 192-deep MXU matmul.
    shifts = []
    for k in range(CONV_KERNEL):                                            # tiny, unrolled
        d = k - CONV_PAD
        if d == 0:
            shifts.append(x)
        else:
            xs = pltpu.roll(x, shift=(-d) % T, axis=0)                      # xs[t] = x[(t+d)%T]
            halo_ok = (row_idx + d >= 0) & (row_idx + d < T)                # (T, 1)
            shifts.append(jnp.where(halo_ok, xs, 0.0))
    xs_cat = jnp.concatenate(shifts, axis=1)                                # (T, K*C)
    conv = _mm(xs_cat, conv_w[...]) + conv_b[...]                           # (T, C)
    # TODO(synk): torch F.gelu is exact (erf); tanh approximation used for Mosaic lowering.
    x = x + jax.nn.gelu(conv, approximate=True)

    # ---------------- post-norm transformer layers (layer_norm_first=False) --
    for l in range(NUM_LAYERS):
        # Fused QKV projection; 1/sqrt(Dh) already folded into the Q weights/bias.
        qkv = _mm(x, qkv_w[l]) + qkv_b[l]                                   # (T, 3C) f32
        qkv_mx = qkv.astype(MXU_DTYPE)                                      # single cast/layer

        # Pack heads along the sublane axis: (H*T, Dh); row h*T + t = head h, time t.
        def pack(base):
            return jnp.concatenate(
                [qkv_mx[:, base + h * Dh: base + (h + 1) * Dh] for h in range(H)], axis=0)
        qp, kp, vp = pack(0), pack(C), pack(2 * C)                          # (H*T, Dh) bf16

        # One block-diagonal score matmul + one softmax for all heads.
        s = jax.lax.dot_general(qp, kp, (((1,), (1,)), ((), ())),
                                preferred_element_type=jnp.float32)         # (H*T, H*T)
        s = s + attn_mask                                                   # head block + key pad
        s = s - jnp.max(s, axis=-1, keepdims=True)
        p = jnp.exp(s)
        denom = jnp.sum(p, axis=-1, keepdims=True)
        # approx reciprocal (EUP slot); for strict parity testing use exact division first.
        p = p * pl.reciprocal(denom, approx=True)
        pv = jnp.dot(p.astype(MXU_DTYPE), vp,
                     preferred_element_type=jnp.float32)                    # (H*T, Dh)
        # Unpack heads back to (T, C) and apply the output projection once.
        ctx = jnp.concatenate([pv[h * T:(h + 1) * T, :] for h in range(H)], axis=1)
        attn = _mm(ctx, o_w[l]) + o_b[l]                                    # (T, C)

        x = x + attn                                                        # residual
        x = _layernorm(x, ln1_g[l], ln1_b[l])
        hdn = _mm(x, ff1_w[l]) + ff1_b[l]                                   # (T, FFN)
        hdn = jax.nn.gelu(hdn, approximate=True)                            # TODO(synk): erf
        x = x + (_mm(hdn, ff2_w[l]) + ff2_b[l])                             # residual
        x = _layernorm(x, ln2_g[l], ln2_b[l])

    # final transformer LayerNorm
    x = _layernorm(x, final_ln_g[...], final_ln_b[...])

    # Lane-dense store: pack `rp` row-blocks side-by-side so the last dim is 128 wide
    # (unmasked vst); the wrapper undoes the packing.
    rp = out_ref.shape[2] // C
    rows = T // rp
    out_ref[0] = jnp.concatenate(
        [x[i * rows:(i + 1) * rows, :] for i in range(rp)], axis=1).astype(out_ref.dtype)


# --------------------------------------- wrapper ------------------------------------------
def _const_spec(arr):
    nd = arr.ndim
    # full-array block, revisited every grid step (no re-DMA: block index is constant)
    return pl.BlockSpec(arr.shape, lambda b, lens, _nd=nd: (0,) * _nd)


@jax.jit
def encoder_forward(params, feats_padded, feat_lens):
    """feats_padded: (B, T, IN_FEATURES) f32; feat_lens: (B,) int32 -> (B, T, EMBED_DIM)."""
    B, T, F = feats_padded.shape
    C = EMBED_DIM
    weights = [params[name] for name in WEIGHT_NAMES]

    # Block-diagonal head mask for packed all-heads attention — built here (traced,
    # constant-folded by XLA) instead of per-step iota work inside the kernel.
    HT = NUM_HEADS * T
    hq = jnp.arange(HT, dtype=jnp.int32) // T
    head_mask = jnp.where(hq[:, None] == hq[None, :], 0.0, HEAD_MASK).astype(jnp.float32)

    # Lane-dense output packing factor: store (T, C) as (T/rp, rp*C) with rp*C == 128.
    rp = 1
    if C < LANES and LANES % C == 0 and T % (LANES // C) == 0:
        rp = LANES // C

    grid_spec = pltpu.PrefetchScalarGridSpec(
        num_scalar_prefetch=1,                      # feat_lens -> SMEM, read in-kernel
        grid=(B,),                                  # B=2 parallel steps -> both v7x TCs
        in_specs=[pl.BlockSpec((1, T, F), lambda b, lens: (b, 0, 0))]
                 + [_const_spec(w) for w in weights]
                 + [_const_spec(head_mask)],
        out_specs=pl.BlockSpec((1, T // rp, rp * C), lambda b, lens: (b, 0, 0)),
    )
    out = pl.pallas_call(
        _encoder_kernel,
        out_shape=jax.ShapeDtypeStruct((B, T // rp, rp * C), jnp.float32),
        grid_spec=grid_spec,
        compiler_params=pltpu.CompilerParams(
            dimension_semantics=("parallel",),      # batch axis -> megacore sharding
            vmem_limit_bytes=32 * 1024 * 1024),
    )(feat_lens.astype(jnp.int32), feats_padded, *weights, head_mask)

    if rp > 1:   # undo the lane-dense packing (pure layout plumbing in the wrapper)
        out = jnp.concatenate([out[..., i * C:(i + 1) * C] for i in range(rp)], axis=1)
    return out


# ------------------------------ parameter construction -----------------------------------
def grouped_conv_to_dense(w_grouped, groups):
    """PyTorch Conv1d weight (C_out, C_in/groups, K) -> dense (K, C_in, C_out) block-diag."""
    c_out, c_in_g, K = w_grouped.shape
    c_in = c_in_g * groups
    out_g = c_out // groups
    w_dense = jnp.zeros((K, c_in, c_out), w_grouped.dtype)
    for g in range(groups):
        blk = jnp.transpose(w_grouped[g * out_g:(g + 1) * out_g], (2, 1, 0))  # (K, c_in_g, out_g)
        w_dense = w_dense.at[:, g * c_in_g:(g + 1) * c_in_g,
                             g * out_g:(g + 1) * out_g].set(blk)
    return w_dense


def init_params(key):
    keys = iter(jax.random.split(key, 64))

    def nrm(shape, scale=0.02):
        return (scale * jax.random.normal(next(keys), shape)).astype(jnp.float32)

    def stack(shape):
        return jnp.stack([nrm(shape) for _ in range(NUM_LAYERS)], axis=0)

    ones = lambda *s: jnp.ones(s, jnp.float32)
    zeros = lambda *s: jnp.zeros(s, jnp.float32)

    # Grouped conv weight densified + flattened ONCE here (hoisted out of forward).
    # TODO(synk): real checkpoints must fold weight_norm (g*v/||v||) before this step.
    conv_grouped = nrm((EMBED_DIM, EMBED_DIM // CONV_GROUPS, CONV_KERNEL))
    conv_dense = grouped_conv_to_dense(conv_grouped, CONV_GROUPS)        # (K, C, C)
    conv_flat = conv_dense.reshape(CONV_KERNEL * EMBED_DIM, EMBED_DIM)   # (K*C, C)

    # Fused QKV weights with the 1/sqrt(head_dim) scale folded into the Q third.
    scale = float(HEAD_DIM) ** -0.5
    qkv_w = stack((EMBED_DIM, 3 * EMBED_DIM))
    qkv_w = qkv_w.at[:, :, :EMBED_DIM].multiply(scale)
    qkv_b = jnp.zeros((NUM_LAYERS, 1, 3 * EMBED_DIM), jnp.float32)
    qkv_b = qkv_b.at[:, :, :EMBED_DIM].multiply(scale)

    return {
        # FeatureProjection: LayerNorm(in) -> Linear(in, embed)
        "fp_ln_g": ones(1, IN_FEATURES), "fp_ln_b": zeros(1, IN_FEATURES),
        "fp_w": nrm((IN_FEATURES, EMBED_DIM)).astype(MXU_DTYPE),
        "fp_b": zeros(1, EMBED_DIM),
        # ConvolutionalPositionalEmbedding (weight_norm folded into effective weight)
        "conv_w": conv_flat.astype(MXU_DTYPE),
        "conv_b": zeros(1, EMBED_DIM),
        # Per-layer weights stacked on a leading layer axis; QKV fused to (C, 3C).
        "qkv_w": qkv_w.astype(MXU_DTYPE),
        "qkv_b": qkv_b,
        "o_w": stack((EMBED_DIM, EMBED_DIM)).astype(MXU_DTYPE),
        "o_b": jnp.zeros((NUM_LAYERS, 1, EMBED_DIM), jnp.float32),
        "ln1_g": jnp.ones((NUM_LAYERS, 1, EMBED_DIM), jnp.float32),
        "ln1_b": jnp.zeros((NUM_LAYERS, 1, EMBED_DIM), jnp.float32),
        "ff1_w": stack((EMBED_DIM, FFN_DIM)).astype(MXU_DTYPE),
        "ff1_b": jnp.zeros((NUM_LAYERS, 1, FFN_DIM), jnp.float32),
        "ff2_w": stack((FFN_DIM, EMBED_DIM)).astype(MXU_DTYPE),
        "ff2_b": jnp.zeros((NUM_LAYERS, 1, EMBED_DIM), jnp.float32),
        "ln2_g": jnp.ones((NUM_LAYERS, 1, EMBED_DIM), jnp.float32),
        "ln2_b": jnp.zeros((NUM_LAYERS, 1, EMBED_DIM), jnp.float32),
        # Final transformer LayerNorm (layer_norm_first=False -> applied after the layers)
        "final_ln_g": ones(1, EMBED_DIM), "final_ln_b": zeros(1, EMBED_DIM),
    }


# --------------------------------------- main ---------------------------------------------
if __name__ == "__main__":
    key = jax.random.PRNGKey(0)
    pkey, xkey = jax.random.split(key)

    params = init_params(pkey)

    B, T = 2, 16
    feats_padded = jax.random.normal(xkey, (B, T, IN_FEATURES), dtype=jnp.float32)
    feat_lens = jnp.array([16, 11], dtype=jnp.int32)

    out = encoder_forward(params, feats_padded, feat_lens)
    jax.block_until_ready(out)
    assert out.shape == (B, T, EMBED_DIM)
    assert bool(jnp.all(jnp.isfinite(out)))
    print("KERNEL_OK")
</pallas_src>

<mosaic_0001>
module attributes {stable_mosaic.version = 11 : i64} {
  func.func @_encoder_kernel(%arg0: i32, %arg1: memref<2xi32, #tpu.memory_space<smem>>, %arg2: memref<1x16x32xf32, #tpu.memory_space<vmem>>, %arg3: memref<1x32xf32, #tpu.memory_space<vmem>>, %arg4: memref<1x32xf32, #tpu.memory_space<vmem>>, %arg5: memref<32x64xbf16, #tpu.memory_space<vmem>>, %arg6: memref<1x64xf32, #tpu.memory_space<vmem>>, %arg7: memref<192x64xbf16, #tpu.memory_space<vmem>>, %arg8: memref<1x64xf32, #tpu.memory_space<vmem>>, %arg9: memref<2x64x192xbf16, #tpu.memory_space<vmem>>, %arg10: memref<2x1x192xf32, #tpu.memory_space<vmem>>, %arg11: memref<2x64x64xbf16, #tpu.memory_space<vmem>>, %arg12: memref<2x1x64xf32, #tpu.memory_space<vmem>>, %arg13: memref<2x1x64xf32, #tpu.memory_space<vmem>>, %arg14: memref<2x1x64xf32, #tpu.memory_space<vmem>>, %arg15: memref<2x64x128xbf16, #tpu.memory_space<vmem>>, %arg16: memref<2x1x128xf32, #tpu.memory_space<vmem>>, %arg17: memref<2x128x64xbf16, #tpu.memory_space<vmem>>, %arg18: memref<2x1x64xf32, #tpu.memory_space<vmem>>, %arg19: memref<2x1x64xf32, #tpu.memory_space<vmem>>, %arg20: memref<2x1x64xf32, #tpu.memory_space<vmem>>, %arg21: memref<1x64xf32, #tpu.memory_space<vmem>>, %arg22: memref<1x64xf32, #tpu.memory_space<vmem>>, %arg23: memref<64x64xf32, #tpu.memory_space<vmem>>, %arg24: memref<1x8x128xf32, #tpu.memory_space<vmem>>) attributes {dimension_semantics = [#tpu.dimension_semantics<parallel>], iteration_bounds = array<i64: 2>, scalar_prefetch = 1 : i64, scratch_operands = 0 : i64, tpu.core_type = #tpu.core_type<tc>, window_params = [{transform_indices = @transform_0, window_bounds = array<i64: 1, 16, 32>}, {pipeline_mode = #tpu.pipeline_mode<synchronous>, transform_indices = @transform_1, window_bounds = array<i64: 1, 32>}, {pipeline_mode = #tpu.pipeline_mode<synchronous>, transform_indices = @transform_2, window_bounds = array<i64: 1, 32>}, {pipeline_mode = #tpu.pipeline_mode<synchronous>, transform_indices = @transform_3, window_bounds = array<i64: 32, 64>}, {pipeline_mode = #tpu.pipeline_mode<synchronous>, transform_indices = @transform_4, window_bounds = array<i64: 1, 64>}, {pipeline_mode = #tpu.pipeline_mode<synchronous>, transform_indices = @transform_5, window_bounds = array<i64: 192, 64>}, {pipeline_mode = #tpu.pipeline_mode<synchronous>, transform_indices = @transform_6, window_bounds = array<i64: 1, 64>}, {pipeline_mode = #tpu.pipeline_mode<synchronous>, transform_indices = @transform_7, window_bounds = array<i64: 2, 64, 192>}, {pipeline_mode = #tpu.pipeline_mode<synchronous>, transform_indices = @transform_8, window_bounds = array<i64: 2, 1, 192>}, {pipeline_mode = #tpu.pipeline_mode<synchronous>, transform_indices = @transform_9, window_bounds = array<i64: 2, 64, 64>}, {pipeline_mode = #tpu.pipeline_mode<synchronous>, transform_indices = @transform_10, window_bounds = array<i64: 2, 1, 64>}, {pipeline_mode = #tpu.pipeline_mode<synchronous>, transform_indices = @transform_11, window_bounds = array<i64: 2, 1, 64>}, {pipeline_mode = #tpu.pipeline_mode<synchronous>, transform_indices = @transform_12, window_bounds = array<i64: 2, 1, 64>}, {pipeline_mode = #tpu.pipeline_mode<synchronous>, transform_indices = @transform_13, window_bounds = array<i64: 2, 64, 128>}, {pipeline_mode = #tpu.pipeline_mode<synchronous>, transform_indices = @transform_14, window_bounds = array<i64: 2, 1, 128>}, {pipeline_mode = #tpu.pipeline_mode<synchronous>, transform_indices = @transform_15, window_bounds = array<i64: 2, 128, 64>}, {pipeline_mode = #tpu.pipeline_mode<synchronous>, transform_indices = @transform_16, window_bounds = array<i64: 2, 1, 64>}, {pipeline_mode = #tpu.pipeline_mode<synchronous>, transform_indices = @transform_17, window_bounds = array<i64: 2, 1, 64>}, {pipeline_mode = #tpu.pipeline_mode<synchronous>, transform_indices = @transform_18, window_bounds = array<i64: 2, 1, 64>}, {pipeline_mode = #tpu.pipeline_mode<synchronous>, transform_indices = @transform_19, window_bounds = array<i64: 1, 64>}, {pipeline_mode = #tpu.pipeline_mode<synchronous>, transform_indices = @transform_20, window_bounds = array<i64: 1, 64>}, {pipeline_mode = #tpu.pipeline_mode<synchronous>, transform_indices = @transform_21, window_bounds = array<i64: 64, 64>}, {transform_indices = @transform_22, window_bounds = array<i64: 1, 8, 128>}]} {
    %0 = arith.index_cast %arg0 : i32 to index
    %1 = memref.load %arg1[%0] : memref<2xi32, #tpu.memory_space<smem>>
    %2 = tpu.iota {dimensions = array<i32: 0>} : vector<16x1xi32>
    %3 = vector.broadcast %1 : i32 to vector<16x1xi32>
    %4 = arith.cmpi slt, %2, %3 : vector<16x1xi32>
    %5 = tpu.iota {dimensions = array<i32: 1>} : vector<1x16xi32>
    %6 = vector.broadcast %1 : i32 to vector<1x16xi32>
    %7 = arith.cmpi slt, %5, %6 : vector<1x16xi32>
    %cst = arith.constant 0.000000e+00 : f32
    %cst_0 = arith.constant -1.000000e+04 : f32
    %8 = vector.broadcast %cst : f32 to vector<1x16xf32>
    %9 = vector.broadcast %cst_0 : f32 to vector<1x16xf32>
    %10 = arith.select %7, %8, %9 : vector<1x16xi1>, vector<1x16xf32>
    %c0 = arith.constant 0 : index
    %c0_1 = arith.constant 0 : index
    %11 = vector.load %arg23[%c0, %c0_1] : memref<64x64xf32, #tpu.memory_space<vmem>>, vector<64x64xf32>
    %12 = tpu.concatenate %10, %10, %10, %10 in 1 : vector<1x16xf32>, vector<1x16xf32>, vector<1x16xf32>, vector<1x16xf32> -> vector<1x64xf32>
    %13 = vector.broadcast %12 : vector<1x64xf32> to vector<64x64xf32>
    %14 = arith.addf %11, %13 : vector<64x64xf32>
    %c0_2 = arith.constant 0 : index
    %c0_3 = arith.constant 0 : index
    %c0_4 = arith.constant 0 : index
    %15 = vector.load %arg2[%c0_2, %c0_3, %c0_4] : memref<1x16x32xf32, #tpu.memory_space<vmem>>, vector<1x16x32xf32>
    %16 = vector.shape_cast %15 : vector<1x16x32xf32> to vector<16x32xf32>
    %c0_5 = arith.constant 0 : index
    %c0_6 = arith.constant 0 : index
    %17 = vector.load %arg3[%c0_5, %c0_6] : memref<1x32xf32, #tpu.memory_space<vmem>>, vector<1x32xf32>
    %c0_7 = arith.constant 0 : index
    %c0_8 = arith.constant 0 : index
    %18 = vector.load %arg4[%c0_7, %c0_8] : memref<1x32xf32, #tpu.memory_space<vmem>>, vector<1x32xf32>
    %cst_9 = arith.constant dense<0.000000e+00> : vector<16xf32>
    %19 = vector.multi_reduction <add>, %16, %cst_9 [1] : vector<16x32xf32> to vector<16xf32>
    %20 = vector.shape_cast %19 : vector<16xf32> to vector<16x1xf32>
    %cst_10 = arith.constant 3.200000e+01 : f32
    %21 = vector.broadcast %cst_10 : f32 to vector<16x1xf32>
    %22 = arith.divf %20, %21 : vector<16x1xf32>
    %23 = vector.broadcast %22 : vector<16x1xf32> to vector<16x32xf32>
    %24 = arith.subf %16, %23 : vector<16x32xf32>
    %25 = arith.mulf %24, %24 : vector<16x32xf32>
    %cst_11 = arith.constant dense<0.000000e+00> : vector<16xf32>
    %26 = vector.multi_reduction <add>, %25, %cst_11 [1] : vector<16x32xf32> to vector<16xf32>
    %27 = vector.shape_cast %26 : vector<16xf32> to vector<16x1xf32>
    %cst_12 = arith.constant 3.200000e+01 : f32
    %28 = vector.broadcast %cst_12 : f32 to vector<16x1xf32>
    %29 = arith.divf %27, %28 : vector<16x1xf32>
    %cst_13 = arith.constant 9.99999974E-6 : f32
    %30 = vector.broadcast %cst_13 : f32 to vector<16x1xf32>
    %31 = arith.addf %29, %30 : vector<16x1xf32>
    %32 = math.rsqrt %31 : vector<16x1xf32>
    %33 = vector.broadcast %32 : vector<16x1xf32> to vector<16x32xf32>
    %34 = arith.mulf %24, %33 : vector<16x32xf32>
    %35 = vector.broadcast %17 : vector<1x32xf32> to vector<16x32xf32>
    %36 = arith.mulf %34, %35 : vector<16x32xf32>
    %37 = vector.broadcast %18 : vector<1x32xf32> to vector<16x32xf32>
    %38 = arith.addf %36, %37 : vector<16x32xf32>
    %c0_14 = arith.constant 0 : index
    %c0_15 = arith.constant 0 : index
    %39 = vector.load %arg5[%c0_14, %c0_15] : memref<32x64xbf16, #tpu.memory_space<vmem>>, vector<32x64xbf16>
    %40 = arith.truncf %38 : vector<16x32xf32> to vector<16x32xbf16>
    %cst_16 = arith.constant dense<0.000000e+00> : vector<16x64xf32>
    %41 = tpu.matmul %40, %39, %cst_16 {dimension_numbers = #tpu.dot_dimension_numbers<[1], [0], [0], [1], [0, 0, 1, 1], [], []>} : vector<16x32xbf16>, vector<32x64xbf16>, vector<16x64xf32> -> vector<16x64xf32>
    %c0_17 = arith.constant 0 : index
    %c0_18 = arith.constant 0 : index
    %42 = vector.load %arg6[%c0_17, %c0_18] : memref<1x64xf32, #tpu.memory_space<vmem>>, vector<1x64xf32>
    %43 = vector.broadcast %42 : vector<1x64xf32> to vector<16x64xf32>
    %44 = arith.addf %41, %43 : vector<16x64xf32>
    %cst_19 = arith.constant 0.000000e+00 : f32
    %45 = vector.shape_cast %4 : vector<16x1xi1> to vector<16x1xi1>
    %46 = vector.broadcast %45 : vector<16x1xi1> to vector<16x64xi1>
    %47 = vector.broadcast %cst_19 : f32 to vector<16x64xf32>
    %48 = arith.select %46, %44, %47 : vector<16x64xi1>, vector<16x64xf32>
    %c1_i32 = arith.constant 1 : i32
    %49 = tpu.dynamic_rotate %48 by %c1_i32 dim 0 : vector<16x64xf32>, i32 -> vector<16x64xf32>
    %c-1_i32 = arith.constant -1 : i32
    %50 = vector.broadcast %c-1_i32 : i32 to vector<16x1xi32>
    %51 = arith.addi %2, %50 : vector<16x1xi32>
    %c0_i32 = arith.constant 0 : i32
    %52 = vector.broadcast %c0_i32 : i32 to vector<16x1xi32>
    %53 = arith.cmpi sge, %51, %52 : vector<16x1xi32>
    %c-1_i32_20 = arith.constant -1 : i32
    %54 = vector.broadcast %c-1_i32_20 : i32 to vector<16x1xi32>
    %55 = arith.addi %2, %54 : vector<16x1xi32>
    %c16_i32 = arith.constant 16 : i32
    %56 = vector.broadcast %c16_i32 : i32 to vector<16x1xi32>
    %57 = arith.cmpi slt, %55, %56 : vector<16x1xi32>
    %58 = arith.andi %53, %57 : vector<16x1xi1>
    %cst_21 = arith.constant 0.000000e+00 : f32
    %59 = vector.shape_cast %58 : vector<16x1xi1> to vector<16x1xi1>
    %60 = vector.broadcast %59 : vector<16x1xi1> to vector<16x64xi1>
    %61 = vector.broadcast %cst_21 : f32 to vector<16x64xf32>
    %62 = arith.select %60, %49, %61 : vector<16x64xi1>, vector<16x64xf32>
    %c15_i32 = arith.constant 15 : i32
    %63 = tpu.dynamic_rotate %48 by %c15_i32 dim 0 : vector<16x64xf32>, i32 -> vector<16x64xf32>
    %c1_i32_22 = arith.constant 1 : i32
    %64 = vector.broadcast %c1_i32_22 : i32 to vector<16x1xi32>
    %65 = arith.addi %2, %64 : vector<16x1xi32>
    %c0_i32_23 = arith.constant 0 : i32
    %66 = vector.broadcast %c0_i32_23 : i32 to vector<16x1xi32>
    %67 = arith.cmpi sge, %65, %66 : vector<16x1xi32>
    %c1_i32_24 = arith.constant 1 : i32
    %68 = vector.broadcast %c1_i32_24 : i32 to vector<16x1xi32>
    %69 = arith.addi %2, %68 : vector<16x1xi32>
    %c16_i32_25 = arith.constant 16 : i32
    %70 = vector.broadcast %c16_i32_25 : i32 to vector<16x1xi32>
    %71 = arith.cmpi slt, %69, %70 : vector<16x1xi32>
    %72 = arith.andi %67, %71 : vector<16x1xi1>
    %cst_26 = arith.constant 0.000000e+00 : f32
    %73 = vector.shape_cast %72 : vector<16x1xi1> to vector<16x1xi1>
    %74 = vector.broadcast %73 : vector<16x1xi1> to vector<16x64xi1>
    %75 = vector.broadcast %cst_26 : f32 to vector<16x64xf32>
    %76 = arith.select %74, %63, %75 : vector<16x64xi1>, vector<16x64xf32>
    %77 = tpu.concatenate %62, %48, %76 in 1 : vector<16x64xf32>, vector<16x64xf32>, vector<16x64xf32> -> vector<16x192xf32>
    %c0_27 = arith.constant 0 : index
    %c0_28 = arith.constant 0 : index
    %78 = vector.load %arg7[%c0_27, %c0_28] : memref<192x64xbf16, #tpu.memory_space<vmem>>, vector<192x64xbf16>
    %79 = arith.truncf %77 : vector<16x192xf32> to vector<16x192xbf16>
    %cst_29 = arith.constant dense<0.000000e+00> : vector<16x64xf32>
    %80 = tpu.matmul %79, %78, %cst_29 {dimension_numbers = #tpu.dot_dimension_numbers<[1], [0], [0], [1], [0, 0, 1, 1], [], []>} : vector<16x192xbf16>, vector<192x64xbf16>, vector<16x64xf32> -> vector<16x64xf32>
    %c0_30 = arith.constant 0 : index
    %c0_31 = arith.constant 0 : index
    %81 = vector.load %arg8[%c0_30, %c0_31] : memref<1x64xf32, #tpu.memory_space<vmem>>, vector<1x64xf32>
    %82 = vector.broadcast %81 : vector<1x64xf32> to vector<16x64xf32>
    %83 = arith.addf %80, %82 : vector<16x64xf32>
    %84 = arith.mulf %83, %83 : vector<16x64xf32>
    %85 = arith.mulf %83, %84 : vector<16x64xf32>
    %cst_32 = arith.constant 4.471500e-02 : f32
    %86 = vector.broadcast %cst_32 : f32 to vector<16x64xf32>
    %87 = arith.mulf %86, %85 : vector<16x64xf32>
    %88 = arith.addf %83, %87 : vector<16x64xf32>
    %cst_33 = arith.constant 0.797884583 : f32
    %89 = vector.broadcast %cst_33 : f32 to vector<16x64xf32>
    %90 = arith.mulf %89, %88 : vector<16x64xf32>
    %91 = math.tanh %90 : vector<16x64xf32>
    %cst_34 = arith.constant 1.000000e+00 : f32
    %92 = vector.broadcast %cst_34 : f32 to vector<16x64xf32>
    %93 = arith.addf %92, %91 : vector<16x64xf32>
    %cst_35 = arith.constant 5.000000e-01 : f32
    %94 = vector.broadcast %cst_35 : f32 to vector<16x64xf32>
    %95 = arith.mulf %94, %93 : vector<16x64xf32>
    %96 = arith.mulf %83, %95 : vector<16x64xf32>
    %97 = arith.addf %48, %96 : vector<16x64xf32>
    %c0_36 = arith.constant 0 : index
    %c0_37 = arith.constant 0 : index
    %c0_38 = arith.constant 0 : index
    %98 = vector.load %arg9[%c0_36, %c0_37, %c0_38] : memref<2x64x192xbf16, #tpu.memory_space<vmem>>, vector<1x64x192xbf16>
    %99 = vector.shape_cast %98 : vector<1x64x192xbf16> to vector<64x192xbf16>
    %100 = arith.truncf %97 : vector<16x64xf32> to vector<16x64xbf16>
    %cst_39 = arith.constant dense<0.000000e+00> : vector<16x192xf32>
    %101 = tpu.matmul %100, %99, %cst_39 {dimension_numbers = #tpu.dot_dimension_numbers<[1], [0], [0], [1], [0, 0, 1, 1], [], []>} : vector<16x64xbf16>, vector<64x192xbf16>, vector<16x192xf32> -> vector<16x192xf32>
    %c0_40 = arith.constant 0 : index
    %c0_41 = arith.constant 0 : index
    %c0_42 = arith.constant 0 : index
    %102 = vector.load %arg10[%c0_40, %c0_41, %c0_42] : memref<2x1x192xf32, #tpu.memory_space<vmem>>, vector<1x1x192xf32>
    %103 = vector.shape_cast %102 : vector<1x1x192xf32> to vector<1x192xf32>
    %104 = vector.broadcast %103 : vector<1x192xf32> to vector<16x192xf32>
    %105 = arith.addf %101, %104 : vector<16x192xf32>
    %106 = arith.truncf %105 : vector<16x192xf32> to vector<16x192xbf16>
    %107 = vector.extract_strided_slice %106 {offsets = [0, 0], sizes = [16, 16], strides = [1, 1]} : vector<16x192xbf16> to vector<16x16xbf16>
    %108 = vector.extract_strided_slice %106 {offsets = [0, 16], sizes = [16, 16], strides = [1, 1]} : vector<16x192xbf16> to vector<16x16xbf16>
    %109 = vector.extract_strided_slice %106 {offsets = [0, 32], sizes = [16, 16], strides = [1, 1]} : vector<16x192xbf16> to vector<16x16xbf16>
    %110 = vector.extract_strided_slice %106 {offsets = [0, 48], sizes = [16, 16], strides = [1, 1]} : vector<16x192xbf16> to vector<16x16xbf16>
    %111 = tpu.concatenate %107, %108, %109, %110 in 0 : vector<16x16xbf16>, vector<16x16xbf16>, vector<16x16xbf16>, vector<16x16xbf16> -> vector<64x16xbf16>
    %112 = vector.extract_strided_slice %106 {offsets = [0, 64], sizes = [16, 16], strides = [1, 1]} : vector<16x192xbf16> to vector<16x16xbf16>
    %113 = vector.extract_strided_slice %106 {offsets = [0, 80], sizes = [16, 16], strides = [1, 1]} : vector<16x192xbf16> to vector<16x16xbf16>
    %114 = vector.extract_strided_slice %106 {offsets = [0, 96], sizes = [16, 16], strides = [1, 1]} : vector<16x192xbf16> to vector<16x16xbf16>
    %115 = vector.extract_strided_slice %106 {offsets = [0, 112], sizes = [16, 16], strides = [1, 1]} : vector<16x192xbf16> to vector<16x16xbf16>
    %116 = tpu.concatenate %112, %113, %114, %115 in 0 : vector<16x16xbf16>, vector<16x16xbf16>, vector<16x16xbf16>, vector<16x16xbf16> -> vector<64x16xbf16>
    %117 = vector.extract_strided_slice %106 {offsets = [0, 128], sizes = [16, 16], strides = [1, 1]} : vector<16x192xbf16> to vector<16x16xbf16>
    %118 = vector.extract_strided_slice %106 {offsets = [0, 144], sizes = [16, 16], strides = [1, 1]} : vector<16x192xbf16> to vector<16x16xbf16>
    %119 = vector.extract_strided_slice %106 {offsets = [0, 160], sizes = [16, 16], strides = [1, 1]} : vector<16x192xbf16> to vector<16x16xbf16>
    %120 = vector.extract_strided_slice %106 {offsets = [0, 176], sizes = [16, 16], strides = [1, 1]} : vector<16x192xbf16> to vector<16x16xbf16>
    %121 = tpu.concatenate %117, %118, %119, %120 in 0 : vector<16x16xbf16>, vector<16x16xbf16>, vector<16x16xbf16>, vector<16x16xbf16> -> vector<64x16xbf16>
    %cst_43 = arith.constant dense<0.000000e+00> : vector<64x64xf32>
    %122 = tpu.matmul %111, %116, %cst_43 {dimension_numbers = #tpu.dot_dimension_numbers<[1], [1], [0], [0], [0, 0, 1, 0], [], []>} : vector<64x16xbf16>, vector<64x16xbf16>, vector<64x64xf32> -> vector<64x64xf32>
    %123 = arith.addf %122, %14 : vector<64x64xf32>
    %cst_44 = arith.constant dense<0xFF800000> : vector<64xf32>
    %124 = vector.multi_reduction <maximumf>, %123, %cst_44 [1] : vector<64x64xf32> to vector<64xf32>
    %125 = vector.shape_cast %124 : vector<64xf32> to vector<64x1xf32>
    %126 = vector.broadcast %125 : vector<64x1xf32> to vector<64x64xf32>
    %127 = arith.subf %123, %126 : vector<64x64xf32>
    %128 = math.exp %127 : vector<64x64xf32>
    %cst_45 = arith.constant dense<0.000000e+00> : vector<64xf32>
    %129 = vector.multi_reduction <add>, %128, %cst_45 [1] : vector<64x64xf32> to vector<64xf32>
    %130 = vector.shape_cast %129 : vector<64xf32> to vector<64x1xf32>
    %131 = tpu.reciprocal %130 {approx = true} : vector<64x1xf32> -> vector<64x1xf32>
    %132 = vector.broadcast %131 : vector<64x1xf32> to vector<64x64xf32>
    %133 = arith.mulf %128, %132 : vector<64x64xf32>
    %134 = arith.truncf %133 : vector<64x64xf32> to vector<64x64xbf16>
    %cst_46 = arith.constant dense<0.000000e+00> : vector<64x16xf32>
    %135 = tpu.matmul %134, %121, %cst_46 {dimension_numbers = #tpu.dot_dimension_numbers<[1], [0], [0], [1], [0, 0, 1, 1], [], []>} : vector<64x64xbf16>, vector<64x16xbf16>, vector<64x16xf32> -> vector<64x16xf32>
    %136 = vector.extract_strided_slice %135 {offsets = [0, 0], sizes = [16, 16], strides = [1, 1]} : vector<64x16xf32> to vector<16x16xf32>
    %137 = vector.extract_strided_slice %135 {offsets = [16, 0], sizes = [16, 16], strides = [1, 1]} : vector<64x16xf32> to vector<16x16xf32>
    %138 = vector.extract_strided_slice %135 {offsets = [32, 0], sizes = [16, 16], strides = [1, 1]} : vector<64x16xf32> to vector<16x16xf32>
    %139 = vector.extract_strided_slice %135 {offsets = [48, 0], sizes = [16, 16], strides = [1, 1]} : vector<64x16xf32> to vector<16x16xf32>
    %140 = tpu.concatenate %136, %137, %138, %139 in 1 : vector<16x16xf32>, vector<16x16xf32>, vector<16x16xf32>, vector<16x16xf32> -> vector<16x64xf32>
    %c0_47 = arith.constant 0 : index
    %c0_48 = arith.constant 0 : index
    %c0_49 = arith.constant 0 : index
    %141 = vector.load %arg11[%c0_47, %c0_48, %c0_49] : memref<2x64x64xbf16, #tpu.memory_space<vmem>>, vector<1x64x64xbf16>
    %142 = vector.shape_cast %141 : vector<1x64x64xbf16> to vector<64x64xbf16>
    %143 = arith.truncf %140 : vector<16x64xf32> to vector<16x64xbf16>
    %cst_50 = arith.constant dense<0.000000e+00> : vector<16x64xf32>
    %144 = tpu.matmul %143, %142, %cst_50 {dimension_numbers = #tpu.dot_dimension_numbers<[1], [0], [0], [1], [0, 0, 1, 1], [], []>} : vector<16x64xbf16>, vector<64x64xbf16>, vector<16x64xf32> -> vector<16x64xf32>
    %c0_51 = arith.constant 0 : index
    %c0_52 = arith.constant 0 : index
    %c0_53 = arith.constant 0 : index
    %145 = vector.load %arg12[%c0_51, %c0_52, %c0_53] : memref<2x1x64xf32, #tpu.memory_space<vmem>>, vector<1x1x64xf32>
    %146 = vector.shape_cast %145 : vector<1x1x64xf32> to vector<1x64xf32>
    %147 = vector.broadcast %146 : vector<1x64xf32> to vector<16x64xf32>
    %148 = arith.addf %144, %147 : vector<16x64xf32>
    %149 = arith.addf %97, %148 : vector<16x64xf32>
    %c0_54 = arith.constant 0 : index
    %c0_55 = arith.constant 0 : index
    %c0_56 = arith.constant 0 : index
    %150 = vector.load %arg13[%c0_54, %c0_55, %c0_56] : memref<2x1x64xf32, #tpu.memory_space<vmem>>, vector<1x1x64xf32>
    %151 = vector.shape_cast %150 : vector<1x1x64xf32> to vector<1x64xf32>
    %c0_57 = arith.constant 0 : index
    %c0_58 = arith.constant 0 : index
    %c0_59 = arith.constant 0 : index
    %152 = vector.load %arg14[%c0_57, %c0_58, %c0_59] : memref<2x1x64xf32, #tpu.memory_space<vmem>>, vector<1x1x64xf32>
    %153 = vector.shape_cast %152 : vector<1x1x64xf32> to vector<1x64xf32>
    %cst_60 = arith.constant dense<0.000000e+00> : vector<16xf32>
    %154 = vector.multi_reduction <add>, %149, %cst_60 [1] : vector<16x64xf32> to vector<16xf32>
    %155 = vector.shape_cast %154 : vector<16xf32> to vector<16x1xf32>
    %cst_61 = arith.constant 6.400000e+01 : f32
    %156 = vector.broadcast %cst_61 : f32 to vector<16x1xf32>
    %157 = arith.divf %155, %156 : vector<16x1xf32>
    %158 = vector.broadcast %157 : vector<16x1xf32> to vector<16x64xf32>
    %159 = arith.subf %149, %158 : vector<16x64xf32>
    %160 = arith.mulf %159, %159 : vector<16x64xf32>
    %cst_62 = arith.constant dense<0.000000e+00> : vector<16xf32>
    %161 = vector.multi_reduction <add>, %160, %cst_62 [1] : vector<16x64xf32> to vector<16xf32>
    %162 = vector.shape_cast %161 : vector<16xf32> to vector<16x1xf32>
    %cst_63 = arith.constant 6.400000e+01 : f32
    %163 = vector.broadcast %cst_63 : f32 to vector<16x1xf32>
    %164 = arith.divf %162, %163 : vector<16x1xf32>
    %cst_64 = arith.constant 9.99999974E-6 : f32
    %165 = vector.broadcast %cst_64 : f32 to vector<16x1xf32>
    %166 = arith.addf %164, %165 : vector<16x1xf32>
    %167 = math.rsqrt %166 : vector<16x1xf32>
    %168 = vector.broadcast %167 : vector<16x1xf32> to vector<16x64xf32>
    %169 = arith.mulf %159, %168 : vector<16x64xf32>
    %170 = vector.broadcast %151 : vector<1x64xf32> to vector<16x64xf32>
    %171 = arith.mulf %169, %170 : vector<16x64xf32>
    %172 = vector.broadcast %153 : vector<1x64xf32> to vector<16x64xf32>
    %173 = arith.addf %171, %172 : vector<16x64xf32>
    %c0_65 = arith.constant 0 : index
    %c0_66 = arith.constant 0 : index
    %c0_67 = arith.constant 0 : index
    %174 = vector.load %arg15[%c0_65, %c0_66, %c0_67] : memref<2x64x128xbf16, #tpu.memory_space<vmem>>, vector<1x64x128xbf16>
    %175 = vector.shape_cast %174 : vector<1x64x128xbf16> to vector<64x128xbf16>
    %176 = arith.truncf %173 : vector<16x64xf32> to vector<16x64xbf16>
    %cst_68 = arith.constant dense<0.000000e+00> : vector<16x128xf32>
    %177 = tpu.matmul %176, %175, %cst_68 {dimension_numbers = #tpu.dot_dimension_numbers<[1], [0], [0], [1], [0, 0, 1, 1], [], []>} : vector<16x64xbf16>, vector<64x128xbf16>, vector<16x128xf32> -> vector<16x128xf32>
    %c0_69 = arith.constant 0 : index
    %c0_70 = arith.constant 0 : index
    %c0_71 = arith.constant 0 : index
    %178 = vector.load %arg16[%c0_69, %c0_70, %c0_71] : memref<2x1x128xf32, #tpu.memory_space<vmem>>, vector<1x1x128xf32>
    %179 = vector.shape_cast %178 : vector<1x1x128xf32> to vector<1x128xf32>
    %180 = vector.broadcast %179 : vector<1x128xf32> to vector<16x128xf32>
    %181 = arith.addf %177, %180 : vector<16x128xf32>
    %182 = arith.mulf %181, %181 : vector<16x128xf32>
    %183 = arith.mulf %181, %182 : vector<16x128xf32>
    %cst_72 = arith.constant 4.471500e-02 : f32
    %184 = vector.broadcast %cst_72 : f32 to vector<16x128xf32>
    %185 = arith.mulf %184, %183 : vector<16x128xf32>
    %186 = arith.addf %181, %185 : vector<16x128xf32>
    %cst_73 = arith.constant 0.797884583 : f32
    %187 = vector.broadcast %cst_73 : f32 to vector<16x128xf32>
    %188 = arith.mulf %187, %186 : vector<16x128xf32>
    %189 = math.tanh %188 : vector<16x128xf32>
    %cst_74 = arith.constant 1.000000e+00 : f32
    %190 = vector.broadcast %cst_74 : f32 to vector<16x128xf32>
    %191 = arith.addf %190, %189 : vector<16x128xf32>
    %cst_75 = arith.constant 5.000000e-01 : f32
    %192 = vector.broadcast %cst_75 : f32 to vector<16x128xf32>
    %193 = arith.mulf %192, %191 : vector<16x128xf32>
    %194 = arith.mulf %181, %193 : vector<16x128xf32>
    %c0_76 = arith.constant 0 : index
    %c0_77 = arith.constant 0 : index
    %c0_78 = arith.constant 0 : index
    %195 = vector.load %arg17[%c0_76, %c0_77, %c0_78] : memref<2x128x64xbf16, #tpu.memory_space<vmem>>, vector<1x128x64xbf16>
    %196 = vector.shape_cast %195 : vector<1x128x64xbf16> to vector<128x64xbf16>
    %197 = arith.truncf %194 : vector<16x128xf32> to vector<16x128xbf16>
    %cst_79 = arith.constant dense<0.000000e+00> : vector<16x64xf32>
    %198 = tpu.matmul %197, %196, %cst_79 {dimension_numbers = #tpu.dot_dimension_numbers<[1], [0], [0], [1], [0, 0, 1, 1], [], []>} : vector<16x128xbf16>, vector<128x64xbf16>, vector<16x64xf32> -> vector<16x64xf32>
    %c0_80 = arith.constant 0 : index
    %c0_81 = arith.constant 0 : index
    %c0_82 = arith.constant 0 : index
    %199 = vector.load %arg18[%c0_80, %c0_81, %c0_82] : memref<2x1x64xf32, #tpu.memory_space<vmem>>, vector<1x1x64xf32>
    %200 = vector.shape_cast %199 : vector<1x1x64xf32> to vector<1x64xf32>
    %201 = vector.broadcast %200 : vector<1x64xf32> to vector<16x64xf32>
    %202 = arith.addf %198, %201 : vector<16x64xf32>
    %203 = arith.addf %173, %202 : vector<16x64xf32>
    %c0_83 = arith.constant 0 : index
    %c0_84 = arith.constant 0 : index
    %c0_85 = arith.constant 0 : index
    %204 = vector.load %arg19[%c0_83, %c0_84, %c0_85] : memref<2x1x64xf32, #tpu.memory_space<vmem>>, vector<1x1x64xf32>
    %205 = vector.shape_cast %204 : vector<1x1x64xf32> to vector<1x64xf32>
    %c0_86 = arith.constant 0 : index
    %c0_87 = arith.constant 0 : index
    %c0_88 = arith.constant 0 : index
    %206 = vector.load %arg20[%c0_86, %c0_87, %c0_88] : memref<2x1x64xf32, #tpu.memory_space<vmem>>, vector<1x1x64xf32>
    %207 = vector.shape_cast %206 : vector<1x1x64xf32> to vector<1x64xf32>
    %cst_89 = arith.constant dense<0.000000e+00> : vector<16xf32>
    %208 = vector.multi_reduction <add>, %203, %cst_89 [1] : vector<16x64xf32> to vector<16xf32>
    %209 = vector.shape_cast %208 : vector<16xf32> to vector<16x1xf32>
    %cst_90 = arith.constant 6.400000e+01 : f32
    %210 = vector.broadcast %cst_90 : f32 to vector<16x1xf32>
    %211 = arith.divf %209, %210 : vector<16x1xf32>
    %212 = vector.broadcast %211 : vector<16x1xf32> to vector<16x64xf32>
    %213 = arith.subf %203, %212 : vector<16x64xf32>
    %214 = arith.mulf %213, %213 : vector<16x64xf32>
    %cst_91 = arith.constant dense<0.000000e+00> : vector<16xf32>
    %215 = vector.multi_reduction <add>, %214, %cst_91 [1] : vector<16x64xf32> to vector<16xf32>
    %216 = vector.shape_cast %215 : vector<16xf32> to vector<16x1xf32>
    %cst_92 = arith.constant 6.400000e+01 : f32
    %217 = vector.broadcast %cst_92 : f32 to vector<16x1xf32>
    %218 = arith.divf %216, %217 : vector<16x1xf32>
    %cst_93 = arith.constant 9.99999974E-6 : f32
    %219 = vector.broadcast %cst_93 : f32 to vector<16x1xf32>
    %220 = arith.addf %218, %219 : vector<16x1xf32>
    %221 = math.rsqrt %220 : vector<16x1xf32>
    %222 = vector.broadcast %221 : vector<16x1xf32> to vector<16x64xf32>
    %223 = arith.mulf %213, %222 : vector<16x64xf32>
    %224 = vector.broadcast %205 : vector<1x64xf32> to vector<16x64xf32>
    %225 = arith.mulf %223, %224 : vector<16x64xf32>
    %226 = vector.broadcast %207 : vector<1x64xf32> to vector<16x64xf32>
    %227 = arith.addf %225, %226 : vector<16x64xf32>
    %c1 = arith.constant 1 : index
    %c0_94 = arith.constant 0 : index
    %c0_95 = arith.constant 0 : index
    %228 = vector.load %arg9[%c1, %c0_94, %c0_95] : memref<2x64x192xbf16, #tpu.memory_space<vmem>>, vector<1x64x192xbf16>
    %229 = vector.shape_cast %228 : vector<1x64x192xbf16> to vector<64x192xbf16>
    %230 = arith.truncf %227 : vector<16x64xf32> to vector<16x64xbf16>
    %cst_96 = arith.constant dense<0.000000e+00> : vector<16x192xf32>
    %231 = tpu.matmul %230, %229, %cst_96 {dimension_numbers = #tpu.dot_dimension_numbers<[1], [0], [0], [1], [0, 0, 1, 1], [], []>} : vector<16x64xbf16>, vector<64x192xbf16>, vector<16x192xf32> -> vector<16x192xf32>
    %c1_97 = arith.constant 1 : index
    %c0_98 = arith.constant 0 : index
    %c0_99 = arith.constant 0 : index
    %232 = vector.load %arg10[%c1_97, %c0_98, %c0_99] : memref<2x1x192xf32, #tpu.memory_space<vmem>>, vector<1x1x192xf32>
    %233 = vector.shape_cast %232 : vector<1x1x192xf32> to vector<1x192xf32>
    %234 = vector.broadcast %233 : vector<1x192xf32> to vector<16x192xf32>
    %235 = arith.addf %231, %234 : vector<16x192xf32>
    %236 = arith.truncf %235 : vector<16x192xf32> to vector<16x192xbf16>
    %237 = vector.extract_strided_slice %236 {offsets = [0, 0], sizes = [16, 16], strides = [1, 1]} : vector<16x192xbf16> to vector<16x16xbf16>
    %238 = vector.extract_strided_slice %236 {offsets = [0, 16], sizes = [16, 16], strides = [1, 1]} : vector<16x192xbf16> to vector<16x16xbf16>
    %239 = vector.extract_strided_slice %236 {offsets = [0, 32], sizes = [16, 16], strides = [1, 1]} : vector<16x192xbf16> to vector<16x16xbf16>
    %240 = vector.extract_strided_slice %236 {offsets = [0, 48], sizes = [16, 16], strides = [1, 1]} : vector<16x192xbf16> to vector<16x16xbf16>
    %241 = tpu.concatenate %237, %238, %239, %240 in 0 : vector<16x16xbf16>, vector<16x16xbf16>, vector<16x16xbf16>, vector<16x16xbf16> -> vector<64x16xbf16>
    %242 = vector.extract_strided_slice %236 {offsets = [0, 64], sizes = [16, 16], strides = [1, 1]} : vector<16x192xbf16> to vector<16x16xbf16>
    %243 = vector.extract_strided_slice %236 {offsets = [0, 80], sizes = [16, 16], strides = [1, 1]} : vector<16x192xbf16> to vector<16x16xbf16>
    %244 = vector.extract_strided_slice %236 {offsets = [0, 96], sizes = [16, 16], strides = [1, 1]} : vector<16x192xbf16> to vector<16x16xbf16>
    %245 = vector.extract_strided_slice %236 {offsets = [0, 112], sizes = [16, 16], strides = [1, 1]} : vector<16x192xbf16> to vector<16x16xbf16>
    %246 = tpu.concatenate %242, %243, %244, %245 in 0 : vector<16x16xbf16>, vector<16x16xbf16>, vector<16x16xbf16>, vector<16x16xbf16> -> vector<64x16xbf16>
    %247 = vector.extract_strided_slice %236 {offsets = [0, 128], sizes = [16, 16], strides = [1, 1]} : vector<16x192xbf16> to vector<16x16xbf16>
    %248 = vector.extract_strided_slice %236 {offsets = [0, 144], sizes = [16, 16], strides = [1, 1]} : vector<16x192xbf16> to vector<16x16xbf16>
    %249 = vector.extract_strided_slice %236 {offsets = [0, 160], sizes = [16, 16], strides = [1, 1]} : vector<16x192xbf16> to vector<16x16xbf16>
    %250 = vector.extract_strided_slice %236 {offsets = [0, 176], sizes = [16, 16], strides = [1, 1]} : vector<16x192xbf16> to vector<16x16xbf16>
    %251 = tpu.concatenate %247, %248, %249, %250 in 0 : vector<16x16xbf16>, vector<16x16xbf16>, vector<16x16xbf16>, vector<16x16xbf16> -> vector<64x16xbf16>
    %cst_100 = arith.constant dense<0.000000e+00> : vector<64x64xf32>
    %252 = tpu.matmul %241, %246, %cst_100 {dimension_numbers = #tpu.dot_dimension_numbers<[1], [1], [0], [0], [0, 0, 1, 0], [], []>} : vector<64x16xbf16>, vector<64x16xbf16>, vector<64x64xf32> -> vector<64x64xf32>
    %253 = arith.addf %252, %14 : vector<64x64xf32>
    %cst_101 = arith.constant dense<0xFF800000> : vector<64xf32>
    %254 = vector.multi_reduction <maximumf>, %253, %cst_101 [1] : vector<64x64xf32> to vector<64xf32>
    %255 = vector.shape_cast %254 : vector<64xf32> to vector<64x1xf32>
    %256 = vector.broadcast %255 : vector<64x1xf32> to vector<64x64xf32>
    %257 = arith.subf %253, %256 : vector<64x64xf32>
    %258 = math.exp %257 : vector<64x64xf32>
    %cst_102 = arith.constant dense<0.000000e+00> : vector<64xf32>
    %259 = vector.multi_reduction <add>, %258, %cst_102 [1] : vector<64x64xf32> to vector<64xf32>
    %260 = vector.shape_cast %259 : vector<64xf32> to vector<64x1xf32>
    %261 = tpu.reciprocal %260 {approx = true} : vector<64x1xf32> -> vector<64x1xf32>
    %262 = vector.broadcast %261 : vector<64x1xf32> to vector<64x64xf32>
    %263 = arith.mulf %258, %262 : vector<64x64xf32>
    %264 = arith.truncf %263 : vector<64x64xf32> to vector<64x64xbf16>
    %cst_103 = arith.constant dense<0.000000e+00> : vector<64x16xf32>
    %265 = tpu.matmul %264, %251, %cst_103 {dimension_numbers = #tpu.dot_dimension_numbers<[1], [0], [0], [1], [0, 0, 1, 1], [], []>} : vector<64x64xbf16>, vector<64x16xbf16>, vector<64x16xf32> -> vector<64x16xf32>
    %266 = vector.extract_strided_slice %265 {offsets = [0, 0], sizes = [16, 16], strides = [1, 1]} : vector<64x16xf32> to vector<16x16xf32>
    %267 = vector.extract_strided_slice %265 {offsets = [16, 0], sizes = [16, 16], strides = [1, 1]} : vector<64x16xf32> to vector<16x16xf32>
    %268 = vector.extract_strided_slice %265 {offsets = [32, 0], sizes = [16, 16], strides = [1, 1]} : vector<64x16xf32> to vector<16x16xf32>
    %269 = vector.extract_strided_slice %265 {offsets = [48, 0], sizes = [16, 16], strides = [1, 1]} : vector<64x16xf32> to vector<16x16xf32>
    %270 = tpu.concatenate %266, %267, %268, %269 in 1 : vector<16x16xf32>, vector<16x16xf32>, vector<16x16xf32>, vector<16x16xf32> -> vector<16x64xf32>
    %c1_104 = arith.constant 1 : index
    %c0_105 = arith.constant 0 : index
    %c0_106 = arith.constant 0 : index
    %271 = vector.load %arg11[%c1_104, %c0_105, %c0_106] : memref<2x64x64xbf16, #tpu.memory_space<vmem>>, vector<1x64x64xbf16>
    %272 = vector.shape_cast %271 : vector<1x64x64xbf16> to vector<64x64xbf16>
    %273 = arith.truncf %270 : vector<16x64xf32> to vector<16x64xbf16>
    %cst_107 = arith.constant dense<0.000000e+00> : vector<16x64xf32>
    %274 = tpu.matmul %273, %272, %cst_107 {dimension_numbers = #tpu.dot_dimension_numbers<[1], [0], [0], [1], [0, 0, 1, 1], [], []>} : vector<16x64xbf16>, vector<64x64xbf16>, vector<16x64xf32> -> vector<16x64xf32>
    %c1_108 = arith.constant 1 : index
    %c0_109 = arith.constant 0 : index
    %c0_110 = arith.constant 0 : index
    %275 = vector.load %arg12[%c1_108, %c0_109, %c0_110] : memref<2x1x64xf32, #tpu.memory_space<vmem>>, vector<1x1x64xf32>
    %276 = vector.shape_cast %275 : vector<1x1x64xf32> to vector<1x64xf32>
    %277 = vector.broadcast %276 : vector<1x64xf32> to vector<16x64xf32>
    %278 = arith.addf %274, %277 : vector<16x64xf32>
    %279 = arith.addf %227, %278 : vector<16x64xf32>
    %c1_111 = arith.constant 1 : index
    %c0_112 = arith.constant 0 : index
    %c0_113 = arith.constant 0 : index
    %280 = vector.load %arg13[%c1_111, %c0_112, %c0_113] : memref<2x1x64xf32, #tpu.memory_space<vmem>>, vector<1x1x64xf32>
    %281 = vector.shape_cast %280 : vector<1x1x64xf32> to vector<1x64xf32>
    %c1_114 = arith.constant 1 : index
    %c0_115 = arith.constant 0 : index
    %c0_116 = arith.constant 0 : index
    %282 = vector.load %arg14[%c1_114, %c0_115, %c0_116] : memref<2x1x64xf32, #tpu.memory_space<vmem>>, vector<1x1x64xf32>
    %283 = vector.shape_cast %282 : vector<1x1x64xf32> to vector<1x64xf32>
    %cst_117 = arith.constant dense<0.000000e+00> : vector<16xf32>
    %284 = vector.multi_reduction <add>, %279, %cst_117 [1] : vector<16x64xf32> to vector<16xf32>
    %285 = vector.shape_cast %284 : vector<16xf32> to vector<16x1xf32>
    %cst_118 = arith.constant 6.400000e+01 : f32
    %286 = vector.broadcast %cst_118 : f32 to vector<16x1xf32>
    %287 = arith.divf %285, %286 : vector<16x1xf32>
    %288 = vector.broadcast %287 : vector<16x1xf32> to vector<16x64xf32>
    %289 = arith.subf %279, %288 : vector<16x64xf32>
    %290 = arith.mulf %289, %289 : vector<16x64xf32>
    %cst_119 = arith.constant dense<0.000000e+00> : vector<16xf32>
    %291 = vector.multi_reduction <add>, %290, %cst_119 [1] : vector<16x64xf32> to vector<16xf32>
    %292 = vector.shape_cast %291 : vector<16xf32> to vector<16x1xf32>
    %cst_120 = arith.constant 6.400000e+01 : f32
    %293 = vector.broadcast %cst_120 : f32 to vector<16x1xf32>
    %294 = arith.divf %292, %293 : vector<16x1xf32>
    %cst_121 = arith.constant 9.99999974E-6 : f32
    %295 = vector.broadcast %cst_121 : f32 to vector<16x1xf32>
    %296 = arith.addf %294, %295 : vector<16x1xf32>
    %297 = math.rsqrt %296 : vector<16x1xf32>
    %298 = vector.broadcast %297 : vector<16x1xf32> to vector<16x64xf32>
    %299 = arith.mulf %289, %298 : vector<16x64xf32>
    %300 = vector.broadcast %281 : vector<1x64xf32> to vector<16x64xf32>
    %301 = arith.mulf %299, %300 : vector<16x64xf32>
    %302 = vector.broadcast %283 : vector<1x64xf32> to vector<16x64xf32>
    %303 = arith.addf %301, %302 : vector<16x64xf32>
    %c1_122 = arith.constant 1 : index
    %c0_123 = arith.constant 0 : index
    %c0_124 = arith.constant 0 : index
    %304 = vector.load %arg15[%c1_122, %c0_123, %c0_124] : memref<2x64x128xbf16, #tpu.memory_space<vmem>>, vector<1x64x128xbf16>
    %305 = vector.shape_cast %304 : vector<1x64x128xbf16> to vector<64x128xbf16>
    %306 = arith.truncf %303 : vector<16x64xf32> to vector<16x64xbf16>
    %cst_125 = arith.constant dense<0.000000e+00> : vector<16x128xf32>
    %307 = tpu.matmul %306, %305, %cst_125 {dimension_numbers = #tpu.dot_dimension_numbers<[1], [0], [0], [1], [0, 0, 1, 1], [], []>} : vector<16x64xbf16>, vector<64x128xbf16>, vector<16x128xf32> -> vector<16x128xf32>
    %c1_126 = arith.constant 1 : index
    %c0_127 = arith.constant 0 : index
    %c0_128 = arith.constant 0 : index
    %308 = vector.load %arg16[%c1_126, %c0_127, %c0_128] : memref<2x1x128xf32, #tpu.memory_space<vmem>>, vector<1x1x128xf32>
    %309 = vector.shape_cast %308 : vector<1x1x128xf32> to vector<1x128xf32>
    %310 = vector.broadcast %309 : vector<1x128xf32> to vector<16x128xf32>
    %311 = arith.addf %307, %310 : vector<16x128xf32>
    %312 = arith.mulf %311, %311 : vector<16x128xf32>
    %313 = arith.mulf %311, %312 : vector<16x128xf32>
    %cst_129 = arith.constant 4.471500e-02 : f32
    %314 = vector.broadcast %cst_129 : f32 to vector<16x128xf32>
    %315 = arith.mulf %314, %313 : vector<16x128xf32>
    %316 = arith.addf %311, %315 : vector<16x128xf32>
    %cst_130 = arith.constant 0.797884583 : f32
    %317 = vector.broadcast %cst_130 : f32 to vector<16x128xf32>
    %318 = arith.mulf %317, %316 : vector<16x128xf32>
    %319 = math.tanh %318 : vector<16x128xf32>
    %cst_131 = arith.constant 1.000000e+00 : f32
    %320 = vector.broadcast %cst_131 : f32 to vector<16x128xf32>
    %321 = arith.addf %320, %319 : vector<16x128xf32>
    %cst_132 = arith.constant 5.000000e-01 : f32
    %322 = vector.broadcast %cst_132 : f32 to vector<16x128xf32>
    %323 = arith.mulf %322, %321 : vector<16x128xf32>
    %324 = arith.mulf %311, %323 : vector<16x128xf32>
    %c1_133 = arith.constant 1 : index
    %c0_134 = arith.constant 0 : index
    %c0_135 = arith.constant 0 : index
    %325 = vector.load %arg17[%c1_133, %c0_134, %c0_135] : memref<2x128x64xbf16, #tpu.memory_space<vmem>>, vector<1x128x64xbf16>
    %326 = vector.shape_cast %325 : vector<1x128x64xbf16> to vector<128x64xbf16>
    %327 = arith.truncf %324 : vector<16x128xf32> to vector<16x128xbf16>
    %cst_136 = arith.constant dense<0.000000e+00> : vector<16x64xf32>
    %328 = tpu.matmul %327, %326, %cst_136 {dimension_numbers = #tpu.dot_dimension_numbers<[1], [0], [0], [1], [0, 0, 1, 1], [], []>} : vector<16x128xbf16>, vector<128x64xbf16>, vector<16x64xf32> -> vector<16x64xf32>
    %c1_137 = arith.constant 1 : index
    %c0_138 = arith.constant 0 : index
    %c0_139 = arith.constant 0 : index
    %329 = vector.load %arg18[%c1_137, %c0_138, %c0_139] : memref<2x1x64xf32, #tpu.memory_space<vmem>>, vector<1x1x64xf32>
    %330 = vector.shape_cast %329 : vector<1x1x64xf32> to vector<1x64xf32>
    %331 = vector.broadcast %330 : vector<1x64xf32> to vector<16x64xf32>
    %332 = arith.addf %328, %331 : vector<16x64xf32>
    %333 = arith.addf %303, %332 : vector<16x64xf32>
    %c1_140 = arith.constant 1 : index
    %c0_141 = arith.constant 0 : index
    %c0_142 = arith.constant 0 : index
    %334 = vector.load %arg19[%c1_140, %c0_141, %c0_142] : memref<2x1x64xf32, #tpu.memory_space<vmem>>, vector<1x1x64xf32>
    %335 = vector.shape_cast %334 : vector<1x1x64xf32> to vector<1x64xf32>
    %c1_143 = arith.constant 1 : index
    %c0_144 = arith.constant 0 : index
    %c0_145 = arith.constant 0 : index
    %336 = vector.load %arg20[%c1_143, %c0_144, %c0_145] : memref<2x1x64xf32, #tpu.memory_space<vmem>>, vector<1x1x64xf32>
    %337 = vector.shape_cast %336 : vector<1x1x64xf32> to vector<1x64xf32>
    %cst_146 = arith.constant dense<0.000000e+00> : vector<16xf32>
    %338 = vector.multi_reduction <add>, %333, %cst_146 [1] : vector<16x64xf32> to vector<16xf32>
    %339 = vector.shape_cast %338 : vector<16xf32> to vector<16x1xf32>
    %cst_147 = arith.constant 6.400000e+01 : f32
    %340 = vector.broadcast %cst_147 : f32 to vector<16x1xf32>
    %341 = arith.divf %339, %340 : vector<16x1xf32>
    %342 = vector.broadcast %341 : vector<16x1xf32> to vector<16x64xf32>
    %343 = arith.subf %333, %342 : vector<16x64xf32>
    %344 = arith.mulf %343, %343 : vector<16x64xf32>
    %cst_148 = arith.constant dense<0.000000e+00> : vector<16xf32>
    %345 = vector.multi_reduction <add>, %344, %cst_148 [1] : vector<16x64xf32> to vector<16xf32>
    %346 = vector.shape_cast %345 : vector<16xf32> to vector<16x1xf32>
    %cst_149 = arith.constant 6.400000e+01 : f32
    %347 = vector.broadcast %cst_149 : f32 to vector<16x1xf32>
    %348 = arith.divf %346, %347 : vector<16x1xf32>
    %cst_150 = arith.constant 9.99999974E-6 : f32
    %349 = vector.broadcast %cst_150 : f32 to vector<16x1xf32>
    %350 = arith.addf %348, %349 : vector<16x1xf32>
    %351 = math.rsqrt %350 : vector<16x1xf32>
    %352 = vector.broadcast %351 : vector<16x1xf32> to vector<16x64xf32>
    %353 = arith.mulf %343, %352 : vector<16x64xf32>
    %354 = vector.broadcast %335 : vector<1x64xf32> to vector<16x64xf32>
    %355 = arith.mulf %353, %354 : vector<16x64xf32>
    %356 = vector.broadcast %337 : vector<1x64xf32> to vector<16x64xf32>
    %357 = arith.addf %355, %356 : vector<16x64xf32>
    %c0_151 = arith.constant 0 : index
    %c0_152 = arith.constant 0 : index
    %358 = vector.load %arg21[%c0_151, %c0_152] : memref<1x64xf32, #tpu.memory_space<vmem>>, vector<1x64xf32>
    %c0_153 = arith.constant 0 : index
    %c0_154 = arith.constant 0 : index
    %359 = vector.load %arg22[%c0_153, %c0_154] : memref<1x64xf32, #tpu.memory_space<vmem>>, vector<1x64xf32>
    %cst_155 = arith.constant dense<0.000000e+00> : vector<16xf32>
    %360 = vector.multi_reduction <add>, %357, %cst_155 [1] : vector<16x64xf32> to vector<16xf32>
    %361 = vector.shape_cast %360 : vector<16xf32> to vector<16x1xf32>
    %cst_156 = arith.constant 6.400000e+01 : f32
    %362 = vector.broadcast %cst_156 : f32 to vector<16x1xf32>
    %363 = arith.divf %361, %362 : vector<16x1xf32>
    %364 = vector.broadcast %363 : vector<16x1xf32> to vector<16x64xf32>
    %365 = arith.subf %357, %364 : vector<16x64xf32>
    %366 = arith.mulf %365, %365 : vector<16x64xf32>
    %cst_157 = arith.constant dense<0.000000e+00> : vector<16xf32>
    %367 = vector.multi_reduction <add>, %366, %cst_157 [1] : vector<16x64xf32> to vector<16xf32>
    %368 = vector.shape_cast %367 : vector<16xf32> to vector<16x1xf32>
    %cst_158 = arith.constant 6.400000e+01 : f32
    %369 = vector.broadcast %cst_158 : f32 to vector<16x1xf32>
    %370 = arith.divf %368, %369 : vector<16x1xf32>
    %cst_159 = arith.constant 9.99999974E-6 : f32
    %371 = vector.broadcast %cst_159 : f32 to vector<16x1xf32>
    %372 = arith.addf %370, %371 : vector<16x1xf32>
    %373 = math.rsqrt %372 : vector<16x1xf32>
    %374 = vector.broadcast %373 : vector<16x1xf32> to vector<16x64xf32>
    %375 = arith.mulf %365, %374 : vector<16x64xf32>
    %376 = vector.broadcast %358 : vector<1x64xf32> to vector<16x64xf32>
    %377 = arith.mulf %375, %376 : vector<16x64xf32>
    %378 = vector.broadcast %359 : vector<1x64xf32> to vector<16x64xf32>
    %379 = arith.addf %377, %378 : vector<16x64xf32>
    %380 = vector.extract_strided_slice %379 {offsets = [0, 0], sizes = [8, 64], strides = [1, 1]} : vector<16x64xf32> to vector<8x64xf32>
    %381 = vector.extract_strided_slice %379 {offsets = [8, 0], sizes = [8, 64], strides = [1, 1]} : vector<16x64xf32> to vector<8x64xf32>
    %382 = tpu.concatenate %380, %381 in 1 : vector<8x64xf32>, vector<8x64xf32> -> vector<8x128xf32>
    %c0_160 = arith.constant 0 : index
    %c0_161 = arith.constant 0 : index
    %c0_162 = arith.constant 0 : index
    %383 = vector.load %arg24[%c0_160, %c0_161, %c0_162] : memref<1x8x128xf32, #tpu.memory_space<vmem>>, vector<1x8x128xf32>
    %384 = vector.shape_cast %383 : vector<1x8x128xf32> to vector<8x128xf32>
    %385 = vector.shape_cast %382 : vector<8x128xf32> to vector<1x8x128xf32>
    tpu.vector_store %arg24[%c0_160, %c0_161, %c0_162], %385 {strides = array<i32>} : memref<1x8x128xf32, #tpu.memory_space<vmem>>, vector<1x8x128xf32>,
    return
  }
  func.func @transform_0(%arg0: i32, %arg1: memref<2xi32, #tpu.memory_space<smem>>) -> (i32, i32, i32) {
    %c0_i32 = arith.constant 0 : i32
    %c0_i32_0 = arith.constant 0 : i32
    %c0_i32_1 = arith.constant 0 : i32
    return %arg0, %c0_i32, %c0_i32_0 : i32, i32, i32
  }
  func.func @transform_1(%arg0: i32, %arg1: memref<2xi32, #tpu.memory_space<smem>>) -> (i32, i32) {
    %c0_i32 = arith.constant 0 : i32
    %c0_i32_0 = arith.constant 0 : i32
    %c0_i32_1 = arith.constant 0 : i32
    return %c0_i32, %c0_i32_0 : i32, i32
  }
  func.func @transform_2(%arg0: i32, %arg1: memref<2xi32, #tpu.memory_space<smem>>) -> (i32, i32) {
    %c0_i32 = arith.constant 0 : i32
    %c0_i32_0 = arith.constant 0 : i32
    %c0_i32_1 = arith.constant 0 : i32
    return %c0_i32, %c0_i32_0 : i32, i32
  }
  func.func @transform_3(%arg0: i32, %arg1: memref<2xi32, #tpu.memory_space<smem>>) -> (i32, i32) {
    %c0_i32 = arith.constant 0 : i32
    %c0_i32_0 = arith.constant 0 : i32
    %c0_i32_1 = arith.constant 0 : i32
    return %c0_i32, %c0_i32_0 : i32, i32
  }
  func.func @transform_4(%arg0: i32, %arg1: memref<2xi32, #tpu.memory_space<smem>>) -> (i32, i32) {
    %c0_i32 = arith.constant 0 : i32
    %c0_i32_0 = arith.constant 0 : i32
    %c0_i32_1 = arith.constant 0 : i32
    return %c0_i32, %c0_i32_0 : i32, i32
  }
  func.func @transform_5(%arg0: i32, %arg1: memref<2xi32, #tpu.memory_space<smem>>) -> (i32, i32) {
    %c0_i32 = arith.constant 0 : i32
    %c0_i32_0 = arith.constant 0 : i32
    %c0_i32_1 = arith.constant 0 : i32
    return %c0_i32, %c0_i32_0 : i32, i32
  }
  func.func @transform_6(%arg0: i32, %arg1: memref<2xi32, #tpu.memory_space<smem>>) -> (i32, i32) {
    %c0_i32 = arith.constant 0 : i32
    %c0_i32_0 = arith.constant 0 : i32
    %c0_i32_1 = arith.constant 0 : i32
    return %c0_i32, %c0_i32_0 : i32, i32
  }
  func.func @transform_7(%arg0: i32, %arg1: memref<2xi32, #tpu.memory_space<smem>>) -> (i32, i32, i32) {
    %c0_i32 = arith.constant 0 : i32
    %c0_i32_0 = arith.constant 0 : i32
    %c0_i32_1 = arith.constant 0 : i32
    %c0_i32_2 = arith.constant 0 : i32
    return %c0_i32, %c0_i32_0, %c0_i32_1 : i32, i32, i32
  }
  func.func @transform_8(%arg0: i32, %arg1: memref<2xi32, #tpu.memory_space<smem>>) -> (i32, i32, i32) {
    %c0_i32 = arith.constant 0 : i32
    %c0_i32_0 = arith.constant 0 : i32
    %c0_i32_1 = arith.constant 0 : i32
    %c0_i32_2 = arith.constant 0 : i32
    return %c0_i32, %c0_i32_0, %c0_i32_1 : i32, i32, i32
  }
  func.func @transform_9(%arg0: i32, %arg1: memref<2xi32, #tpu.memory_space<smem>>) -> (i32, i32, i32) {
    %c0_i32 = arith.constant 0 : i32
    %c0_i32_0 = arith.constant 0 : i32
    %c0_i32_1 = arith.constant 0 : i32
    %c0_i32_2 = arith.constant 0 : i32
    return %c0_i32, %c0_i32_0, %c0_i32_1 : i32, i32, i32
  }
  func.func @transform_10(%arg0: i32, %arg1: memref<2xi32, #tpu.memory_space<smem>>) -> (i32, i32, i32) {
    %c0_i32 = arith.constant 0 : i32
    %c0_i32_0 = arith.constant 0 : i32
    %c0_i32_1 = arith.constant 0 : i32
    %c0_i32_2 = arith.constant 0 : i32
    return %c0_i32, %c0_i32_0, %c0_i32_1 : i32, i32, i32
  }
  func.func @transform_11(%arg0: i32, %arg1: memref<2xi32, #tpu.memory_space<smem>>) -> (i32, i32, i32) {
    %c0_i32 = arith.constant 0 : i32
    %c0_i32_0 = arith.constant 0 : i32
    %c0_i32_1 = arith.constant 0 : i32
    %c0_i32_2 = arith.constant 0 : i32
    return %c0_i32, %c0_i32_0, %c0_i32_1 : i32, i32, i32
  }
  func.func @transform_12(%arg0: i32, %arg1: memref<2xi32, #tpu.memory_space<smem>>) -> (i32, i32, i32) {
    %c0_i32 = arith.constant 0 : i32
    %c0_i32_0 = arith.constant 0 : i32
    %c0_i32_1 = arith.constant 0 : i32
    %c0_i32_2 = arith.constant 0 : i32
    return %c0_i32, %c0_i32_0, %c0_i32_1 : i32, i32, i32
  }
  func.func @transform_13(%arg0: i32, %arg1: memref<2xi32, #tpu.memory_space<smem>>) -> (i32, i32, i32) {
    %c0_i32 = arith.constant 0 : i32
    %c0_i32_0 = arith.constant 0 : i32
    %c0_i32_1 = arith.constant 0 : i32
    %c0_i32_2 = arith.constant 0 : i32
    return %c0_i32, %c0_i32_0, %c0_i32_1 : i32, i32, i32
  }
  func.func @transform_14(%arg0: i32, %arg1: memref<2xi32, #tpu.memory_space<smem>>) -> (i32, i32, i32) {
    %c0_i32 = arith.constant 0 : i32
    %c0_i32_0 = arith.constant 0 : i32
    %c0_i32_1 = arith.constant 0 : i32
    %c0_i32_2 = arith.constant 0 : i32
    return %c0_i32, %c0_i32_0, %c0_i32_1 : i32, i32, i32
  }
  func.func @transform_15(%arg0: i32, %arg1: memref<2xi32, #tpu.memory_space<smem>>) -> (i32, i32, i32) {
    %c0_i32 = arith.constant 0 : i32
    %c0_i32_0 = arith.constant 0 : i32
    %c0_i32_1 = arith.constant 0 : i32
    %c0_i32_2 = arith.constant 0 : i32
    return %c0_i32, %c0_i32_0, %c0_i32_1 : i32, i32, i32
  }
  func.func @transform_16(%arg0: i32, %arg1: memref<2xi32, #tpu.memory_space<smem>>) -> (i32, i32, i32) {
    %c0_i32 = arith.constant 0 : i32
    %c0_i32_0 = arith.constant 0 : i32
    %c0_i32_1 = arith.constant 0 : i32
    %c0_i32_2 = arith.constant 0 : i32
    return %c0_i32, %c0_i32_0, %c0_i32_1 : i32, i32, i32
  }
  func.func @transform_17(%arg0: i32, %arg1: memref<2xi32, #tpu.memory_space<smem>>) -> (i32, i32, i32) {
    %c0_i32 = arith.constant 0 : i32
    %c0_i32_0 = arith.constant 0 : i32
    %c0_i32_1 = arith.constant 0 : i32
    %c0_i32_2 = arith.constant 0 : i32
    return %c0_i32, %c0_i32_0, %c0_i32_1 : i32, i32, i32
  }
  func.func @transform_18(%arg0: i32, %arg1: memref<2xi32, #tpu.memory_space<smem>>) -> (i32, i32, i32) {
    %c0_i32 = arith.constant 0 : i32
    %c0_i32_0 = arith.constant 0 : i32
    %c0_i32_1 = arith.constant 0 : i32
    %c0_i32_2 = arith.constant 0 : i32
    return %c0_i32, %c0_i32_0, %c0_i32_1 : i32, i32, i32
  }
  func.func @transform_19(%arg0: i32, %arg1: memref<2xi32, #tpu.memory_space<smem>>) -> (i32, i32) {
    %c0_i32 = arith.constant 0 : i32
    %c0_i32_0 = arith.constant 0 : i32
    %c0_i32_1 = arith.constant 0 : i32
    return %c0_i32, %c0_i32_0 : i32, i32
  }
  func.func @transform_20(%arg0: i32, %arg1: memref<2xi32, #tpu.memory_space<smem>>) -> (i32, i32) {
    %c0_i32 = arith.constant 0 : i32
    %c0_i32_0 = arith.constant 0 : i32
    %c0_i32_1 = arith.constant 0 : i32
    return %c0_i32, %c0_i32_0 : i32, i32
  }
  func.func @transform_21(%arg0: i32, %arg1: memref<2xi32, #tpu.memory_space<smem>>) -> (i32, i32) {
    %c0_i32 = arith.constant 0 : i32
    %c0_i32_0 = arith.constant 0 : i32
    %c0_i32_1 = arith.constant 0 : i32
    return %c0_i32, %c0_i32_0 : i32, i32
  }
  func.func @transform_22(%arg0: i32, %arg1: memref<2xi32, #tpu.memory_space<smem>>) -> (i32, i32, i32) {
    %c0_i32 = arith.constant 0 : i32
    %c0_i32_0 = arith.constant 0 : i32
    %c0_i32_1 = arith.constant 0 : i32
    return %arg0, %c0_i32, %c0_i32_0 : i32, i32, i32
  }
}

</mosaic_0001>

<bundles_post_ra>
// kernel: encoder_forward.1
= control target key start
LH: loop header
LB: loop body
LE: loop exit
PB: predicated region body
PF: predicated region fallthrough
CT: control target
= control target key end

     0   :  { %s5006_s0 = inlined_call_operand.vmem [shape: s32[2], index: 0, kind: input, shape index: {}]   ;;  %s5007_s1 = inlined_call_operand.vmem [shape: f32[2,16,32], index: 1, kind: input, shape index: {}]   ;;  %s5008_s2 = inlined_call_operand.hbm [shape: f32[1,32], index: 2, kind: input, shape index: {}]   ;;  %s5009_s3 = inlined_call_operand.hbm [shape: f32[1,32], index: 3, kind: input, shape index: {}]   ;;  %s5010_s4 = inlined_call_operand.vmem [shape: bf16[32,64], index: 4, kind: input, shape index: {}]   ;;  %s5011_s5 = inlined_call_operand.hbm [shape: f32[1,64], index: 5, kind: input, shape index: {}]   ;;  %s5012_s6 = inlined_call_operand.vmem [shape: bf16[192,64], index: 6, kind: input, shape index: {}]   ;;  %s5013_s7 = inlined_call_operand.hbm [shape: f32[1,64], index: 7, kind: input, shape index: {}]   ;;  %s5014_s8 = inlined_call_operand.vmem [shape: bf16[2,64,192], index: 8, kind: input, shape index: {}]   ;;  %s5015_s9 = inlined_call_operand.vmem [shape: f32[2,1,192], index: 9, kind: input, shape index: {}]   ;;  %s5016_s10 = inlined_call_operand.vmem [shape: bf16[2,64,64], index: 10, kind: input, shape index: {}]   ;;  %s5017_s11 = inlined_call_operand.vmem [shape: f32[2,1,64], index: 11, kind: input, shape index: {}]   ;;  %s5018_s12 = inlined_call_operand.hbm [shape: f32[2,1,64], index: 12, kind: input, shape index: {}]   ;;  %s5019_s13 = inlined_call_operand.hbm [shape: f32[2,1,64], index: 13, kind: input, shape index: {}]   ;;  %s5020_s14 = inlined_call_operand.vmem [shape: bf16[2,64,128], index: 14, kind: input, shape index: {}]   ;;  %s5021_s15 = inlined_call_operand.hbm [shape: f32[2,1,128], index: 15, kind: input, shape index: {}]   ;;  %s5022_s16 = inlined_call_operand.vmem [shape: bf16[2,128,64], index: 16, kind: input, shape index: {}]   ;;  %s5023_s17 = inlined_call_operand.hbm [shape: f32[2,1,64], index: 17, kind: input, shape index: {}]   ;;  %s5024_s18 = inlined_call_operand.vmem [shape: f32[2,1,64], index: 18, kind: input, shape index: {}]   ;;  %s5025_s19 = inlined_call_operand.vmem [shape: f32[2,1,64], index: 19, kind: input, shape index: {}]   ;;  %s5026_s20 = inlined_call_operand.hbm [shape: f32[1,64], index: 20, kind: input, shape index: {}]   ;;  %s5027_s21 = inlined_call_operand.hbm [shape: f32[1,64], index: 21, kind: input, shape index: {}]   ;;  %s5028_s22 = inlined_call_operand.vmem [shape: f32[64,64], index: 22, kind: input, shape index: {}]   ;;  %s5029_s23 = inlined_call_operand.vmem [shape: f32[2,8,128], index: 23, kind: output, shape index: {}]  }
   0x1   :  { %5047 = sst [smem:[#allocation27_spill]] %s5006_s0 }
   0x2   :  { %5048 = sst [smem:[#allocation28_spill]] %s5007_s1 }
   0x3   :  { %5049 = sst [smem:[#allocation29_spill]] %s5008_s2 }
   0x4   :  { %5050 = sst [smem:[#allocation30_spill]] %s5009_s3 }
   0x5   :  { %5051 = sst [smem:[#allocation31_spill]] %s5010_s4 }
   0x6   :  { %5052 = sst [smem:[#allocation32_spill]] %s5011_s5 }
   0x7   :  { %5053 = sst [smem:[#allocation33_spill]] %s5012_s6 }
   0x8   :  { %5054 = sst [smem:[#allocation34_spill]] %s5013_s7 }
   0x9   :  { %5055 = sst [smem:[#allocation35_spill]] %s5022_s16 }
   0xa   :  { %s5056_s24 = sld [smem:[#allocation27_spill]] }
  0x10   :  { %s28_s16 = sshll.u32 %s5056_s24, 4  ;;  %s29_s16 = int_to_ptr.vmem [resolvable:$true] %s28_s16 }
  0x11   :  { %s3800_s25 = scalar_lea.vmem %s29_s16, 16  ;;  %p3805_p1 = scmp.lt.s32.totalorder %s29_s16, %s29_s16 }
  0x12   :  { %p3801_p0 = scmp.ne.s32.totalorder %s29_s16, %s3800_s25  ;;  %p3806_p2 = scmp.lt.s32.totalorder %s3800_s25, %s3800_s25 }
  0x14   :  { %p3807_p3 = por %p3806_p2, %p3805_p1 }
  0x16   :  { %p3808_p4 = pnand %p3807_p3, %p3801_p0 }
  0x18   :  { %3811 = shalt.err (!%p3808_p4)  }
  0x19   :  { %s4106_s5 = smov [#allocation3]  }
  0x1a   :  { %31 = dma.vmem_to_smem %s29_s16, 16, %s4106_s5, [#allocation2] }
  0x1b   :  { %4076 = dma.done.wait [#allocation2], 16 }
  0x1c   :  { %4077 = vsyncadd [#allocation2], 4294967280 }
  0x1d   :  { %33 = sfence }
  0x1e   :  { %34 = vsyncpa [#allocation5], 0 }
  0x1f   :  { %35 = vsyncpa [#allocation7], 0 }
  0x20   :  { %36 = vsyncpa [#allocation10], 0 }
  0x21   :  { %37 = vsyncpa [#allocation13], 0 }
  0x22   :  { %38 = vsyncpa [#allocation16], 0 }
  0x23   :  { %39 = vsyncpa [#allocation19], 0  ;;  %s4253_s1 = smov 0  }
  0x24 LB: > { %s4107_s16 = smov [#allocation6]   ;;  %s4259_s2 = sadd.s32 4294967295, %s4104_s1   ;;  %s4104_s1 = sphi %s4253_s1, %s45_s1  }
  0x25   : > { %s567_s26 = sshll.u32 %s4107_s16, 4  ;;  %p3052_p5 = scmp.ge.s32.totalorder %s4104_s1, 1  ;;  %s568_s26 = int_to_ptr.vmem [resolvable:$true] %s567_s26 }
  0x26   : > { %p543_p6 = scmp.lt.s32.totalorder %s4104_s1, 3  ;;  %p5033_p7 = scmp.eq.s32.totalorder %s4259_s2, 0 }
  0x27   : > { %s4108_s27 = smov [#allocation9]   ;;  %s4109_s29 = smov [#allocation12]  }
  0x28   : > { %p4264_p8 = pnand %p3052_p5, %p543_p6  ;;  %s595_s7 = sshll.u32 %s4108_s27, 4  ;;  %s4270_s7 = int_to_ptr.vmem [resolvable:$true] %s595_s7 }
  0x29   : > { %s630_s3 = sshll.u32 %s4109_s29, 4  ;;  %s4110_s0 = smov [#allocation15]   ;;  %s4278_s3 = int_to_ptr.vmem [resolvable:$true] %s630_s3 }
  0x2a   : > { %p3512_p9 = pneg %p4264_p8  ;;  %s4280_s4 = sshll.u32 %s4110_s0, 4  ;;  %s663_s4 = int_to_ptr.vmem [resolvable:$true] %s4280_s4 }
  0x2b   : > { %s3823_s24 = scalar_lea.vmem %s568_s26, 16  ;;  %s3830_s25 = scalar_lea.vmem %s568_s26, 32 }
  0x2c   : > { %p4274_p10 = pnand %p5033_p7, %p3512_p9  ;;  %p3824_p12 = scmp.ne.s32.totalorder %s568_s26, %s3823_s24 }
  0x2d   : > { %p3831_p1 = scmp.lt.s32.totalorder %s568_s26, %s568_s26  ;;  %p3832_p2 = scmp.lt.s32.totalorder %s3830_s25, %s3823_s24 }
  0x2e   : > { %p4284_p11 = pneg %p4274_p10 }
  0x2f   : > { %p3833_p3 = por %p3832_p2, %p3831_p1 }
  0x30   : > { %p3826_p13 = pnand %p3824_p12, %p4284_p11 }
  0x32   : > { %p3827_p0 = pneg %p3826_p13 }
  0x34   : > { %p3834_p4 = pnand %p3833_p3, %p3827_p0 }
  0x36   : > { %3837 = shalt.err (!%p3834_p4)
}
  0x37   : > { %s5060_s27 = sld [smem:[#allocation30_spill]]  ;;  %s3849_s29 = scalar_lea.vmem %s4270_s7, 16 }
  0x38   : > { %p3850_p5 = scmp.ne.s32.totalorder %s4270_s7, %s3849_s29  ;;  %s3856_s0 = scalar_lea.vmem %s4270_s7, 32 }
  0x39   : > { %p3857_p12 = scmp.lt.s32.totalorder %s4270_s7, %s4270_s7  ;;  %p3858_p13 = scmp.lt.s32.totalorder %s3856_s0, %s3849_s29 }
  0x3a   : > { %p3852_p6 = pnand %p3850_p5, %p4284_p11 }
  0x3b   : > { %p3859_p0 = por %p3858_p13, %p3857_p12 }
  0x3c   : > { %p3853_p9 = pneg %p3852_p6 }
  0x3d   : > { %3518 = dma.hbm_to_vmem [thread:$0]  (!%p4274_p10), %s5060_s27, 16, %s568_s26, [#allocation7]  }
  0x3e   : > { %p3860_p1 = pnand %p3859_p0, %p3853_p9 }
  0x40   : > { %3863 = shalt.err (!%p3860_p1)
}
  0x41   : > { %s5061_s5 = sld [smem:[#allocation34_spill]]  ;;  %s3875_s26 = scalar_lea.vmem %s4278_s3, 32 }
  0x42   : > { %p3876_p2 = scmp.ne.s32.totalorder %s4278_s3, %s3875_s26  ;;  %p3883_p5 = scmp.lt.s32.totalorder %s4278_s3, %s4278_s3 }
  0x43   : > { %p3884_p6 = scmp.lt.s32.totalorder %s3875_s26, %s3875_s26 }
  0x44   : > { %p3878_p3 = pnand %p3876_p2, %p4284_p11 }
  0x45   : > { %p3885_p9 = por %p3884_p6, %p3883_p5 }
  0x46   : > { %p3879_p4 = pneg %p3878_p3 }
  0x47   : > { %3524 = dma.hbm_to_vmem [thread:$0]  (!%p4274_p10), %s5061_s5, 16, %s4270_s7, [#allocation10]  }
  0x48   : > { %p3886_p12 = pnand %p3885_p9, %p3879_p4 }
  0x4a   : > { %3889 = shalt.err (!%p3886_p12)
}
  0x4b   : > { %s5034_s16 = smov 16   ;;  %s5036_s27 = smov 1  }
  0x4c   : > { %3530 = dma.hbm_to_vmem [thread:$0]  (!%p4274_p10), %s5019_s13, 32, %s4278_s3, [#allocation13], %s5034_s16, %s5034_s16, %s5036_s27  }
  0x4d   : > { %s3901_s0 = scalar_lea.vmem %s663_s4, 32  ;;  %p3909_p2 = scmp.lt.s32.totalorder %s663_s4, %s663_s4 }
  0x4e   : > { %p3902_p13 = scmp.ne.s32.totalorder %s663_s4, %s3901_s0  ;;  %p3910_p3 = scmp.lt.s32.totalorder %s3901_s0, %s3901_s0 }
  0x50   : > { %p3904_p0 = pnand %p3902_p13, %p4284_p11  ;;  %p3911_p4 = por %p3910_p3, %p3909_p2 }
  0x52   : > { %p3905_p1 = pneg %p3904_p0 }
  0x54   : > { %p3912_p5 = pnand %p3911_p4, %p3905_p1 }
  0x56   : > { %3915 = shalt.err (!%p3912_p5)
}
  0x57   : > { %3536 = dma.hbm_to_vmem [thread:$0]  (!%p4274_p10), %s5023_s17, 32, %s663_s4, [#allocation16], %s5034_s16, %s5034_s16, %s5036_s27  }
  0x58   : > { %s4113_s3 = smov [#allocation4]   ;;  %s4114_s26 = smov [#allocation8]  }
  0x59   : > { %s556_s5 = sshll.u32 %s4113_s3, 4  ;;  %s581_s7 = sshll.u32 %s4114_s26, 4  ;;  %s557_s5 = int_to_ptr.vmem [resolvable:$true] %s556_s5  ;;  %s582_s7 = int_to_ptr.vmem [resolvable:$true] %s581_s7 }
  0x5a   : > { %s3927_s29 = scalar_lea.vmem %s557_s5, 16  ;;  %s3934_s0 = scalar_lea.vmem %s557_s5, 32 }
  0x5b   : > { %p3928_p6 = scmp.ne.s32.totalorder %s557_s5, %s3927_s29  ;;  %p3935_p13 = scmp.lt.s32.totalorder %s557_s5, %s557_s5 }
  0x5c   : > { %p3936_p0 = scmp.lt.s32.totalorder %s3934_s0, %s3927_s29 }
  0x5d   : > { %p3930_p9 = pnand %p3928_p6, %p4284_p11 }
  0x5e   : > { %p3937_p1 = por %p3936_p0, %p3935_p13 }
  0x5f   : > { %p3931_p12 = pneg %p3930_p9 }
  0x61   : > { %p3938_p2 = pnand %p3937_p1, %p3931_p12 }
  0x63   : > { %3941 = shalt.err (!%p3938_p2)
}
  0x64   : > { %s5062_s25 = sld [smem:[#allocation29_spill]]  ;;  %s3953_s3 = scalar_lea.vmem %s582_s7, 16 }
  0x65   : > { %p3954_p3 = scmp.ne.s32.totalorder %s582_s7, %s3953_s3  ;;  %s3960_s26 = scalar_lea.vmem %s582_s7, 32 }
  0x66   : > { %p3961_p6 = scmp.lt.s32.totalorder %s582_s7, %s582_s7  ;;  %p3962_p9 = scmp.lt.s32.totalorder %s3960_s26, %s3953_s3 }
  0x67   : > { %p3956_p4 = pnand %p3954_p3, %p4284_p11 }
  0x68   : > { %p3963_p7 = por %p3962_p9, %p3961_p6 }
  0x69   : > { %p3957_p5 = pneg %p3956_p4 }
  0x6a   : > { %3515 = dma.hbm_to_vmem [thread:$0]  (!%p4274_p10), %s5062_s25, 16, %s557_s5, [#allocation5]  }
  0x6b   : > { %p3964_p13 = pnand %p3963_p7, %p3957_p5 }
  0x6d   : > { %3967 = shalt.err (!%p3964_p13)
}
  0x6e   : > { %s5063_s16 = sld [smem:[#allocation32_spill]]  ;;  %s4115_s5 = smov [#allocation11]  }
  0x6f   : > { %s617_s24 = sshll.u32 %s4115_s5, 4  ;;  %s4116_s4 = smov [#allocation14]   ;;  %s618_s24 = int_to_ptr.vmem [resolvable:$true] %s617_s24 }
  0x70   : > { %s646_s25 = sshll.u32 %s4116_s4, 4  ;;  %s3979_s27 = scalar_lea.vmem %s618_s24, 32  ;;  %s647_s25 = int_to_ptr.vmem [resolvable:$true] %s646_s25 }
  0x71   : > { %p3980_p12 = scmp.ne.s32.totalorder %s618_s24, %s3979_s27  ;;  %p3987_p2 = scmp.lt.s32.totalorder %s618_s24, %s618_s24 }
  0x72   : > { %p3988_p7 = scmp.lt.s32.totalorder %s3979_s27, %s3979_s27 }
  0x73   : > { %p3982_p0 = pnand %p3980_p12, %p4284_p11 }
  0x74   : > { %3521 = dma.hbm_to_vmem [thread:$0]  (!%p4274_p10), %s5063_s16, 16, %s582_s7, [#allocation7]  }
  0x75   : > { %p3983_p1 = pneg %p3982_p0  ;;  %p3989_p3 = por %p3988_p7, %p3987_p2 }
  0x77   : > { %p3990_p4 = pnand %p3989_p3, %p3983_p1 }
  0x79   : > { %3993 = shalt.err (!%p3990_p4)
}
  0x7a   : > { %s5064_s3 = smov 1   ;;  %s5065_s26 = smov 16  }
  0x7b   : > { %3527 = dma.hbm_to_vmem [thread:$0]  (!%p4274_p10), %s5018_s12, 32, %s618_s24, [#allocation10], %s5065_s26, %s5065_s26, %s5064_s3  }
  0x7c   : > { %s4005_s29 = scalar_lea.vmem %s647_s25, 32  ;;  %p4013_p13 = scmp.lt.s32.totalorder %s647_s25, %s647_s25 }
  0x7d   : > { %p4006_p5 = scmp.ne.s32.totalorder %s647_s25, %s4005_s29  ;;  %p4014_p12 = scmp.lt.s32.totalorder %s4005_s29, %s4005_s29 }
  0x7f   : > { %p4008_p6 = pnand %p4006_p5, %p4284_p11  ;;  %p4015_p0 = por %p4014_p12, %p4013_p13 }
  0x81   : > { %p4009_p9 = pneg %p4008_p6 }
  0x83   : > { %p4016_p1 = pnand %p4015_p0, %p4009_p9 }
  0x85   : > { %4019 = shalt.err (!%p4016_p1)
}
  0x86   : > { %3533 = dma.hbm_to_vmem [thread:$0]  (!%p4274_p10), %s5021_s15, 32, %s647_s25, [#allocation13], %s5065_s26, %s5065_s26, %s5064_s3  }
  0x87   : > { %s4117_s5 = smov [#allocation17]   ;;  %s4118_s4 = smov [#allocation18]  }
  0x88   : > { %s682_s24 = sshll.u32 %s4117_s5, 4  ;;  %s693_s16 = sshll.u32 %s4118_s4, 4  ;;  %s683_s24 = int_to_ptr.vmem [resolvable:$true] %s682_s24  ;;  %s694_s16 = int_to_ptr.vmem [resolvable:$true] %s693_s16 }
  0x89   : > { %s4031_s7 = scalar_lea.vmem %s683_s24, 16  ;;  %s4038_s29 = scalar_lea.vmem %s683_s24, 32 }
  0x8a   : > { %p4032_p2 = scmp.ne.s32.totalorder %s683_s24, %s4031_s7  ;;  %p4039_p4 = scmp.lt.s32.totalorder %s683_s24, %s683_s24 }
  0x8b   : > { %p4040_p5 = scmp.lt.s32.totalorder %s4038_s29, %s4031_s7 }
  0x8c   : > { %p4034_p7 = pnand %p4032_p2, %p4284_p11 }
  0x8d   : > { %p4041_p6 = por %p4040_p5, %p4039_p4 }
  0x8e   : > { %p4035_p3 = pneg %p4034_p7 }
  0x90   : > { %p4042_p9 = pnand %p4041_p6, %p4035_p3 }
  0x92   : > { %4045 = shalt.err (!%p4042_p9)
}
  0x93   : > { %3539 = dma.hbm_to_vmem [thread:$0]  (!%p4274_p10), %s5026_s20, 16, %s683_s24, [#allocation16]  }
  0x94   : > { %s4057_s3 = scalar_lea.vmem %s694_s16, 16  ;;  %s4064_s26 = scalar_lea.vmem %s694_s16, 32 }
  0x95   : > { %p4058_p13 = scmp.ne.s32.totalorder %s694_s16, %s4057_s3  ;;  %p4065_p1 = scmp.lt.s32.totalorder %s694_s16, %s694_s16 }
  0x96   : > { %p4066_p2 = scmp.lt.s32.totalorder %s4064_s26, %s4057_s3 }
  0x97   : > { %p4060_p12 = pnand %p4058_p13, %p4284_p11 }
  0x98   : > { %p4067_p7 = por %p4066_p2, %p4065_p1 }
  0x99   : > { %p4061_p0 = pneg %p4060_p12 }
  0x9b   : > { %p4068_p4 = pnand %p4067_p7, %p4061_p0 }
  0x9d   : > { %4071 = shalt.err (!%p4068_p4)
}
  0x9e   : > { %3542 = dma.hbm_to_vmem [thread:$0]  (!%p4274_p10), %s5027_s21, 16, %s694_s16, [#allocation19]  }
  0x9f   : > { %717 = sbr.rel (%p4264_p8) target bundleno = 6676 (0x1a14), region = 108  ;;  %p5066_p3 = scmp.eq.s32.totalorder (!%p4264_p8), %s4259_s2, 0 }
  0xa4   : > { %4079 = dma.done.wait (%p5066_p3), [#allocation5], 16   ;;  %p5067_p11 = pmov %p5066_p3 }
  0xa5   : > { %p5068_p5 = pmov %p5066_p3 }
  0xa6   : > { %4081 = vsyncadd (%p5067_p11), [#allocation5], 4294967280 }
  0xa7   : > { %4083 = dma.done.wait (%p5068_p5), [#allocation7], 32   ;;  %p5069_p6 = pmov %p5066_p3 }
  0xa8   : > { %p5070_p9 = pmov %p5066_p3 }
  0xa9   : > { %4085 = vsyncadd (%p5069_p6), [#allocation7], 4294967264 }
  0xaa   : > { %4087 = dma.done.wait (%p5070_p9), [#allocation10], 48   ;;  %p5071_p10 = pmov %p5066_p3 }
  0xab   : > { %p5072_p8 = pmov %p5066_p3 }
  0xac   : > { %4089 = vsyncadd (%p5071_p10), [#allocation10], 4294967248 }
  0xad   : > { %4091 = dma.done.wait (%p5072_p8), [#allocation13], 64   ;;  %p5073_p13 = pmov %p5066_p3 }
  0xae   : > { %p5074_p12 = pmov %p5066_p3 }
  0xaf   : > { %4093 = vsyncadd (%p5073_p13), [#allocation13], 4294967232 }
  0xb0   : > { %4095 = dma.done.wait (%p5074_p12), [#allocation16], 48   ;;  %p5075_p0 = pmov %p5066_p3 }
  0xb2   : > { %4097 = vsyncadd (%p5075_p0), [#allocation16], 4294967248  ;;  %p5076_p1 = pmov %p5075_p0 }
  0xb3   : > { %p5077_p2 = pmov %p5075_p0 }
  0xb4   : > { %4099 = dma.done.wait (%p5076_p1), [#allocation19], 16  }
  0xb5   : > { %4101 = vsyncadd (%p5077_p2), [#allocation19], 4294967280  ;;  %p814_p7 = scmp.lt.s32.totalorder %s4259_s2, 1  ;;  %s5078_s4 = sld [smem:[#allocation28_spill]]  ;;  %vm855_vm0 = vcmask 261120   ;;  %v4119_v15 = vmov 0.0   ;;  %v825_v46 = vlaneseq }
  0xb6   : > { %s5079_s27 = sld [smem:[#allocation31_spill]]  ;;  %3304 = vmatprep.subr.bf16.mxu1 %v4119_v15  ;;  %vm4120_vm1 = vmmov 0   ;;  %v3078_v25 = vld [vmem:[#allocation4] ss:$0 sm:$0xff]  ;;  %v3079_v29 = vld [vmem:[#allocation6] ss:$0 sm:$0xff] }
  0xb7   : > { %s4410_s6 = scalar_select %p814_p7, %s4259_s2, 1  ;;  %3308 = vmatprep.mubr.msk.bf16.mxu1 %vm4120_vm1, %v4119_v15  ;;  %v4121_v35 = vmov 0   ;;  %v4482_v48 = vshrl.u32 %v825_v46, 7  ;;  %v3080_v49 = vld [vmem:[#allocation8] ss:$0 sm:$0xff]  ;;  %vm1038_vm6 = vcmask 523264  }
  0xb8   : > { %s5080_s5 = sld [smem:[#allocation33_spill]]  ;;  %1306 = vmatprep.mubr.bf16.mxu0 %v4121_v35  ;;  %vm853_vm9 = vcmask 130048   ;;  %s5045_s3 = smov 80   ;;  %vm857_vm11 = vcmask 392192  }
  0xb9   : > { %s3230_s28 = sshll.u32 %s4410_s6, 4  ;;  %s824_s26 = sld [smem:[#allocation3 + %s4259_s2]]  ;;  %v827_v52 = vadd.s32 8, %v4482_v48  ;;  %vm1013_vm4 = vcmp.lt.s32.totalorder %v4482_v48, 7  ;;  %vm994_vm7 = vcmp.lt.s32.totalorder %v4482_v48, 1 }
  0xba   : > { %s5038_s2 = smov 64   ;;  %s5043_s0 = smov 112  }
  0xbb   : > { %s818_s16 = scalar_lea.vmem %s5078_s4, %s3230_s28  ;;  %v1017_v56 = vadd.s32 1, %v827_v52  ;;  %s5042_s28 = smov 16  }
  0xbc   : > { %v871_v0 = vld [vmem:[%s818_s16] sm:$0xff]  ;;  %v872_v1 = vld [vmem:[%s818_s16 + $0x8] sm:$0xff]  ;;  %s5040_s30 = smov 32   ;;  %s5041_s24 = smov 48  }
  0xbd   : > { %v875_v2 = vsel %vm855_vm0, %v871_v0, 0.0  ;;  %v878_v3 = vsel %vm855_vm0, %v872_v1, 0.0  ;;  %v3630_v14 = vld [vmem:[%s5079_s27 + $0x8] sm:$0xff]   ;;  %v3631_v16 = vld [vmem:[%s5079_s27] sm:$0xff]   ;;  %vm1021_vm5 = vcmp.lt.s32.totalorder %v1017_v56, 16  ;;  %s5081_s7 = sld [smem:[#allocation35_spill]] }
  0xbe   : > { %876 = vadd.xlane.f32.xlu0 %v875_v2  ;;  %3305 = vmatpush3.bf16.msra.mxu1 %v3630_v14  ;;  %v3632_v34 = vld [vmem:[%s5080_s5 + $0x38] sm:$0xff]   ;;  %v3633_v36 = vld [vmem:[%s5080_s5 + $0x30] sm:$0xff]   ;;  %v3634_v37 = vld [vmem:[%s5080_s5 + $0x28] sm:$0xff]   ;;  %s5082_s25 = smov 80   ;;  %s5083_s4 = smov 112  }
  0xbf   : > { %3306 = vmatprep.subr.bf16.mxu1 %v4119_v15  ;;  %v3635_v38 = vld [vmem:[%s5080_s5 + $0x20] sm:$0xff]   ;;  %v3636_v39 = vld [vmem:[%s5080_s5 + $0x18] sm:$0xff]   ;;  %v3637_v40 = vld [vmem:[%s5080_s5 + $0x10] sm:$0xff]   ;;  %v4484_v50 = vstv %s824_s26  ;;  %s4124_s26 = smov 96   ;;  %s5084_s16 = smov 64  }
  0xc0   : > { %v3638_v41 = vld [vmem:[%s5080_s5 + $0x8] sm:$0xff]   ;;  %v3639_v42 = vld [vmem:[%s5080_s5] sm:$0xff]   ;;  %v3640_v43 = vld [vmem:[%s5080_s5 + $0x58] sm:$0xff]   ;;  %vm829_vm2 = vcmp.lt.s32.totalorder %v4482_v48, %v4484_v50  ;;  %vm830_vm3 = vcmp.lt.s32.totalorder %v827_v52, %v4484_v50 }
  0xc1   : > { %v3641_v44 = vld [vmem:[%s5080_s5 + $0x50] sm:$0xff]   ;;  %v3642_v45 = vld [vmem:[%s5080_s5 + $0x48] sm:$0xff]   ;;  %v3643_v47 = vld [vmem:[%s5080_s5 + $0x40] sm:$0xff]  }
  0xc2   : > { %879 = vadd.xlane.f32.xlu0 %v878_v3  ;;  %3307 = vmatpush3.bf16.msra.mxu1 %v3631_v16 }
  0xc3   : > { %1149 = vmatprep.subr.bf16.mxu1 %v4121_v35 }
 0x147   : > { %v877_v4 = vpop.xlane.xlu0 %876 }
 0x148   : > { %v882_v5 = vmul.f32 0.03125, %v877_v4 }
 0x14a   : > { %v884_v6 = vsub.f32 %v871_v0, %v882_v5  ;;  %v997_v5 = vadd.s32 4294967295, %v4482_v48 }
 0x14b   : > { %v880_v7 = vpop.xlane.xlu0 %879 }
 0x14c   : > { %v883_v8 = vmul.f32 0.03125, %v880_v7  ;;  %v886_v9 = vmul.f32 %v884_v6, %v884_v6  ;;  %vm999_vm8 = vcmp.ge.s32.totalorder %v997_v5, 0  ;;  %v832_v5 = vand.u32 127, %v825_v46 }
 0x14e   : > { %v885_v10 = vsub.f32 %v872_v1, %v883_v8  ;;  %v888_v11 = vsel %vm855_vm0, %v886_v9, 0.0  ;;  %vm833_vm10 = vcmp.lt.s32.totalorder %v832_v5, %v4484_v50 }
 0x14f   : > { %889 = vadd.xlane.f32.xlu1 %v888_v11 }
 0x150   : > { %v887_v12 = vmul.f32 %v885_v10, %v885_v10 }
 0x152   : > { %v891_v13 = vsel %vm855_vm0, %v887_v12, 0.0 }
 0x153   : > { %892 = vadd.xlane.f32.xlu1 %v891_v13 }
 0x1d8   : > { %v890_v17 = vpop.xlane.xlu1 %889 }
 0x1d9   : > { %v894_v18 = vmul.f32 0.03125, %v890_v17  ;;  %v3644_v17 = vld [vmem:[%s5014_s8 + $0x34] ss:$8 sps:$4 sm:$0xff]  }
 0x1da   : > { %1282 = vmatprep.subr.bf16.mxu0 %v3644_v17 }
 0x1db   : > { %v896_v19 = vadd.f32 1e-05, %v894_v18  ;;  %v3646_v18 = vld [vmem:[%s5014_s8 + $0x30] ss:$8 sps:$4 sm:$0xff]  }
 0x1dc   : > { %v893_v20 = vpop.xlane.xlu1 %892  ;;  %1283 = vmatpush1.bf16.msra.mxu0 %v3646_v18 }
 0x1dd   : > { %3700 = vrsqrt.f32 %v896_v19  ;;  %v895_v21 = vmul.f32 0.03125, %v893_v20  ;;  %v3647_v19 = vld [vmem:[%s5014_s8 + $0x24] ss:$8 sps:$4 sm:$0xff]   ;;  %v3649_v20 = vld [vmem:[%s5014_s8 + $0x20] ss:$8 sps:$4 sm:$0xff]  }
 0x1de   : > { %1284 = vmatprep.subr.bf16.mxu0 %v3647_v19 }
 0x1df   : > { %v897_v22 = vadd.f32 1e-05, %v895_v21  ;;  %v3650_v21 = vld [vmem:[%s5014_s8 + $0x14] ss:$8 sps:$4 sm:$0xff]  }
 0x1e0   : > { %1285 = vmatpush1.bf16.msra.mxu0 %v3649_v20 }
 0x1e1   : > { %3702 = vrsqrt.f32 %v897_v22  ;;  %v3652_v22 = vld [vmem:[%s5014_s8 + $0x10] ss:$8 sps:$4 sm:$0xff]   ;;  %1286 = vmatprep.subr.bf16.mxu0 %v3650_v21 }
 0x1e4   : > { %1287 = vmatpush1.bf16.msra.mxu0 %v3652_v22  ;;  %v837_v22 = vld [vmem:[%s5028_s22 + $0x10] sm:$0xff] }
 0x1ea   : > { %v3701_v23 = vpop.eup %3700 }
 0x1eb   : > { %v900_v24 = vmul.f32 %v3701_v23, %v884_v6  ;;  %v3653_v23 = vld [vmem:[%s5014_s8 + $0x4] ss:$8 sps:$4 sm:$0xff]  }
 0x1ec   : > { %1288 = vmatprep.subr.bf16.mxu0 %v3653_v23 }
 0x1ed   : > { %v908_v28 = vmul.f32 %v3078_v25, %v900_v24  ;;  %v3655_v24 = vld [vmem:[%s5014_s8] ss:$8 sps:$4 sm:$0xff]  }
 0x1ee   : > { %v3703_v26 = vpop.eup %3702  ;;  %1289 = vmatpush1.bf16.msra.mxu0 %v3655_v24 }
 0x1ef   : > { %v901_v27 = vmul.f32 %v3703_v26, %v885_v10  ;;  %v916_v31 = vadd.f32 %v3079_v29, %v908_v28 }
 0x1f1   : > { %v909_v30 = vmul.f32 %v3078_v25, %v901_v27  ;;  %v3084_v25 = vld [vmem:[#allocation9] ss:$0 sm:$0xff] }
 0x1f3   : > { %v917_v32 = vadd.f32 %v3079_v29, %v909_v30 }
 0x1f5   : > { %v922_v33 = vpack.c.bf16 %v917_v32, %v916_v31 }
 0x1f7   : > { %3309 = vmatmul.mubr.msk.bf16.vlgmr.msra.gmra.mxu1 %vm855_vm0, %v922_v33 }
 0x1f8   : > { %1150 = vmatpush1.bf16.msra.mxu1 %v3632_v34 }
 0x1f9   : > { %1151 = vmatprep.subr.bf16.mxu1 %v4121_v35 }
 0x1fc   : > { %1152 = vmatpush1.bf16.msra.mxu1 %v3633_v36 }
 0x1fd   : > { %1153 = vmatprep.subr.bf16.mxu1 %v4121_v35 }
 0x200   : > { %1154 = vmatpush1.bf16.msra.mxu1 %v3634_v37 }
 0x201   : > { %1155 = vmatprep.subr.bf16.mxu1 %v4121_v35 }
 0x204   : > { %1156 = vmatpush1.bf16.msra.mxu1 %v3635_v38 }
 0x205   : > { %1157 = vmatprep.subr.bf16.mxu1 %v4121_v35 }
 0x208   : > { %1158 = vmatpush1.bf16.msra.mxu1 %v3636_v39 }
 0x209   : > { %1159 = vmatprep.subr.bf16.mxu1 %v4121_v35 }
 0x20c   : > { %1160 = vmatpush1.bf16.msra.mxu1 %v3637_v40 }
 0x20d   : > { %1161 = vmatprep.subr.bf16.mxu1 %v4121_v35 }
 0x210   : > { %1162 = vmatpush1.bf16.msra.mxu1 %v3638_v41 }
 0x211   : > { %1163 = vmatprep.subr.bf16.mxu1 %v4121_v35 }
 0x214   : > { %1164 = vmatpush1.bf16.msra.mxu1 %v3639_v42 }
 0x215   : > { %1173 = vmatprep.subr.bf16.mxu1 %v4121_v35 }
 0x218   : > { %1174 = vmatpush2.bf16.msra.mxu1 %v3640_v43 }
 0x219   : > { %1175 = vmatprep.subr.bf16.mxu1 %v4121_v35 }
 0x21c   : > { %1176 = vmatpush2.bf16.msra.mxu1 %v3641_v44 }
 0x21d   : > { %1177 = vmatprep.subr.bf16.mxu1 %v4121_v35 }
 0x220   : > { %1178 = vmatpush2.bf16.msra.mxu1 %v3642_v45 }
 0x221   : > { %1179 = vmatprep.subr.bf16.mxu1 %v4121_v35 }
 0x224   : > { %1180 = vmatpush2.bf16.msra.mxu1 %v3643_v47 }
 0x2b7   : > { %v979_v51 = vpop.f32.mrf.mxu1 }
 0x2b8   : > { %v980_v53 = vadd.f32 %v3080_v49, %v979_v51 }
 0x2b9   : > { %v3310_v54 = vpop.f32.mrf.mxu1 }
 0x2ba   : > { %v4490_v57 = vsel %vm829_vm2, %v980_v53, 0.0 }
 0x2bb   : > { %v982_v55 = vpop.f32.mrf.mxu1  ;;  %v1011_v61 = vrot.slane %v4490_v57, 1  ;;  %v992_v6 = vrot.slane %v4490_v57, 7 }
 0x2bc   : > { %v983_v58 = vadd.f32 %v3080_v49, %v982_v55 }
 0x2bd   : > { %v3311_v59 = vpop.f32.mrf.mxu1 }
 0x2be   : > { %v4492_v60 = vsel %vm830_vm3, %v983_v58, 0.0  ;;  %v4541_v58 = vsub.s32 0, %v4482_v48  ;;  %v4546_v59 = vld [vmem:[%s5015_s9] sm:$0x3] }
 0x2bf   : > { %v1012_v62 = vrot.slane %v4492_v60, 1  ;;  %v3595_v63 = vpack.i.bf16 %v4492_v60, %v4490_v57  ;;  %v993_v4 = vrot.slane %v4492_v60, 7 }
 0x2c1   : > { %3596 = vrot.lane.b32.xlu0 %v3595_v63, %s5038_s2  ;;  %v1014_v0 = vsel %vm1013_vm4, %v1011_v61, %v1012_v62  ;;  %v1015_v1 = vsel %vm1013_vm4, %v1012_v62, %v1011_v61  ;;  %v996_v7 = vsel %vm994_vm7, %v993_v4, %v992_v6  ;;  %v995_v11 = vsel %vm994_vm7, %v992_v6, %v993_v4 }
 0x2c2   : > { %v1029_v2 = vsel %vm1021_vm5, %v1015_v1, 0.0  ;;  %v1009_v12 = vsel %vm999_vm8, %v996_v7, 0.0  ;;  %v4126_v6 = vmov -10000.0  }
 0x2c3   : > { %v1066_v3 = vpack.c.bf16 %v1029_v2, %v1014_v0  ;;  %v834_v7 = vsel %vm833_vm10, 0.0, %v4126_v6 }
 0x2c5   : > { %3097 = vmatprep.mubr.msk.bf16.mxu1 %vm1038_vm6, %v1066_v3 }
 0x333   : > { %v3597_v8 = vpop.permute.xlu0 %3596 }
 0x334   : > { %v3599_v9 = vunpack.i.h.bf16 %v3597_v8  ;;  %v3598_v10 = vunpack.i.l.bf16 %v3597_v8 }
 0x336   : > { %v1039_v13 = vsel %vm1038_vm6, %v1009_v12, %v3598_v10  ;;  %v1040_v14 = vsel %vm1038_vm6, %v995_v11, %v3599_v9 }
 0x337   : > { %v1065_v16 = vpack.c.bf16 %v1040_v14, %v1039_v13 }
 0x339   : > { %1182 = vmatmul.mubr.bf16.vlgmr.msra.gmra.mxu1 %v1065_v16 }
 0x3f9   : > { %v1183_v26 = vpop.f32.mrf.mxu1 }
 0x3fa   : > { %v1184_v27 = vadd.f32 %v3084_v25, %v1183_v26 }
 0x3fb   : > { %v1185_v28 = vpop.f32.mrf.mxu1 }
 0x3fc   : > { %v1190_v29 = vmul.f32 %v1184_v27, %v1184_v27 }
 0x3fd   : > { %v1186_v30 = vpop.f32.mrf.mxu1 }
 0x3fe   : > { %v1192_v31 = vmul.f32 %v1190_v29, %v1184_v27  ;;  %v1187_v32 = vadd.f32 %v3084_v25, %v1186_v30  ;;  %v835_v25 = vld [vmem:[%s5028_s22] sm:$0xff]  ;;  %v836_v30 = vld [vmem:[%s5028_s22 + $0x8] sm:$0xff] }
 0x3ff   : > { %v1188_v33 = vpop.f32.mrf.mxu1 }
 0x400   : > { %v1194_v34 = vmul.f32 0.044715, %v1192_v31  ;;  %v1191_v36 = vmul.f32 %v1187_v32, %v1187_v32  ;;  %v838_v33 = vld [vmem:[%s5028_s22 + $0x18] sm:$0xff] }
 0x402   : > { %v1196_v37 = vadd.f32 %v1194_v34, %v1184_v27  ;;  %v1193_v38 = vmul.f32 %v1191_v36, %v1187_v32 }
 0x404   : > { %v1198_v39 = vmul.f32 0.7978846, %v1196_v37  ;;  %v1195_v40 = vmul.f32 0.044715, %v1193_v38 }
 0x406   : > { %3704 = vtanh.f32 %v1198_v39  ;;  %v1197_v41 = vadd.f32 %v1195_v40, %v1187_v32  ;;  %v839_v39 = vld [vmem:[%s5028_s22 + $0x20] sm:$0xff] }
 0x408   : > { %v1199_v42 = vmul.f32 0.7978846, %v1197_v41 }
 0x40a   : > { %3706 = vtanh.f32 %v1199_v42  ;;  %v841_v42 = vld [vmem:[%s5028_s22 + $0x30] sm:$0xff] }
 0x413   : > { %v3705_v43 = vpop.eup %3704 }
 0x414   : > { %v1202_v44 = vadd.f32 1.0, %v3705_v43 }
 0x416   : > { %v1204_v45 = vmul.f32 0.5, %v1202_v44 }
 0x417   : > { %v3707_v47 = vpop.eup %3706 }
 0x418   : > { %v1203_v49 = vadd.f32 1.0, %v3707_v47  ;;  %v1206_v51 = vmul.f32 %v1204_v45, %v1184_v27 }
 0x41a   : > { %v1205_v52 = vmul.f32 0.5, %v1203_v49  ;;  %v4532_v54 = vadd.f32 %v1206_v51, %v4490_v57  ;;  %v1224_v57 = vrot.slane %v4546_v59, %v4541_v58  ;;  %v840_v51 = vld [vmem:[%s5028_s22 + $0x28] sm:$0xff] }
 0x41c   : > { %v1207_v53 = vmul.f32 %v1205_v52, %v1187_v32 }
 0x41e   : > { %v4535_v55 = vadd.f32 %v1207_v53, %v4492_v60 }
 0x420   : > { %v1218_v56 = vpack.c.bf16 %v4535_v55, %v4532_v54 }
 0x422   : > { %3106 = vmatmul.mubr.msk.bf16.vlgmr.msra.gmra.mxu0 %vm1038_vm6, %v1218_v56  ;;  %v842_v56 = vld [vmem:[%s5028_s22 + $0x38] sm:$0xff] }
 0x4e2   : > { %v1308_v61 = vpop.f32.mrf.mxu0 }
 0x4e3   : > { %v1309_v63 = vadd.f32 %v1308_v61, %v1224_v57 }
 0x4e4   : > { %v4550_v62 = vpop.f32.mrf.mxu0 }
 0x4e6   : > { %v1312_v60 = vpop.f32.mrf.mxu0 }
 0x4e7   : > { %v1313_v0 = vadd.f32 %v1312_v60, %v1224_v57 }
 0x4e8   : > { %v1314_v24 = vpop.f32.mrf.mxu0 }
 0x4e9   : > { %v1317_v1 = vpack.c.bf16 %v1313_v0, %v1309_v63 }
 0x4eb   : > { %1324 = vrot.lane.b32.xlu1 %v1317_v1, %s5045_s3  ;;  %3320 = vmatprep.mubr.msk.bf16.mxu0 %vm853_vm9, %v1317_v1 }
 0x4ef   : > { %1322 = vrot.lane.b32.xlu1 %v1317_v1, %s4124_s26 }
 0x4f3   : > { %1320 = vrot.lane.b32.xlu1 %v1317_v1, %s5043_s0 }
 0x55d   : > { %v1325_v2 = vpop.permute.xlu1 %1324 }
 0x55e   : > { %1342 = vrot.lane.b32.xlu0 %v1325_v2, %s5038_s2 }
 0x561   : > { %v1323_v3 = vpop.permute.xlu1 %1322 }
 0x562   : > { %1340 = vrot.lane.b32.xlu1 %v1323_v3, %s5038_s2 }
 0x565   : > { %v1321_v4 = vpop.permute.xlu1 %1320 }
 0x566   : > { %1336 = vrot.lane.b32.xlu1 %v1317_v1, %s5038_s2  ;;  %1338 = vrot.lane.b32.xlu0 %v1321_v4, %s5038_s2 }
 0x56a   : > { %844 = vrot.lane.b32.xlu0 %v834_v7, %s5042_s28  ;;  %847 = vrot.lane.b32.xlu1 %v834_v7, %s5040_s30 }
 0x56e   : > { %850 = vrot.lane.b32.xlu0 %v834_v7, %s5041_s24 }
 0x5d0   : > { %v1343_v8 = vpop.permute.xlu0 %1342 }
 0x5d1   : > { %v1366_v9 = vsel %vm853_vm9, %v1343_v8, 0  ;;  %3464 = vmatprep.subr.msk.bf16.mxu0 %vm853_vm9, %v1343_v8  ;;  %v1227_v8 = vsub.s32 1, %v4482_v48 }
 0x5d2   : > { %3313 = vmatpush3.bf16.xpose.msra.mxu0 %v1366_v9 }
 0x5d3   : > { %v1228_v9 = vrot.slane %v4546_v59, %v1227_v8 }
 0x5d4   : > { %v1341_v46 = vpop.permute.xlu1 %1340 }
 0x5d5   : > { %3465 = vmatprep.subr.msk.bf16.mxu0 %vm853_vm9, %v1341_v46  ;;  %v1363_v50 = vsel %vm853_vm9, %v1341_v46, 0  ;;  %v1315_v46 = vadd.f32 %v1314_v24, %v1228_v9 }
 0x5d8   : > { %v1339_v10 = vpop.permute.xlu0 %1338  ;;  %v1337_v12 = vpop.permute.xlu1 %1336 }
 0x5d9   : > { %v1360_v11 = vsel %vm853_vm9, %v1339_v10, 0  ;;  %v1357_v13 = vsel %vm853_vm9, %v1337_v12, 0 }
 0x5da   : > { %3315 = vmatpush3.bf16.xpose.msra.mxu0 %v1363_v50  ;;  %v1311_v50 = vadd.f32 %v4550_v62, %v1228_v9 }
 0x5db   : > { %3466 = vmatprep.subr.msk.bf16.mxu0 %vm853_vm9, %v1339_v10 }
 0x5dc   : > { %v845_v14 = vpop.permute.xlu0 %844  ;;  %v848_v17 = vpop.permute.xlu1 %847  ;;  %v4644_v10 = vpack.c.bf16 %v1315_v46, %v1311_v50 }
 0x5dd   : > { %v854_v16 = vsel %vm853_vm9, %v834_v7, %v845_v14 }
 0x5de   : > { %v856_v18 = vsel %vm855_vm0, %v854_v16, %v848_v17 }
 0x5e0   : > { %v851_v19 = vpop.permute.xlu0 %850 }
 0x5e1   : > { %v858_v20 = vsel %vm857_vm11, %v856_v18, %v851_v19 }
 0x5e2   : > { %3317 = vmatpush3.bf16.xpose.msra.mxu0 %v1360_v11  ;;  %v862_v21 = vrot.slane %v858_v20, %v4541_v58 }
 0x5e3   : > { %3467 = vmatprep.subr.msk.bf16.mxu0 %vm853_vm9, %v1337_v12 }
 0x5e4   : > { %v4586_v23 = vadd.f32 %v862_v21, %v837_v22  ;;  %v4592_v28 = vadd.f32 %v862_v21, %v835_v25  ;;  %v4602_v36 = vadd.f32 %v862_v21, %v836_v30  ;;  %v4608_v40 = vadd.f32 %v862_v21, %v838_v33 }
 0x5e5   : > { %v4615_v45 = vadd.f32 %v862_v21, %v839_v39  ;;  %v4621_v52 = vadd.f32 %v862_v21, %v841_v42  ;;  %v4628_v60 = vadd.f32 %v862_v21, %v840_v51 }
 0x5ea   : > { %3319 = vmatpush3.bf16.xpose.msra.mxu0 %v1357_v13 }
 0x5eb   : > { %3344 = vmatprep.subr.bf16.mxu0 %v4119_v15 }
 0x5f1   : > { %3321 = vmatmul.mubr.msk.bf16.vlgmr.msra.gmra.mxu0 %vm853_vm9, %v1321_v4 }
 0x5f2   : > { %3324 = vmatprep.mubr.msk.bf16.mxu0 %vm853_vm9, %v1323_v3 }
 0x5f9   : > { %3325 = vmatmul.mubr.msk.bf16.gmra.mxu0 %vm853_vm9, %v1325_v2  ;;  %v4632_v2 = vadd.f32 %v862_v21, %v842_v56 }
 0x5fa   : > { %3352 = vmatprep.mubr.msk.bf16.mxu0 %vm4120_vm1, %v4119_v15 }
 0x6b1   : > { %v3322_v26 = vpop.f32.mrf.mxu0 }
 0x6b2   : > { %v1411_v27 = vadd.f32 %v3322_v26, %v4586_v23 }
 0x6b3   : > { %v1402_v29 = vpop.f32.mrf.mxu0 }
 0x6b4   : > { %v1403_v31 = vadd.f32 %v1402_v29, %v4592_v28  ;;  %v1439_v32 = vsel %vm1038_vm6, %v1411_v27, -inf }
 0x6b5   : > { %1440 = vmax.xlane.f32.xlu0 %v1439_v32  ;;  %v3323_v34 = vpop.f32.mrf.mxu0 }
 0x6b6   : > { %v1433_v37 = vsel %vm1038_vm6, %v1403_v31, -inf  ;;  %v1414_v44 = vadd.f32 %v3323_v34, %v4608_v40 }
 0x6b7   : > { %v1405_v38 = vpop.f32.mrf.mxu0  ;;  %1434 = vmax.xlane.f32.xlu1 %v1433_v37 }
 0x6b8   : > { %v1406_v41 = vadd.f32 %v1405_v38, %v4602_v36  ;;  %v1442_v63 = vsel %vm1038_vm6, %v1414_v44, -inf }
 0x6b9   : > { %v3326_v43 = vpop.f32.mrf.mxu0 }
 0x6ba   : > { %v1436_v47 = vsel %vm1038_vm6, %v1406_v41, -inf  ;;  %v1427_v57 = vadd.f32 %v3326_v43, %v4621_v52 }
 0x6bb   : > { %v1418_v49 = vpop.f32.mrf.mxu0  ;;  %1437 = vmax.xlane.f32.xlu0 %v1436_v47 }
 0x6bc   : > { %v1419_v53 = vadd.f32 %v1418_v49, %v4615_v45  ;;  %v1451_v6 = vsel %vm1038_vm6, %v1427_v57, -inf }
 0x6bd   : > { %v3327_v61 = vpop.f32.mrf.mxu0 }
 0x6be   : > { %v1445_v0 = vsel %vm1038_vm6, %v1419_v53, -inf  ;;  %v1430_v4 = vadd.f32 %v3327_v61, %v4632_v2 }
 0x6bf   : > { %v1421_v1 = vpop.f32.mrf.mxu0  ;;  %1443 = vmax.xlane.f32.xlu0 %v1442_v63  ;;  %1446 = vmax.xlane.f32.xlu1 %v1445_v0 }
 0x6c0   : > { %v1422_v3 = vadd.f32 %v1421_v1, %v4628_v60  ;;  %v1454_v7 = vsel %vm1038_vm6, %v1430_v4, -inf }
 0x6c2   : > { %v1448_v5 = vsel %vm1038_vm6, %v1422_v3, -inf }
 0x6c3   : > { %1449 = vmax.xlane.f32.xlu0 %v1448_v5  ;;  %1452 = vmax.xlane.f32.xlu1 %v1451_v6 }
 0x6c7   : > { %1455 = vmax.xlane.f32.xlu0 %v1454_v7 }
 0x6d4   : > { %1333 = vrot.lane.b32.xlu1 %v4644_v10, %s5045_s3 }
 0x73e   : > { %v1441_v11 = vpop.xlane.xlu0 %1440 }
 0x73f   : > { %v1459_v12 = vsub.f32 %v1411_v27, %v1441_v11 }
 0x740   : > { %v1435_v13 = vpop.xlane.xlu1 %1434 }
 0x741   : > { %v1469_v14 = vmul.f32 1.442695, %v1459_v12  ;;  %v1457_v16 = vsub.f32 %v1403_v31, %v1435_v13 }
 0x743   : > { %3708 = vpow2.f32 %v1469_v14  ;;  %v1465_v17 = vmul.f32 1.442695, %v1457_v16 }
 0x744   : > { %v1438_v18 = vpop.xlane.xlu0 %1437 }
 0x745   : > { %3710 = vpow2.f32 %v1465_v17  ;;  %v1458_v19 = vsub.f32 %v1406_v41, %v1438_v18 }
 0x747   : > { %v1467_v22 = vmul.f32 1.442695, %v1458_v19 }
 0x748   : > { %v1444_v20 = vpop.xlane.xlu0 %1443  ;;  %v1447_v59 = vpop.xlane.xlu1 %1446 }
 0x749   : > { %v1460_v21 = vsub.f32 %v1414_v44, %v1444_v20  ;;  %v1461_v24 = vsub.f32 %v1419_v53, %v1447_v59 }
 0x74b   : > { %v1471_v62 = vmul.f32 1.442695, %v1460_v21  ;;  %v1473_v31 = vmul.f32 1.442695, %v1461_v24 }
 0x74c   : > { %v1450_v25 = vpop.xlane.xlu0 %1449  ;;  %v1453_v26 = vpop.xlane.xlu1 %1452 }
 0x74d   : > { %3712 = vpow2.f32 %v1471_v62  ;;  %v1463_v29 = vsub.f32 %v1427_v57, %v1453_v26  ;;  %v1462_v27 = vsub.f32 %v1422_v3, %v1450_v25 }
 0x74e   : > { %3714 = vpow2.f32 %v1467_v22 }
 0x74f   : > { %v1477_v30 = vmul.f32 1.442695, %v1463_v29  ;;  %v1475_v41 = vmul.f32 1.442695, %v1462_v27 }
 0x750   : > { %v4648_v32 = vpop.eup %3708  ;;  %v1456_v33 = vpop.xlane.xlu0 %1455 }
 0x751   : > { %v1334_v34 = vpop.permute.xlu1 %1333  ;;  %v1464_v37 = vsub.f32 %v1430_v4, %v1456_v33  ;;  %v1487_v38 = vsel %vm1038_vm6, %v4648_v32, 0.0  ;;  %3716 = vpow2.f32 %v1477_v30 }
 0x752   : > { %3328 = vmatprep.subr.bf16.mxu1 %v1334_v34  ;;  %v3711_v39 = vpop.eup %3710  ;;  %1488 = vadd.xlane.f32.xlu1 %v1487_v38  ;;  %3718 = vpow2.f32 %v1473_v31 }
 0x753   : > { %3329 = vmatpush3.bf16.msra.mxu1 %v1334_v34  ;;  %v1479_v42 = vmul.f32 1.442695, %v1464_v37  ;;  %v1481_v43 = vsel %vm1038_vm6, %v3711_v39, 0.0 }
 0x755   : > { %3720 = vpow2.f32 %v1479_v42 }
 0x756   : > { %1482 = vadd.xlane.f32.xlu1 %v1481_v43  ;;  %3722 = vpow2.f32 %v1475_v41  ;;  %v3658_v41 = vld [vmem:[%s5016_s10 + $0x8] sm:$0xff]  }
 0x75a   : > { %v3713_v44 = vpop.eup %3712 }
 0x75b   : > { %v1490_v47 = vsel %vm1038_vm6, %v3713_v44, 0.0  ;;  %v3715_v49 = vpop.eup %3714 }
 0x75c   : > { %1491 = vadd.xlane.f32.xlu0 %v1490_v47  ;;  %v1484_v53 = vsel %vm1038_vm6, %v3715_v49, 0.0  ;;  %v3659_v47 = vld [vmem:[%s5016_s10] sm:$0xff]  }
 0x75e   : > { %v3717_v51 = vpop.eup %3716 }
 0x75f   : > { %v1499_v56 = vsel %vm1038_vm6, %v3717_v51, 0.0  ;;  %v3719_v61 = vpop.eup %3718 }
 0x760   : > { %1485 = vadd.xlane.f32.xlu0 %v1484_v53  ;;  %1500 = vadd.xlane.f32.xlu1 %v1499_v56  ;;  %v1493_v1 = vsel %vm1038_vm6, %v3719_v61, 0.0 }
 0x762   : > { %v3721_v57 = vpop.eup %3720 }
 0x763   : > { %v1502_v63 = vsel %vm1038_vm6, %v3721_v57, 0.0  ;;  %v3723_v0 = vpop.eup %3722 }
 0x764   : > { %1503 = vadd.xlane.f32.xlu0 %v1502_v63  ;;  %1494 = vadd.xlane.f32.xlu1 %v1493_v1  ;;  %v1496_v3 = vsel %vm1038_vm6, %v3723_v0, 0.0 }
 0x768   : > { %1497 = vadd.xlane.f32.xlu0 %v1496_v3 }
 0x775   : > { %1327 = vrot.lane.b32.xlu1 %v4644_v10, %s5043_s0 }
 0x77e   : > { %1330 = vrot.lane.b32.xlu0 %v4644_v10, %s4124_s26 }
 0x7db   : > { %v1489_v4 = vpop.xlane.xlu1 %1488 }
 0x7df   : > { %v1483_v5 = vpop.xlane.xlu1 %1482 }
 0x7e0   : > { %3724 = vrcp.f32 %v1483_v5 }
 0x7e5   : > { %v1492_v6 = vpop.xlane.xlu0 %1491 }
 0x7e9   : > { %v1486_v7 = vpop.xlane.xlu0 %1485  ;;  %v1501_v9 = vpop.xlane.xlu1 %1500 }
 0x7ea   : > { %3726 = vrcp.f32 %v1486_v7 }
 0x7eb   : > { %3728 = vrcp.f32 %v1492_v6 }
 0x7ec   : > { %3730 = vrcp.f32 %v1489_v4 }
 0x7ed   : > { %v1504_v46 = vpop.xlane.xlu0 %1503  ;;  %v1495_v50 = vpop.xlane.xlu1 %1494 }
 0x7ee   : > { %3732 = vrcp.f32 %v1495_v50  ;;  %v3725_v12 = vpop.eup %3724 }
 0x7ef   : > { %v1513_v17 = vmul.f32 %v3725_v12, %v3711_v39 }
 0x7f1   : > { %v1498_v11 = vpop.xlane.xlu0 %1497  ;;  %v1328_v16 = vpop.permute.xlu1 %1327 }
 0x7f2   : > { %3734 = vrcp.f32 %v1498_v11 }
 0x7f3   : > { %3736 = vrcp.f32 %v1504_v46 }
 0x7f4   : > { %3738 = vrcp.f32 %v1501_v9 }
 0x7f5   : > { %v1331_v13 = vpop.permute.xlu0 %1330 }
 0x7f6   : > { %3330 = vmatprep.subr.bf16.mxu1 %v1331_v13 }
 0x7f7   : > { %v3727_v14 = vpop.eup %3726  ;;  %3331 = vmatpush3.bf16.msra.mxu1 %v1331_v13 }
 0x7f8   : > { %3332 = vmatprep.subr.bf16.mxu1 %v1328_v16  ;;  %v1514_v18 = vmul.f32 %v3727_v14, %v3715_v49  ;;  %v3729_v19 = vpop.eup %3728 }
 0x7f9   : > { %v3731_v59 = vpop.eup %3730  ;;  %v1516_v21 = vmul.f32 %v3729_v19, %v3713_v44 }
 0x7fa   : > { %v1521_v20 = vpack.c.bf16 %v1514_v18, %v1513_v17  ;;  %v1515_v62 = vmul.f32 %v3731_v59, %v4648_v32  ;;  %v3657_v32 = vld [vmem:[%s5016_s10 + $0x10] sm:$0xff]   ;;  %v3115_v17 = vld [vmem:[%s5017_s11] ss:$0 sm:$0xff] }
 0x7fb   : > { %3333 = vmatpush3.bf16.msra.mxu1 %v1328_v16  ;;  %v3733_v22 = vpop.eup %3732 }
 0x7fc   : > { %3334 = vmatprep.subr.bf16.mxu1 %v4644_v10  ;;  %3336 = vmatprep.mubr.msk.bf16.mxu1 %vm1038_vm6, %v1521_v20  ;;  %v1522_v25 = vpack.c.bf16 %v1516_v21, %v1515_v62  ;;  %v1517_v26 = vmul.f32 %v3733_v22, %v3719_v61 }
 0x7ff   : > { %v3735_v24 = vpop.eup %3734  ;;  %3335 = vmatpush3.bf16.msra.mxu1 %v4644_v10  ;;  %v3656_v10 = vld [vmem:[%s5016_s10 + $0x18] sm:$0xff]  }
 0x800   : > { %v1518_v29 = vmul.f32 %v3735_v24, %v3723_v0  ;;  %3356 = vmatprep.subr.bf16.mxu1 %v4119_v15  ;;  %v3737_v27 = vpop.eup %3736  ;;  %3345 = vmatpush3.bf16.msra.mxu0 %v3656_v10 }
 0x801   : > { %v3739_v31 = vpop.eup %3738  ;;  %v1520_v33 = vmul.f32 %v3737_v27, %v3721_v57  ;;  %3346 = vmatprep.subr.bf16.mxu0 %v4119_v15 }
 0x802   : > { %3337 = vmatmul.mubr.msk.bf16.vlgmr.msra.gmra.mxu1 %vm1038_vm6, %v1522_v25  ;;  %v1523_v30 = vpack.c.bf16 %v1518_v29, %v1517_v26  ;;  %v1519_v34 = vmul.f32 %v3739_v31, %v3717_v51 }
 0x804   : > { %3340 = vmatprep.mubr.msk.bf16.mxu1 %vm1038_vm6, %v1523_v30  ;;  %v1524_v37 = vpack.c.bf16 %v1520_v33, %v1519_v34  ;;  %3347 = vmatpush3.bf16.msra.mxu0 %v3657_v32 }
 0x805   : > { %3348 = vmatprep.subr.bf16.mxu0 %v4119_v15 }
 0x808   : > { %3349 = vmatpush3.bf16.msra.mxu0 %v3658_v41  ;;  %v3663_v41 = vld [vmem:[%s5020_s14] sm:$0xff]  }
 0x809   : > { %3350 = vmatprep.subr.bf16.mxu0 %v4119_v15 }
 0x80a   : > { %3341 = vmatmul.mubr.msk.bf16.gmra.mxu1 %vm1038_vm6, %v1524_v37 }
 0x80b   : > { %3364 = vmatprep.mubr.msk.bf16.mxu1 %vm4120_vm1, %v4119_v15 }
 0x80c   : > { %3351 = vmatpush3.bf16.msra.mxu0 %v3659_v47 }
 0x80d   : > { %3368 = vmatprep.subr.bf16.mxu0 %v4119_v15 }
 0x8c2   : > { %v3338_v38 = vpop.f32.mrf.mxu1 }
 0x8c4   : > { %v1571_v39 = vpop.f32.mrf.mxu1 }
 0x8c6   : > { %v3339_v42 = vpop.f32.mrf.mxu1 }
 0x8c7   : > { %v3600_v43 = vpack.i.bf16 %v3339_v42, %v3338_v38  ;;  %v3661_v38 = vld [vmem:[%s5020_s14 + $0x10] sm:$0xff]  }
 0x8c8   : > { %v1574_v44 = vpop.f32.mrf.mxu1 }
 0x8c9   : > { %3601 = vrot.lane.b32.xlu1 %v3600_v43, %s5042_s28 }
 0x8ca   : > { %v3342_v49 = vpop.f32.mrf.mxu1 }
 0x8cc   : > { %v1587_v51 = vpop.f32.mrf.mxu1 }
 0x8ce   : > { %v3343_v53 = vpop.f32.mrf.mxu1 }
 0x8cf   : > { %v3610_v56 = vpack.i.bf16 %v3343_v53, %v3342_v49 }
 0x8d0   : > { %v1590_v61 = vpop.f32.mrf.mxu1 }
 0x8d1   : > { %v3605_v57 = vpack.i.bf16 %v1590_v61, %v1587_v51  ;;  %3611 = vrot.lane.b32.xlu0 %v3610_v56, %s5041_s24  ;;  %v3121_v61 = vld [vmem:[#allocation11] ss:$0 sm:$0xff] }
 0x8d3   : > { %3606 = vrot.lane.b32.xlu1 %v3605_v57, %s5040_s30  ;;  %s3077_s30 = sshll.u32 %s4410_s6, 3 }
 0x8d4   : > { %s822_s28 = scalar_lea.vmem %s5029_s23, %s3077_s30 }
 0x93b   : > { %v3602_v63 = vpop.permute.xlu1 %3601 }
 0x93c   : > { %v3604_v0 = vunpack.i.h.bf16 %v3602_v63  ;;  %v3603_v1 = vunpack.i.l.bf16 %v3602_v63 }
 0x93e   : > { %v1626_v7 = vsel %vm853_vm9, %v1571_v39, %v3603_v1  ;;  %v1627_v9 = vsel %vm853_vm9, %v1574_v44, %v3604_v0  ;;  %v3662_v39 = vld [vmem:[%s5020_s14 + $0x8] sm:$0xff]  }
 0x93f   : > { %v3122_v1 = vld [vmem:[#allocation12] ss:$0 sm:$0xff] }
 0x943   : > { %v3612_v3 = vpop.permute.xlu0 %3611 }
 0x944   : > { %v3614_v46 = vunpack.i.h.bf16 %v3612_v3  ;;  %v3613_v50 = vunpack.i.l.bf16 %v3612_v3 }
 0x945   : > { %v3607_v4 = vpop.permute.xlu1 %3606 }
 0x946   : > { %v3609_v5 = vunpack.i.h.bf16 %v3607_v4  ;;  %v3608_v6 = vunpack.i.l.bf16 %v3607_v4 }
 0x948   : > { %v1629_v11 = vsel %vm855_vm0, %v1627_v9, %v3609_v5  ;;  %v1628_v12 = vsel %vm855_vm0, %v1626_v7, %v3608_v6  ;;  %v3664_v7 = vld [vmem:[%s5081_s7 + $0x38] sm:$0xff]   ;;  %v3665_v9 = vld [vmem:[%s5081_s7 + $0x30] sm:$0xff]  }
 0x949   : > { %v1631_v13 = vsel %vm857_vm11, %v1629_v11, %v3614_v46  ;;  %v1630_v14 = vsel %vm857_vm11, %v1628_v12, %v3613_v50  ;;  %v3666_v46 = vld [vmem:[%s5081_s7 + $0x28] sm:$0xff]   ;;  %v3668_v50 = vld [vmem:[%s5081_s7 + $0x18] sm:$0xff]   ;;  %v3669_v11 = vld [vmem:[%s5081_s7 + $0x10] sm:$0xff]  }
 0x94a   : > { %v1640_v16 = vpack.c.bf16 %v1631_v13, %v1630_v14  ;;  %v3670_v12 = vld [vmem:[%s5081_s7 + $0x8] sm:$0xff]   ;;  %v3671_v13 = vld [vmem:[%s5081_s7] sm:$0xff]  }
 0x94b   : > { %v3123_v14 = vld [vmem:[#allocation14] ss:$0 sm:$0xff] }
 0x94c   : > { %3353 = vmatmul.mubr.msk.bf16.vlgmr.msra.gmra.mxu0 %vm1038_vm6, %v1640_v16 }
 0x94d   : > { %3384 = vmatprep.mubr.msk.bf16.mxu0 %vm4120_vm1, %v4119_v15  ;;  %3369 = vmatpush3.bf16.msra.mxu0 %v3664_v7 }
 0x94e   : > { %3370 = vmatprep.subr.bf16.mxu0 %v4119_v15 }
 0x951   : > { %3371 = vmatpush3.bf16.msra.mxu0 %v3665_v9 }
 0x952   : > { %3372 = vmatprep.subr.bf16.mxu0 %v4119_v15 }
 0x955   : > { %3373 = vmatpush3.bf16.msra.mxu0 %v3666_v46 }
 0x956   : > { %3374 = vmatprep.subr.bf16.mxu0 %v4119_v15 }
 0xa0c   : > { %v1709_v18 = vpop.f32.mrf.mxu0 }
 0xa0d   : > { %v1710_v19 = vadd.f32 %v3115_v17, %v1709_v18 }
 0xa0e   : > { %v3354_v20 = vpop.f32.mrf.mxu0 }
 0xa0f   : > { %v1716_v59 = vadd.f32 %v1710_v19, %v4532_v54 }
 0xa10   : > { %v1712_v21 = vpop.f32.mrf.mxu0 }
 0xa11   : > { %v1713_v22 = vadd.f32 %v3115_v17, %v1712_v21  ;;  %v1720_v62 = vsel %vm1038_vm6, %v1716_v59, 0.0 }
 0xa12   : > { %1721 = vadd.xlane.f32.xlu1 %v1720_v62  ;;  %v3355_v24 = vpop.f32.mrf.mxu0 }
 0xa13   : > { %v1717_v25 = vadd.f32 %v1713_v22, %v4535_v55  ;;  %v3660_v55 = vld [vmem:[%s5020_s14 + $0x18] sm:$0xff]  }
 0xa14   : > { %3357 = vmatpush3.bf16.msra.mxu1 %v3660_v55 }
 0xa15   : > { %v1723_v26 = vsel %vm1038_vm6, %v1717_v25, 0.0  ;;  %3358 = vmatprep.subr.bf16.mxu1 %v4119_v15 }
 0xa16   : > { %1724 = vadd.xlane.f32.xlu0 %v1723_v26 }
 0xa18   : > { %3359 = vmatpush3.bf16.msra.mxu1 %v3661_v38 }
 0xa19   : > { %3360 = vmatprep.subr.bf16.mxu1 %v4119_v15 }
 0xa1c   : > { %3361 = vmatpush3.bf16.msra.mxu1 %v3662_v39 }
 0xa1d   : > { %3362 = vmatprep.subr.bf16.mxu1 %v4119_v15 }
 0xa20   : > { %3363 = vmatpush3.bf16.msra.mxu1 %v3663_v41  ;;  %v3129_v41 = vld [vmem:[#allocation15] ss:$0 sm:$0xff] }
 0xa9b   : > { %v1722_v29 = vpop.xlane.xlu1 %1721 }
 0xa9c   : > { %v1727_v27 = vmul.f32 0.015625, %v1722_v29 }
 0xa9e   : > { %v1729_v30 = vsub.f32 %v1716_v59, %v1727_v27 }
 0xa9f   : > { %v1725_v31 = vpop.xlane.xlu0 %1724 }
 0xaa0   : > { %v1728_v33 = vmul.f32 0.015625, %v1725_v31  ;;  %v1731_v34 = vmul.f32 %v1729_v30, %v1729_v30 }
 0xaa2   : > { %v1730_v37 = vsub.f32 %v1717_v25, %v1728_v33  ;;  %v1733_v54 = vsel %vm1038_vm6, %v1731_v34, 0.0 }
 0xaa3   : > { %1734 = vadd.xlane.f32.xlu0 %v1733_v54 }
 0xaa4   : > { %v1732_v10 = vmul.f32 %v1730_v37, %v1730_v37 }
 0xaa6   : > { %v1736_v32 = vsel %vm1038_vm6, %v1732_v10, 0.0 }
 0xaa7   : > { %1737 = vadd.xlane.f32.xlu0 %v1736_v32 }
 0xb2c   : > { %v1735_v42 = vpop.xlane.xlu0 %1734 }
 0xb2d   : > { %v1739_v43 = vmul.f32 0.015625, %v1735_v42 }
 0xb2f   : > { %v1741_v44 = vadd.f32 1e-05, %v1739_v43 }
 0xb30   : > { %v1738_v47 = vpop.xlane.xlu0 %1737 }
 0xb31   : > { %3740 = vrsqrt.f32 %v1741_v44  ;;  %v1740_v49 = vmul.f32 0.015625, %v1738_v47 }
 0xb33   : > { %v1742_v51 = vadd.f32 1e-05, %v1740_v49 }
 0xb35   : > { %3742 = vrsqrt.f32 %v1742_v51 }
 0xb3e   : > { %v3741_v53 = vpop.eup %3740 }
 0xb3f   : > { %v1745_v56 = vmul.f32 %v3741_v53, %v1729_v30 }
 0xb41   : > { %v1753_v63 = vmul.f32 %v3121_v61, %v1745_v56 }
 0xb42   : > { %v3743_v57 = vpop.eup %3742 }
 0xb43   : > { %v1746_v0 = vmul.f32 %v3743_v57, %v1730_v37  ;;  %v1761_v4 = vadd.f32 %v3122_v1, %v1753_v63 }
 0xb45   : > { %v1754_v3 = vmul.f32 %v3121_v61, %v1746_v0 }
 0xb47   : > { %v4725_v5 = vadd.f32 %v3122_v1, %v1754_v3 }
 0xb49   : > { %v1771_v6 = vpack.c.bf16 %v4725_v5, %v1761_v4 }
 0xb4b   : > { %3365 = vmatmul.mubr.msk.bf16.vlgmr.msra.gmra.mxu1 %vm1038_vm6, %v1771_v6 }
 0xb4c   : > { %2122 = vmatprep.mubr.bf16.mxu1 %v4121_v35  ;;  %v3667_v35 = vld [vmem:[%s5081_s7 + $0x20] sm:$0xff]  }
 0xb4d   : > { %3375 = vmatpush3.bf16.msra.mxu0 %v3667_v35 }
 0xb4e   : > { %3376 = vmatprep.subr.bf16.mxu0 %v4119_v15 }
 0xb51   : > { %3377 = vmatpush3.bf16.msra.mxu0 %v3668_v50  ;;  %v3672_v50 = vld [vmem:[%s5014_s8 + $0x70] ss:$8 sps:$4 sm:$0xff]  }
 0xb52   : > { %3378 = vmatprep.subr.bf16.mxu0 %v4119_v15 }
 0xb55   : > { %3379 = vmatpush3.bf16.msra.mxu0 %v3669_v11  ;;  %v3677_v11 = vld [vmem:[%s5014_s8 + $0x64] ss:$8 sps:$4 sm:$0xff]  }
 0xb56   : > { %3380 = vmatprep.subr.bf16.mxu0 %v4119_v15 }
 0xb59   : > { %3381 = vmatpush3.bf16.msra.mxu0 %v3670_v12  ;;  %v3675_v12 = vld [vmem:[%s5014_s8 + $0x60] ss:$8 sps:$4 sm:$0xff]  }
 0xb5a   : > { %3382 = vmatprep.subr.bf16.mxu0 %v4119_v15 }
 0xb5d   : > { %3383 = vmatpush3.bf16.msra.mxu0 %v3671_v13  ;;  %v3680_v13 = vld [vmem:[%s5014_s8 + $0x54] ss:$8 sps:$4 sm:$0xff]  }
 0xc0b   : > { %v1840_v16 = vpop.f32.mrf.mxu1 }
 0xc0c   : > { %v1841_v17 = vadd.f32 %v3123_v14, %v1840_v16  ;;  %v3683_v16 = vld [vmem:[%s5014_s8 + $0x44] ss:$8 sps:$4 sm:$0xff]  }
 0xc0d   : > { %v3366_v18 = vpop.f32.mrf.mxu1 }
 0xc0e   : > { %v1847_v19 = vmul.f32 %v1841_v17, %v1841_v17 }
 0xc0f   : > { %v1843_v20 = vpop.f32.mrf.mxu1 }
 0xc10   : > { %v1849_v59 = vmul.f32 %v1847_v19, %v1841_v17  ;;  %v1844_v21 = vadd.f32 %v3123_v14, %v1843_v20  ;;  %v3678_v14 = vld [vmem:[%s5014_s8 + $0x50] ss:$8 sps:$4 sm:$0xff]  }
 0xc11   : > { %v3367_v22 = vpop.f32.mrf.mxu1 }
 0xc12   : > { %v1851_v62 = vmul.f32 0.044715, %v1849_v59  ;;  %v1848_v24 = vmul.f32 %v1844_v21, %v1844_v21 }
 0xc14   : > { %v1853_v25 = vadd.f32 %v1851_v62, %v1841_v17  ;;  %v1850_v26 = vmul.f32 %v1848_v24, %v1844_v21 }
 0xc16   : > { %v1855_v29 = vmul.f32 0.7978846, %v1853_v25  ;;  %v1852_v27 = vmul.f32 0.044715, %v1850_v26  ;;  %v3138_v25 = vld [vmem:[%s5024_s18] ss:$0 sm:$0xff] }
 0xc18   : > { %3744 = vtanh.f32 %v1855_v29  ;;  %v1854_v30 = vadd.f32 %v1852_v27, %v1844_v21 }
 0xc1a   : > { %v1856_v31 = vmul.f32 0.7978846, %v1854_v30  ;;  %v3139_v30 = vld [vmem:[%s5025_s19] ss:$0 sm:$0xff] }
 0xc1c   : > { %3746 = vtanh.f32 %v1856_v31 }
 0xc25   : > { %v3745_v33 = vpop.eup %3744 }
 0xc26   : > { %v1859_v34 = vadd.f32 1.0, %v3745_v33 }
 0xc28   : > { %v1861_v54 = vmul.f32 0.5, %v1859_v34 }
 0xc29   : > { %v3747_v37 = vpop.eup %3746 }
 0xc2a   : > { %v1860_v10 = vadd.f32 1.0, %v3747_v37  ;;  %v1863_v55 = vmul.f32 %v1861_v54, %v1841_v17  ;;  %v3681_v17 = vld [vmem:[%s5014_s8 + $0x40] ss:$8 sps:$4 sm:$0xff]  }
 0xc2b   : > { %v4806_v54 = vld [vmem:[%s5015_s9 + $0x2] sm:$0x3] }
 0xc2c   : > { %v1862_v32 = vmul.f32 0.5, %v1860_v10 }
 0xc2e   : > { %v1864_v38 = vmul.f32 %v1862_v32, %v1844_v21  ;;  %v2040_v32 = vrot.slane %v4806_v54, %v4541_v58 }
 0xc30   : > { %v1881_v39 = vpack.c.bf16 %v1864_v38, %v1863_v55 }
 0xc32   : > { %3385 = vmatmul.mubr.bf16.vlgmr.msra.gmra.mxu0 %v1881_v39 }
 0xcf2   : > { %v1971_v42 = vpop.f32.mrf.mxu0 }
 0xcf3   : > { %v1972_v43 = vadd.f32 %v3129_v41, %v1971_v42 }
 0xcf4   : > { %v3386_v44 = vpop.f32.mrf.mxu0 }
 0xcf5   : > { %v1978_v47 = vadd.f32 %v1972_v43, %v1761_v4 }
 0xcf6   : > { %v1974_v49 = vpop.f32.mrf.mxu0 }
 0xcf7   : > { %v1975_v51 = vadd.f32 %v3129_v41, %v1974_v49  ;;  %v1982_v53 = vsel %vm1038_vm6, %v1978_v47, 0.0 }
 0xcf8   : > { %1983 = vadd.xlane.f32.xlu1 %v1982_v53  ;;  %v3387_v56 = vpop.f32.mrf.mxu0 }
 0xcf9   : > { %v1979_v61 = vadd.f32 %v1975_v51, %v4725_v5  ;;  %v3674_v5 = vld [vmem:[%s5014_s8 + $0x74] ss:$8 sps:$4 sm:$0xff]  }
 0xcfa   : > { %2098 = vmatprep.subr.bf16.mxu1 %v3674_v5 }
 0xcfb   : > { %v1985_v57 = vsel %vm1038_vm6, %v1979_v61, 0.0  ;;  %2099 = vmatpush1.bf16.msra.mxu1 %v3672_v50 }
 0xcfc   : > { %1986 = vadd.xlane.f32.xlu0 %v1985_v57  ;;  %2100 = vmatprep.subr.bf16.mxu1 %v3677_v11 }
 0xcff   : > { %2101 = vmatpush1.bf16.msra.mxu1 %v3675_v12 }
 0xd00   : > { %2102 = vmatprep.subr.bf16.mxu1 %v3680_v13 }
 0xd03   : > { %2103 = vmatpush1.bf16.msra.mxu1 %v3678_v14 }
 0xd04   : > { %2104 = vmatprep.subr.bf16.mxu1 %v3683_v16 }
 0xd07   : > { %2105 = vmatpush1.bf16.msra.mxu1 %v3681_v17 }
 0xd81   : > { %v1984_v63 = vpop.xlane.xlu1 %1983 }
 0xd82   : > { %v1988_v0 = vmul.f32 0.015625, %v1984_v63 }
 0xd84   : > { %v1990_v1 = vsub.f32 %v1978_v47, %v1988_v0 }
 0xd85   : > { %v1987_v3 = vpop.xlane.xlu0 %1986 }
 0xd86   : > { %v1989_v6 = vmul.f32 0.015625, %v1987_v3  ;;  %v1992_v7 = vmul.f32 %v1990_v1, %v1990_v1 }
 0xd88   : > { %v1991_v9 = vsub.f32 %v1979_v61, %v1989_v6  ;;  %v1994_v4 = vsel %vm1038_vm6, %v1992_v7, 0.0 }
 0xd89   : > { %1995 = vadd.xlane.f32.xlu1 %v1994_v4 }
 0xd8a   : > { %v1993_v46 = vmul.f32 %v1991_v9, %v1991_v9 }
 0xd8c   : > { %v1997_v35 = vsel %vm1038_vm6, %v1993_v46, 0.0 }
 0xd8d   : > { %1998 = vadd.xlane.f32.xlu0 %v1997_v35 }
 0xe12   : > { %v1996_v18 = vpop.xlane.xlu1 %1995 }
 0xe13   : > { %v2000_v19 = vmul.f32 0.015625, %v1996_v18 }
 0xe15   : > { %v2002_v20 = vadd.f32 1e-05, %v2000_v19 }
 0xe16   : > { %v1999_v59 = vpop.xlane.xlu0 %1998 }
 0xe17   : > { %3748 = vrsqrt.f32 %v2002_v20  ;;  %v2001_v21 = vmul.f32 0.015625, %v1999_v59 }
 0xe19   : > { %v2003_v22 = vadd.f32 1e-05, %v2001_v21 }
 0xe1b   : > { %3750 = vrsqrt.f32 %v2003_v22 }
 0xe24   : > { %v3749_v62 = vpop.eup %3748 }
 0xe25   : > { %v2006_v24 = vmul.f32 %v3749_v62, %v1990_v1 }
 0xe27   : > { %v2014_v27 = vmul.f32 %v3138_v25, %v2006_v24 }
 0xe28   : > { %v3751_v26 = vpop.eup %3750 }
 0xe29   : > { %v2007_v29 = vmul.f32 %v3751_v26, %v1991_v9  ;;  %v4796_v33 = vadd.f32 %v3139_v30, %v2014_v27 }
 0xe2b   : > { %v2015_v31 = vmul.f32 %v3138_v25, %v2007_v29 }
 0xe2d   : > { %v4798_v34 = vadd.f32 %v3139_v30, %v2015_v31 }
 0xe2f   : > { %v2033_v37 = vpack.c.bf16 %v4798_v34, %v4796_v33 }
 0xe31   : > { %3157 = vmatmul.mubr.msk.bf16.vlgmr.msra.gmra.mxu1 %vm1038_vm6, %v2033_v37 }
 0xef1   : > { %v2124_v10 = vpop.f32.mrf.mxu1 }
 0xef2   : > { %v2125_v39 = vadd.f32 %v2124_v10, %v2040_v32 }
 0xef3   : > { %v4810_v55 = vpop.f32.mrf.mxu1 }
 0xef5   : > { %v2128_v38 = vpop.f32.mrf.mxu1 }
 0xef6   : > { %v2129_v41 = vadd.f32 %v2128_v38, %v2040_v32 }
 0xef7   : > { %v4834_v0 = vpop.f32.mrf.mxu1 }
 0xef8   : > { %v2133_v42 = vpack.c.bf16 %v2129_v41, %v2125_v39 }
 0xefa   : > { %2138 = vrot.lane.b32.xlu0 %v2133_v42, %s4124_s26  ;;  %2140 = vrot.lane.b32.xlu1 %v2133_v42, %s5082_s25 }
 0xefb   : > { %3396 = vmatprep.mubr.msk.bf16.mxu1 %vm853_vm9, %v2133_v42 }
 0xefe   : > { %2136 = vrot.lane.b32.xlu1 %v2133_v42, %s5083_s4 }
 0xf6c   : > { %v2141_v43 = vpop.permute.xlu1 %2140  ;;  %v2139_v44 = vpop.permute.xlu0 %2138 }
 0xf6d   : > { %2158 = vrot.lane.b32.xlu1 %v2141_v43, %s5084_s16 }
 0xf70   : > { %v2137_v47 = vpop.permute.xlu1 %2136 }
 0xf71   : > { %2156 = vrot.lane.b32.xlu1 %v2139_v44, %s5084_s16  ;;  %2154 = vrot.lane.b32.xlu0 %v2137_v47, %s5084_s16 }
 0xf75   : > { %2152 = vrot.lane.b32.xlu1 %v2133_v42, %s5084_s16 }
 0xfdf   : > { %v2159_v58 = vpop.permute.xlu1 %2158 }
 0xfe0   : > { %v2182_v49 = vsel %vm853_vm9, %v2159_v58, 0  ;;  %3468 = vmatprep.subr.msk.bf16.mxu1 %vm853_vm9, %v2159_v58 }
 0xfe1   : > { %3389 = vmatpush3.bf16.xpose.msra.mxu1 %v2182_v49 }
 0xfe3   : > { %v2157_v51 = vpop.permute.xlu1 %2156  ;;  %v2155_v56 = vpop.permute.xlu0 %2154 }
 0xfe4   : > { %3469 = vmatprep.subr.msk.bf16.mxu1 %vm853_vm9, %v2157_v51  ;;  %v2179_v53 = vsel %vm853_vm9, %v2157_v51, 0  ;;  %v2176_v61 = vsel %vm853_vm9, %v2155_v56, 0 }
 0xfe7   : > { %v2153_v57 = vpop.permute.xlu1 %2152 }
 0xfe8   : > { %v2173_v63 = vsel %vm853_vm9, %v2153_v57, 0 }
 0xfe9   : > { %3391 = vmatpush3.bf16.xpose.msra.mxu1 %v2179_v53 }
 0xfea   : > { %3470 = vmatprep.subr.msk.bf16.mxu1 %vm853_vm9, %v2155_v56 }
 0xff1   : > { %3393 = vmatpush3.bf16.xpose.msra.mxu1 %v2176_v61 }
 0xff2   : > { %3471 = vmatprep.subr.msk.bf16.mxu1 %vm853_vm9, %v2153_v57  ;;  %v2044_v57 = vrot.slane %v4806_v54, %v1227_v8 }
 0xff9   : > { %3395 = vmatpush3.bf16.xpose.msra.mxu1 %v2173_v63  ;;  %v2131_v63 = vadd.f32 %v4834_v0, %v2044_v57 }
 0xffa   : > { %3432 = vmatprep.subr.bf16.mxu1 %v4119_v15 }
0x1000   : > { %3397 = vmatmul.mubr.msk.bf16.vlgmr.msra.gmra.mxu1 %vm853_vm9, %v2137_v47 }
0x1001   : > { %3400 = vmatprep.mubr.msk.bf16.mxu1 %vm853_vm9, %v2139_v44 }
0x1008   : > { %3401 = vmatmul.mubr.msk.bf16.gmra.mxu1 %vm853_vm9, %v2141_v43 }
0x1009   : > { %3440 = vmatprep.mubr.msk.bf16.mxu1 %vm4120_vm1, %v4119_v15 }
0x10c0   : > { %v3398_v1 = vpop.f32.mrf.mxu1 }
0x10c1   : > { %v2227_v9 = vadd.f32 %v3398_v1, %v4586_v23  ;;  %v2127_v1 = vadd.f32 %v4810_v55, %v2044_v57 }
0x10c2   : > { %v2218_v3 = vpop.f32.mrf.mxu1 }
0x10c3   : > { %v2219_v6 = vadd.f32 %v2218_v3, %v4592_v28  ;;  %v2255_v12 = vsel %vm1038_vm6, %v2227_v9, -inf  ;;  %v2134_v3 = vpack.c.bf16 %v2131_v63, %v2127_v1 }
0x10c4   : > { %v3399_v7 = vpop.f32.mrf.mxu1 }
0x10c5   : > { %v2249_v4 = vsel %vm1038_vm6, %v2219_v6, -inf  ;;  %v2230_v50 = vadd.f32 %v3399_v7, %v4608_v40 }
0x10c6   : > { %v2221_v46 = vpop.f32.mrf.mxu1  ;;  %2250 = vmax.xlane.f32.xlu0 %v2249_v4 }
0x10c7   : > { %v2222_v35 = vadd.f32 %v2221_v46, %v4602_v36  ;;  %v2258_v23 = vsel %vm1038_vm6, %v2230_v50, -inf }
0x10c8   : > { %v3402_v5 = vpop.f32.mrf.mxu1 }
0x10c9   : > { %v2252_v11 = vsel %vm1038_vm6, %v2222_v35, -inf  ;;  %v2243_v36 = vadd.f32 %v3402_v5, %v4621_v52 }
0x10ca   : > { %v2234_v13 = vpop.f32.mrf.mxu1  ;;  %2253 = vmax.xlane.f32.xlu1 %v2252_v11  ;;  %2256 = vmax.xlane.f32.xlu0 %v2255_v12 }
0x10cb   : > { %v2235_v14 = vadd.f32 %v2234_v13, %v4615_v45  ;;  %v2267_v20 = vsel %vm1038_vm6, %v2243_v36, -inf }
0x10cc   : > { %v3403_v28 = vpop.f32.mrf.mxu1 }
0x10cd   : > { %v2246_v40 = vadd.f32 %v3403_v28, %v4632_v2  ;;  %v2261_v19 = vsel %vm1038_vm6, %v2235_v14, -inf }
0x10ce   : > { %v2237_v16 = vpop.f32.mrf.mxu1  ;;  %2259 = vmax.xlane.f32.xlu0 %v2258_v23 }
0x10cf   : > { %v4846_v17 = vadd.f32 %v2237_v16, %v4628_v60  ;;  %v2270_v45 = vsel %vm1038_vm6, %v2246_v40, -inf }
0x10d1   : > { %v2264_v18 = vsel %vm1038_vm6, %v4846_v17, -inf }
0x10d2   : > { %2265 = vmax.xlane.f32.xlu1 %v2264_v18  ;;  %2262 = vmax.xlane.f32.xlu0 %v2261_v19 }
0x10d6   : > { %2271 = vmax.xlane.f32.xlu1 %v2270_v45  ;;  %2268 = vmax.xlane.f32.xlu0 %v2267_v20 }
0x114f   : > { %v2251_v59 = vpop.xlane.xlu0 %2250 }
0x1150   : > { %v2273_v60 = vsub.f32 %v2219_v6, %v2251_v59 }
0x1152   : > { %v2281_v24 = vmul.f32 1.442695, %v2273_v60 }
0x1153   : > { %v2254_v21 = vpop.xlane.xlu1 %2253  ;;  %v2257_v22 = vpop.xlane.xlu0 %2256 }
0x1154   : > { %v2275_v52 = vsub.f32 %v2227_v9, %v2257_v22  ;;  %v2274_v62 = vsub.f32 %v2222_v35, %v2254_v21 }
0x1156   : > { %v2285_v2 = vmul.f32 1.442695, %v2275_v52  ;;  %v2283_v29 = vmul.f32 1.442695, %v2274_v62 }
0x1157   : > { %v2260_v25 = vpop.xlane.xlu0 %2259 }
0x1158   : > { %v2276_v26 = vsub.f32 %v2230_v50, %v2260_v25  ;;  %3752 = vpow2.f32 %v2285_v2 }
0x1159   : > { %3754 = vpow2.f32 %v2281_v24 }
0x115a   : > { %v2287_v27 = vmul.f32 1.442695, %v2276_v26 }
0x115b   : > { %v2263_v30 = vpop.xlane.xlu0 %2262  ;;  %v2266_v6 = vpop.xlane.xlu1 %2265 }
0x115c   : > { %3756 = vpow2.f32 %v2287_v27  ;;  %v2277_v31 = vsub.f32 %v2235_v14, %v2263_v30  ;;  %v2278_v4 = vsub.f32 %v4846_v17, %v2266_v6 }
0x115d   : > { %3758 = vpow2.f32 %v2283_v29 }
0x115e   : > { %v2289_v38 = vmul.f32 1.442695, %v2277_v31  ;;  %v2291_v35 = vmul.f32 1.442695, %v2278_v4 }
0x115f   : > { %v2269_v37 = vpop.xlane.xlu0 %2268  ;;  %v2272_v7 = vpop.xlane.xlu1 %2271 }
0x1160   : > { %v2279_v10 = vsub.f32 %v2243_v36, %v2269_v37  ;;  %v2280_v9 = vsub.f32 %v2246_v40, %v2272_v7  ;;  %v3684_v37 = vld [vmem:[%s5016_s10 + $0x38] sm:$0xff]  }
0x1162   : > { %v2293_v32 = vmul.f32 1.442695, %v2279_v10  ;;  %v2295_v46 = vmul.f32 1.442695, %v2280_v9  ;;  %v3685_v10 = vld [vmem:[%s5016_s10 + $0x30] sm:$0xff]  }
0x1164   : > { %3760 = vpow2.f32 %v2293_v32 }
0x1165   : > { %v4855_v39 = vpop.eup %3752  ;;  %3762 = vpow2.f32 %v2289_v38 }
0x1166   : > { %v2303_v41 = vsel %vm1038_vm6, %v4855_v39, 0.0  ;;  %v3755_v42 = vpop.eup %3754  ;;  %3764 = vpow2.f32 %v2295_v46 }
0x1167   : > { %2304 = vadd.xlane.f32.xlu0 %v2303_v41  ;;  %v2297_v58 = vsel %vm1038_vm6, %v3755_v42, 0.0  ;;  %3766 = vpow2.f32 %v2291_v35 }
0x1169   : > { %v4859_v43 = vpop.eup %3756 }
0x116a   : > { %v2306_v44 = vsel %vm1038_vm6, %v4859_v43, 0.0  ;;  %v3759_v47 = vpop.eup %3758 }
0x116b   : > { %2307 = vadd.xlane.f32.xlu1 %v2306_v44  ;;  %2298 = vadd.xlane.f32.xlu0 %v2297_v58  ;;  %v2300_v49 = vsel %vm1038_vm6, %v3759_v47, 0.0  ;;  %v3687_v44 = vld [vmem:[%s5016_s10 + $0x20] sm:$0xff]  }
0x116f   : > { %2301 = vadd.xlane.f32.xlu1 %v2300_v49 }
0x1171   : > { %v4865_v51 = vpop.eup %3760 }
0x1172   : > { %v2315_v53 = vsel %vm1038_vm6, %v4865_v51, 0.0  ;;  %v4869_v56 = vpop.eup %3762 }
0x1173   : > { %2316 = vadd.xlane.f32.xlu0 %v2315_v53  ;;  %v2309_v61 = vsel %vm1038_vm6, %v4869_v56, 0.0  ;;  %v3765_v48 = vpop.eup %3764 }
0x1174   : > { %v2318_v8 = vsel %vm1038_vm6, %v3765_v48, 0.0  ;;  %v3767_v54 = vpop.eup %3766 }
0x1175   : > { %v2312_v55 = vsel %vm1038_vm6, %v3767_v54, 0.0 }
0x1177   : > { %2310 = vadd.xlane.f32.xlu0 %v2309_v61 }
0x1180   : > { %2146 = vrot.lane.b32.xlu1 %v2134_v3, %s4124_s26  ;;  %s5087_s26 = smov 32  }
0x118d   : > { %2149 = vrot.lane.b32.xlu0 %v2134_v3, %s5082_s25  ;;  %s5085_s25 = smov 16  }
0x11a4   : > { %2319 = vadd.xlane.f32.xlu1 %v2318_v8 }
0x11a8   : > { %2313 = vadd.xlane.f32.xlu1 %v2312_v55 }
0x11b9   : > { %2143 = vrot.lane.b32.xlu1 %v2134_v3, %s5083_s4  ;;  %s5086_s4 = smov 48  }
0x11f0   : > { %v2305_v0 = vpop.xlane.xlu0 %2304 }
0x11f4   : > { %v2308_v5 = vpop.xlane.xlu1 %2307  ;;  %v2299_v50 = vpop.xlane.xlu0 %2298 }
0x11f5   : > { %3768 = vrcp.f32 %v2299_v50 }
0x11f8   : > { %v2302_v11 = vpop.xlane.xlu1 %2301 }
0x11f9   : > { %3770 = vrcp.f32 %v2302_v11 }
0x11fa   : > { %3772 = vrcp.f32 %v2308_v5  ;;  %v3175_v5 = vld [vmem:[%s5017_s11 + $0x1] ss:$0 sm:$0xff] }
0x11fb   : > { %3774 = vrcp.f32 %v2305_v0 }
0x11fc   : > { %v2317_v12 = vpop.xlane.xlu0 %2316  ;;  %v2147_v16 = vpop.permute.xlu1 %2146 }
0x1200   : > { %v2311_v13 = vpop.xlane.xlu0 %2310 }
0x1201   : > { %3776 = vrcp.f32 %v2311_v13 }
0x1202   : > { %v3769_v28 = vpop.eup %3768 }
0x1203   : > { %v2329_v17 = vmul.f32 %v3769_v28, %v3755_v42 }
0x1204   : > { %v2150_v14 = vpop.permute.xlu0 %2149 }
0x1205   : > { %3404 = vmatprep.subr.bf16.mxu0 %v2150_v14 }
0x1206   : > { %v3771_v23 = vpop.eup %3770  ;;  %3405 = vmatpush3.bf16.msra.mxu0 %v2150_v14 }
0x1207   : > { %v2330_v36 = vmul.f32 %v3771_v23, %v3759_v47  ;;  %3406 = vmatprep.subr.bf16.mxu0 %v2147_v16  ;;  %v3773_v45 = vpop.eup %3772 }
0x1208   : > { %v3775_v59 = vpop.eup %3774  ;;  %v2332_v60 = vmul.f32 %v3773_v45, %v4859_v43 }
0x1209   : > { %v2337_v40 = vpack.c.bf16 %v2330_v36, %v2329_v17  ;;  %v2331_v21 = vmul.f32 %v3775_v59, %v4855_v39  ;;  %v3686_v39 = vld [vmem:[%s5016_s10 + $0x28] sm:$0xff]  }
0x120a   : > { %3407 = vmatpush3.bf16.msra.mxu0 %v2147_v16 }
0x120b   : > { %3412 = vmatprep.mubr.msk.bf16.mxu0 %vm1038_vm6, %v2337_v40  ;;  %v2338_v52 = vpack.c.bf16 %v2332_v60, %v2331_v21 }
0x120e   : > { %v3777_v22 = vpop.eup %3776 }
0x120f   : > { %v2333_v25 = vmul.f32 %v3777_v22, %v4869_v56 }
0x122d   : > { %v2320_v18 = vpop.xlane.xlu1 %2319 }
0x122e   : > { %3778 = vrcp.f32 %v2320_v18 }
0x122f   : > { %3780 = vrcp.f32 %v2317_v12 }
0x1231   : > { %v2314_v19 = vpop.xlane.xlu1 %2313 }
0x1232   : > { %3782 = vrcp.f32 %v2314_v19 }
0x1235   : > { %v2144_v20 = vpop.permute.xlu1 %2143 }
0x1236   : > { %3408 = vmatprep.subr.bf16.mxu0 %v2144_v20 }
0x1237   : > { %3409 = vmatpush3.bf16.msra.mxu0 %v2144_v20 }
0x1238   : > { %3410 = vmatprep.subr.bf16.mxu0 %v2134_v3 }
0x123b   : > { %3411 = vmatpush3.bf16.msra.mxu0 %v2134_v3  ;;  %v3779_v62 = vpop.eup %3778 }
0x123c   : > { %3420 = vmatprep.subr.bf16.mxu0 %v4119_v15  ;;  %v3781_v2 = vpop.eup %3780  ;;  %v2336_v29 = vmul.f32 %v3779_v62, %v3765_v48  ;;  %v3690_v62 = vld [vmem:[%s5020_s14 + $0x28] sm:$0xff]  }
0x123d   : > { %v2335_v30 = vmul.f32 %v3781_v2, %v4865_v51  ;;  %v3691_v2 = vld [vmem:[%s5020_s14 + $0x20] sm:$0xff]  }
0x123e   : > { %3413 = vmatmul.mubr.msk.bf16.vlgmr.msra.gmra.mxu0 %vm1038_vm6, %v2338_v52  ;;  %v3689_v52 = vld [vmem:[%s5020_s14 + $0x30] sm:$0xff]  }
0x123f   : > { %v3783_v24 = vpop.eup %3782  ;;  %v2340_v31 = vpack.c.bf16 %v2336_v29, %v2335_v30  ;;  %3421 = vmatpush3.bf16.msra.mxu0 %v3684_v37 }
0x1240   : > { %v2334_v26 = vmul.f32 %v3783_v24, %v3767_v54  ;;  %3422 = vmatprep.subr.bf16.mxu0 %v4119_v15 }
0x1242   : > { %v2339_v27 = vpack.c.bf16 %v2334_v26, %v2333_v25 }
0x1243   : > { %3423 = vmatpush3.bf16.msra.mxu0 %v3685_v10  ;;  %v3181_v10 = vld [vmem:[#allocation11 + $0x1] ss:$0 sm:$0xff] }
0x1244   : > { %3416 = vmatprep.mubr.msk.bf16.mxu0 %vm1038_vm6, %v2339_v27  ;;  %3424 = vmatprep.subr.bf16.mxu0 %v4119_v15 }
0x1246   : > { %3417 = vmatmul.mubr.msk.bf16.gmra.mxu0 %vm1038_vm6, %v2340_v31 }
0x1247   : > { %3428 = vmatprep.mubr.msk.bf16.mxu0 %vm4120_vm1, %v4119_v15  ;;  %3425 = vmatpush3.bf16.msra.mxu0 %v3686_v39 }
0x1248   : > { %3426 = vmatprep.subr.bf16.mxu0 %v4119_v15 }
0x124b   : > { %3427 = vmatpush3.bf16.msra.mxu0 %v3687_v44 }
0x124c   : > { %3444 = vmatprep.subr.bf16.mxu0 %v4119_v15 }
0x12fe   : > { %v3414_v32 = vpop.f32.mrf.mxu0 }
0x1300   : > { %v2387_v38 = vpop.f32.mrf.mxu0 }
0x1302   : > { %v3415_v41 = vpop.f32.mrf.mxu0 }
0x1303   : > { %v3615_v42 = vpack.i.bf16 %v3415_v41, %v3414_v32  ;;  %v3182_v41 = vld [vmem:[#allocation12 + $0x1] ss:$0 sm:$0xff] }
0x1304   : > { %v2390_v43 = vpop.f32.mrf.mxu0 }
0x1305   : > { %3616 = vrot.lane.b32.xlu1 %v3615_v42, %s5085_s25 }
0x1306   : > { %v3418_v47 = vpop.f32.mrf.mxu0 }
0x1308   : > { %v2403_v58 = vpop.f32.mrf.mxu0 }
0x130a   : > { %v3419_v49 = vpop.f32.mrf.mxu0 }
0x130b   : > { %v3625_v51 = vpack.i.bf16 %v3419_v49, %v3418_v47  ;;  %v3693_v49 = vld [vmem:[%s5081_s7 + $0x70] sm:$0xff]  }
0x130c   : > { %v2406_v53 = vpop.f32.mrf.mxu0 }
0x130d   : > { %v3620_v56 = vpack.i.bf16 %v2406_v53, %v2403_v58  ;;  %3626 = vrot.lane.b32.xlu1 %v3625_v51, %s5086_s4  ;;  %v3692_v58 = vld [vmem:[%s5081_s7 + $0x78] sm:$0xff]   ;;  %v3694_v51 = vld [vmem:[%s5081_s7 + $0x68] sm:$0xff]   ;;  %v3695_v53 = vld [vmem:[%s5081_s7 + $0x60] sm:$0xff]  }
0x130f   : > { %3621 = vrot.lane.b32.xlu0 %v3620_v56, %s5087_s26  ;;  %v3696_v56 = vld [vmem:[%s5081_s7 + $0x58] sm:$0xff]  }
0x1377   : > { %v3617_v61 = vpop.permute.xlu1 %3616 }
0x1378   : > { %v3619_v57 = vunpack.i.h.bf16 %v3617_v61  ;;  %v3618_v63 = vunpack.i.l.bf16 %v3617_v61  ;;  %v3697_v61 = vld [vmem:[%s5081_s7 + $0x50] sm:$0xff]  }
0x137a   : > { %v2442_v9 = vsel %vm853_vm9, %v2387_v38, %v3618_v63  ;;  %v2443_v4 = vsel %vm853_vm9, %v2390_v43, %v3619_v57  ;;  %v3698_v57 = vld [vmem:[%s5081_s7 + $0x48] sm:$0xff]   ;;  %v3699_v63 = vld [vmem:[%s5081_s7 + $0x40] sm:$0xff]  }
0x137f   : > { %v3627_v1 = vpop.permute.xlu1 %3626 }
0x1380   : > { %v3629_v46 = vunpack.i.h.bf16 %v3627_v1  ;;  %v3628_v35 = vunpack.i.l.bf16 %v3627_v1  ;;  %v3191_v1 = vld [vmem:[#allocation14 + $0x1] ss:$0 sm:$0xff] }
0x1381   : > { %v3622_v3 = vpop.permute.xlu0 %3621 }
0x1382   : > { %v3624_v6 = vunpack.i.h.bf16 %v3622_v3  ;;  %v3623_v7 = vunpack.i.l.bf16 %v3622_v3 }
0x1384   : > { %v2445_v48 = vsel %vm855_vm0, %v2443_v4, %v3624_v6  ;;  %v2444_v8 = vsel %vm855_vm0, %v2442_v9, %v3623_v7 }
0x1385   : > { %v2447_v54 = vsel %vm857_vm11, %v2445_v48, %v3629_v46  ;;  %v2446_v55 = vsel %vm857_vm11, %v2444_v8, %v3628_v35 }
0x1386   : > { %v2457_v0 = vpack.c.bf16 %v2447_v54, %v2446_v55 }
0x1388   : > { %3429 = vmatmul.mubr.msk.bf16.vlgmr.msra.gmra.mxu0 %vm1038_vm6, %v2457_v0 }
0x1389   : > { %3460 = vmatprep.mubr.msk.bf16.mxu0 %vm4120_vm1, %v4119_v15  ;;  %3445 = vmatpush3.bf16.msra.mxu0 %v3692_v58  ;;  %v3225_v58 = vld [vmem:[%s5025_s19 + $0x1] ss:$0 sm:$0xff] }
0x138a   : > { %3446 = vmatprep.subr.bf16.mxu0 %v4119_v15 }
0x138d   : > { %3447 = vmatpush3.bf16.msra.mxu0 %v3693_v49 }
0x138e   : > { %3448 = vmatprep.subr.bf16.mxu0 %v4119_v15 }
0x1391   : > { %3449 = vmatpush3.bf16.msra.mxu0 %v3694_v51 }
0x1392   : > { %3450 = vmatprep.subr.bf16.mxu0 %v4119_v15 }
0x1395   : > { %3451 = vmatpush3.bf16.msra.mxu0 %v3695_v53 }
0x1396   : > { %3452 = vmatprep.subr.bf16.mxu0 %v4119_v15 }
0x1399   : > { %3453 = vmatpush3.bf16.msra.mxu0 %v3696_v56 }
0x139a   : > { %3454 = vmatprep.subr.bf16.mxu0 %v4119_v15 }
0x139d   : > { %3455 = vmatpush3.bf16.msra.mxu0 %v3697_v61 }
0x139e   : > { %3456 = vmatprep.subr.bf16.mxu0 %v4119_v15 }
0x13a1   : > { %3457 = vmatpush3.bf16.msra.mxu0 %v3698_v57 }
0x13a2   : > { %3458 = vmatprep.subr.bf16.mxu0 %v4119_v15 }
0x13a5   : > { %3459 = vmatpush3.bf16.msra.mxu0 %v3699_v63 }
0x1448   : > { %v2527_v50 = vpop.f32.mrf.mxu0 }
0x1449   : > { %v2528_v11 = vadd.f32 %v3175_v5, %v2527_v50 }
0x144a   : > { %v3430_v12 = vpop.f32.mrf.mxu0 }
0x144b   : > { %v2534_v13 = vadd.f32 %v2528_v11, %v4796_v33 }
0x144c   : > { %v2530_v28 = vpop.f32.mrf.mxu0 }
0x144d   : > { %v2531_v14 = vadd.f32 %v3175_v5, %v2530_v28  ;;  %v2540_v23 = vsel %vm1038_vm6, %v2534_v13, 0.0 }
0x144e   : > { %2541 = vadd.xlane.f32.xlu0 %v2540_v23  ;;  %v3431_v16 = vpop.f32.mrf.mxu0 }
0x144f   : > { %v2535_v17 = vadd.f32 %v2531_v14, %v4798_v34  ;;  %v3688_v34 = vld [vmem:[%s5020_s14 + $0x38] sm:$0xff]  }
0x1450   : > { %3433 = vmatpush3.bf16.msra.mxu1 %v3688_v34 }
0x1451   : > { %v2543_v36 = vsel %vm1038_vm6, %v2535_v17, 0.0  ;;  %3434 = vmatprep.subr.bf16.mxu1 %v4119_v15 }
0x1452   : > { %2544 = vadd.xlane.f32.xlu1 %v2543_v36 }
0x1454   : > { %3435 = vmatpush3.bf16.msra.mxu1 %v3689_v52 }
0x1455   : > { %3436 = vmatprep.subr.bf16.mxu1 %v4119_v15 }
0x1458   : > { %3437 = vmatpush3.bf16.msra.mxu1 %v3690_v62 }
0x1459   : > { %3438 = vmatprep.subr.bf16.mxu1 %v4119_v15 }
0x145c   : > { %3439 = vmatpush3.bf16.msra.mxu1 %v3691_v2 }
0x14d7   : > { %v2542_v40 = vpop.xlane.xlu0 %2541 }
0x14d8   : > { %v2546_v18 = vmul.f32 0.015625, %v2542_v40 }
0x14da   : > { %v2548_v19 = vsub.f32 %v2534_v13, %v2546_v18  ;;  %v3213_v18 = vld [vmem:[#allocation15 + $0x1] ss:$0 sm:$0xff] }
0x14db   : > { %v2545_v45 = vpop.xlane.xlu1 %2544 }
0x14dc   : > { %v2547_v20 = vmul.f32 0.015625, %v2545_v45  ;;  %v2550_v59 = vmul.f32 %v2548_v19, %v2548_v19 }
0x14de   : > { %v2549_v60 = vsub.f32 %v2535_v17, %v2547_v20  ;;  %v2552_v33 = vsel %vm1038_vm6, %v2550_v59, 0.0 }
0x14df   : > { %2553 = vadd.xlane.f32.xlu0 %v2552_v33 }
0x14e0   : > { %v2551_v21 = vmul.f32 %v2549_v60, %v2549_v60 }
0x14e2   : > { %v2555_v22 = vsel %vm1038_vm6, %v2551_v21, 0.0 }
0x14e3   : > { %2556 = vadd.xlane.f32.xlu0 %v2555_v22 }
0x1568   : > { %v2554_v24 = vpop.xlane.xlu0 %2553 }
0x1569   : > { %v2558_v25 = vmul.f32 0.015625, %v2554_v24 }
0x156b   : > { %v2560_v26 = vadd.f32 1e-05, %v2558_v25 }
0x156c   : > { %v2557_v29 = vpop.xlane.xlu0 %2556 }
0x156d   : > { %3784 = vrsqrt.f32 %v2560_v26  ;;  %v2559_v27 = vmul.f32 0.015625, %v2557_v29 }
0x156f   : > { %v2561_v30 = vadd.f32 1e-05, %v2559_v27 }
0x1571   : > { %3786 = vrsqrt.f32 %v2561_v30 }
0x157a   : > { %v3785_v31 = vpop.eup %3784 }
0x157b   : > { %v2564_v37 = vmul.f32 %v3785_v31, %v2548_v19 }
0x157d   : > { %v2572_v38 = vmul.f32 %v3181_v10, %v2564_v37 }
0x157e   : > { %v3787_v32 = vpop.eup %3786 }
0x157f   : > { %v2565_v39 = vmul.f32 %v3787_v32, %v2549_v60  ;;  %v2580_v43 = vadd.f32 %v3182_v41, %v2572_v38 }
0x1581   : > { %v2573_v42 = vmul.f32 %v3181_v10, %v2565_v39 }
0x1583   : > { %v4947_v44 = vadd.f32 %v3182_v41, %v2573_v42 }
0x1585   : > { %v2591_v47 = vpack.c.bf16 %v4947_v44, %v2580_v43 }
0x1587   : > { %3441 = vmatmul.mubr.msk.bf16.vlgmr.msra.gmra.mxu1 %vm1038_vm6, %v2591_v47 }
0x1647   : > { %v2661_v3 = vpop.f32.mrf.mxu1 }
0x1648   : > { %v2662_v6 = vadd.f32 %v3191_v1, %v2661_v3 }
0x1649   : > { %v3442_v7 = vpop.f32.mrf.mxu1 }
0x164a   : > { %v2668_v9 = vmul.f32 %v2662_v6, %v2662_v6 }
0x164b   : > { %v2664_v4 = vpop.f32.mrf.mxu1 }
0x164c   : > { %v2670_v46 = vmul.f32 %v2668_v9, %v2662_v6  ;;  %v2665_v35 = vadd.f32 %v3191_v1, %v2664_v4 }
0x164d   : > { %v3443_v48 = vpop.f32.mrf.mxu1 }
0x164e   : > { %v2672_v8 = vmul.f32 0.044715, %v2670_v46  ;;  %v2669_v54 = vmul.f32 %v2665_v35, %v2665_v35 }
0x1650   : > { %v2674_v55 = vadd.f32 %v2672_v8, %v2662_v6  ;;  %v2671_v0 = vmul.f32 %v2669_v54, %v2665_v35 }
0x1652   : > { %v2676_v5 = vmul.f32 0.7978846, %v2674_v55  ;;  %v2673_v15 = vmul.f32 0.044715, %v2671_v0 }
0x1654   : > { %3788 = vtanh.f32 %v2676_v5  ;;  %v2675_v50 = vadd.f32 %v2673_v15, %v2665_v35 }
0x1656   : > { %v2677_v11 = vmul.f32 0.7978846, %v2675_v50 }
0x1658   : > { %3790 = vtanh.f32 %v2677_v11 }
0x1661   : > { %v3789_v12 = vpop.eup %3788 }
0x1662   : > { %v2680_v13 = vadd.f32 1.0, %v3789_v12 }
0x1664   : > { %v2682_v14 = vmul.f32 0.5, %v2680_v13  ;;  %v3226_v13 = vld [vmem:[#allocation17] ss:$0 sm:$0xff] }
0x1665   : > { %v3791_v28 = vpop.eup %3790 }
0x1666   : > { %v2681_v23 = vadd.f32 1.0, %v3791_v28  ;;  %v2684_v17 = vmul.f32 %v2682_v14, %v2662_v6  ;;  %v3227_v14 = vld [vmem:[#allocation18] ss:$0 sm:$0xff] }
0x1668   : > { %v2683_v16 = vmul.f32 0.5, %v2681_v23 }
0x166a   : > { %v2685_v36 = vmul.f32 %v2683_v16, %v2665_v35 }
0x166c   : > { %v2703_v40 = vpack.c.bf16 %v2685_v36, %v2684_v17 }
0x166e   : > { %3461 = vmatmul.mubr.bf16.vlgmr.msra.gmra.mxu0 %v2703_v40 }
0x172e   : > { %v2794_v19 = vpop.f32.mrf.mxu0 }
0x172f   : > { %v2795_v45 = vadd.f32 %v3213_v18, %v2794_v19 }
0x1730   : > { %v3462_v20 = vpop.f32.mrf.mxu0 }
0x1731   : > { %v2801_v59 = vadd.f32 %v2795_v45, %v2580_v43 }
0x1732   : > { %v2797_v60 = vpop.f32.mrf.mxu0 }
0x1733   : > { %v2798_v33 = vadd.f32 %v3213_v18, %v2797_v60  ;;  %v2807_v21 = vsel %vm1038_vm6, %v2801_v59, 0.0 }
0x1734   : > { %2808 = vadd.xlane.f32.xlu1 %v2807_v21  ;;  %v3463_v22 = vpop.f32.mrf.mxu0 }
0x1735   : > { %v2802_v34 = vadd.f32 %v2798_v33, %v4947_v44  ;;  %v3224_v44 = vld [vmem:[%s5024_s18 + $0x1] ss:$0 sm:$0xff] }
0x1737   : > { %v2810_v52 = vsel %vm1038_vm6, %v2802_v34, 0.0 }
0x1738   : > { %2811 = vadd.xlane.f32.xlu0 %v2810_v52 }
0x17bd   : > { %v2809_v62 = vpop.xlane.xlu1 %2808 }
0x17be   : > { %v2813_v2 = vmul.f32 0.015625, %v2809_v62 }
0x17c0   : > { %v2815_v24 = vsub.f32 %v2801_v59, %v2813_v2 }
0x17c1   : > { %v2812_v25 = vpop.xlane.xlu0 %2811 }
0x17c2   : > { %v2814_v26 = vmul.f32 0.015625, %v2812_v25  ;;  %v2817_v29 = vmul.f32 %v2815_v24, %v2815_v24 }
0x17c4   : > { %v2816_v27 = vsub.f32 %v2802_v34, %v2814_v26  ;;  %v2819_v30 = vsel %vm1038_vm6, %v2817_v29, 0.0 }
0x17c5   : > { %2820 = vadd.xlane.f32.xlu1 %v2819_v30 }
0x17c6   : > { %v2818_v31 = vmul.f32 %v2816_v27, %v2816_v27 }
0x17c8   : > { %v2822_v37 = vsel %vm1038_vm6, %v2818_v31, 0.0 }
0x17c9   : > { %2823 = vadd.xlane.f32.xlu0 %v2822_v37 }
0x184e   : > { %v2821_v10 = vpop.xlane.xlu1 %2820 }
0x184f   : > { %v2825_v32 = vmul.f32 0.015625, %v2821_v10 }
0x1851   : > { %v2827_v38 = vadd.f32 1e-05, %v2825_v32 }
0x1852   : > { %v2824_v39 = vpop.xlane.xlu0 %2823 }
0x1853   : > { %3792 = vrsqrt.f32 %v2827_v38  ;;  %v2826_v41 = vmul.f32 0.015625, %v2824_v39 }
0x1855   : > { %v2828_v42 = vadd.f32 1e-05, %v2826_v41 }
0x1857   : > { %3794 = vrsqrt.f32 %v2828_v42 }
0x1860   : > { %v3793_v43 = vpop.eup %3792 }
0x1861   : > { %v2831_v47 = vmul.f32 %v3793_v43, %v2815_v24 }
0x1863   : > { %v2839_v49 = vmul.f32 %v3224_v44, %v2831_v47 }
0x1864   : > { %v3795_v51 = vpop.eup %3794 }
0x1865   : > { %v2847_v53 = vadd.f32 %v3225_v58, %v2839_v49  ;;  %v2832_v56 = vmul.f32 %v3795_v51, %v2816_v27 }
0x1867   : > { %v2851_v61 = vsel %vm1038_vm6, %v2847_v53, 0.0  ;;  %v2840_v57 = vmul.f32 %v3224_v44, %v2832_v56 }
0x1868   : > { %2852 = vadd.xlane.f32.xlu1 %v2851_v61 }
0x1869   : > { %v2848_v63 = vadd.f32 %v3225_v58, %v2840_v57 }
0x186b   : > { %v2854_v1 = vsel %vm1038_vm6, %v2848_v63, 0.0 }
0x186c   : > { %2855 = vadd.xlane.f32.xlu0 %v2854_v1 }
0x18f1   : > { %v2853_v3 = vpop.xlane.xlu1 %2852 }
0x18f2   : > { %v2857_v6 = vmul.f32 0.015625, %v2853_v3 }
0x18f4   : > { %v2859_v7 = vsub.f32 %v2847_v53, %v2857_v6 }
0x18f5   : > { %v2856_v9 = vpop.xlane.xlu0 %2855 }
0x18f6   : > { %v2858_v4 = vmul.f32 0.015625, %v2856_v9  ;;  %v2861_v46 = vmul.f32 %v2859_v7, %v2859_v7 }
0x18f8   : > { %v2860_v35 = vsub.f32 %v2848_v63, %v2858_v4  ;;  %v2863_v48 = vsel %vm1038_vm6, %v2861_v46, 0.0 }
0x18f9   : > { %2864 = vadd.xlane.f32.xlu1 %v2863_v48 }
0x18fa   : > { %v2862_v8 = vmul.f32 %v2860_v35, %v2860_v35 }
0x18fc   : > { %v2866_v54 = vsel %vm1038_vm6, %v2862_v8, 0.0 }
0x18fd   : > { %2867 = vadd.xlane.f32.xlu0 %v2866_v54 }
0x1982   : > { %v2865_v55 = vpop.xlane.xlu1 %2864 }
0x1983   : > { %v2869_v0 = vmul.f32 0.015625, %v2865_v55 }
0x1985   : > { %v2871_v5 = vadd.f32 1e-05, %v2869_v0 }
0x1986   : > { %v2868_v15 = vpop.xlane.xlu0 %2867 }
0x1987   : > { %3796 = vrsqrt.f32 %v2871_v5  ;;  %v2870_v50 = vmul.f32 0.015625, %v2868_v15 }
0x1989   : > { %v2872_v11 = vadd.f32 1e-05, %v2870_v50 }
0x198b   : > { %3798 = vrsqrt.f32 %v2872_v11 }
0x1994   : > { %v3797_v12 = vpop.eup %3796 }
0x1995   : > { %v2875_v28 = vmul.f32 %v3797_v12, %v2859_v7 }
0x1997   : > { %v2883_v23 = vmul.f32 %v3226_v13, %v2875_v28 }
0x1998   : > { %v3799_v16 = vpop.eup %3798 }
0x1999   : > { %v2876_v17 = vmul.f32 %v3799_v16, %v2860_v35  ;;  %v2891_v36 = vadd.f32 %v3227_v14, %v2883_v23 }
0x199b   : > { %v2884_v40 = vmul.f32 %v3226_v13, %v2876_v17 }
0x199d   : > { %v2892_v18 = vadd.f32 %v3227_v14, %v2884_v40 }
0x199f   : > { %2894 = vrot.lane.b32.xlu0 %v2892_v18, %s5084_s16 }
0x1a11   : > { %v2895_v19 = vpop.permute.xlu0 %2894 }
0x1a12   : > { %v2897_v45 = vsel %vm1038_vm6, %v2891_v36, %v2895_v19 }
0x1a13   : > { %2898 = vst [vmem:[%s822_s28] sm:$0xff] %v2897_v45 }
0x1a14 PF: > { %s45_s1 = sadd.s32 1, %s4104_s1  }
0x1a15   : > { %p42_p4 = scmp.ge.s32.totalorder %s45_s1, 4  }
0x1a17   :  { %44 = sbr.rel (!%p42_p4) target bundleno = 36 (0x24), region = 191 }
0x1a1c   :  { %2918 = vsyncpa [#allocation5], 1 }
0x1a1d   :  { %2920 = vsyncpa [#allocation5 + $0x1], 1 }
0x1a1e   :  { %2921 = vsyncpa [#allocation7], 1 }
0x1a1f   :  { %2922 = vsyncpa [#allocation10], 1 }
0x1a20   :  { %2923 = vsyncpa [#allocation13], 1 }
0x1a21   :  { %2924 = vsyncpa [#allocation16], 1 }
0x1a22   :  { %2925 = vsyncpa [#allocation19], 1 }

</bundles_post_ra>
